<compile_context>
chip_gen: v7x
topology: tpu7x:2x2x1
jax: 0.10.0
libtpu: 0.0.40
codegen_flags: <defaults>
</compile_context>

<pallas_src>
import numpy as np

import jax
import jax.numpy as jnp
from jax import lax
from jax.experimental import pallas as pl
from jax.experimental.pallas import tpu as pltpu

H, W = 105, 8            # spatial size produced by .view(B, 1, 105, 8)
HW = H * W               # 840 valid positions per image
PADHW = 896              # 7 * 128 lanes per image slab (56 zero pad lanes)
C1 = 64                  # conv1 output channels
EPS = 1e-5               # BatchNorm eps (PyTorch default)

# 3x3 tap offsets in the row-major flattened (105, 8) image, (ky, kx)-major order.
_TAPS = [(ky - 1, kx - 1) for ky in range(3) for kx in range(3)]
_TAP_OFFSETS = [8 * dy + dx for dy, dx in _TAPS]


def _roll_fwd(x, off):
    """result[..., i] = x[..., (i + off) mod n]  (XLU lane rotation; wrapped lanes are
    always killed by the tap masks, see invariant note at the top of the file)."""
    if off == 0:
        return x
    n = x.shape[-1]
    return pltpu.roll(x, shift=(-off) % n, axis=x.ndim - 1)


# ------------------------------------------------------------ fused kernel ---
def _generator_kernel(noise_ref, word_ref, masks_ref, wfn_ref, bfn_ref, wfw_ref, bfw_ref,
                      w1m_ref, gamma_ref, beta_ref, w2m_ref, b2_ref, out_ref):
    B = noise_ref.shape[0]
    N = B * PADHW

    # ---- fc_noise / fc_word: two small MXU matmuls (no zero block-diagonal) -----------
    yn = jnp.dot(noise_ref[...], wfn_ref[...],
                 preferred_element_type=jnp.float32) + bfn_ref[...]      # (B, 896)
    yw = jnp.dot(word_ref[...], wfw_ref[...],
                 preferred_element_type=jnp.float32) + bfw_ref[...]      # (B, 896)

    # channel-major, lane-dense slab: row c, lane b*896 + pos  (reshape is 128-aligned)
    x2 = jnp.concatenate([yn, yw], axis=0).reshape(2, N)                 # (2, N)

    # batch-independent per-tap validity masks (include pos < 840), tiled over batch
    m896 = masks_ref[...]                                                # (9, 896)
    masks = m896 if B == 1 else jnp.concatenate([m896] * B, axis=1)      # (9, N)

    # ---- conv1 (2 -> 64, 3x3, pad 1) as a single im2col MXU matmul --------------------
    cols = []
    for t, off in enumerate(_TAP_OFFSETS):
        cols.append(_roll_fwd(x2, off) * masks[t:t + 1, :])              # (2, N)
    xall = jnp.concatenate(cols, axis=0)                                 # (18, N)
    z = jnp.dot(w1m_ref[...], xall, preferred_element_type=jnp.float32)  # (64, N)
    # conv1 bias omitted: exactly cancelled by the batch-stat BatchNorm below.

    # ---- BatchNorm2d (training-mode biased batch stats over B*840 valid positions) ----
    # Pad lanes of z are exactly zero (all tap masks are 0 there), so one pass of
    # sum / sum-of-squares over all lanes with an explicit 1/(B*840) count is exact.
    inv_cnt = 1.0 / float(B * HW)
    s1 = jnp.sum(z, axis=1, keepdims=True)
    s2 = jnp.sum(z * z, axis=1, keepdims=True)
    mean = s1 * inv_cnt
    var = s2 * inv_cnt - mean * mean
    z = (z - mean) * lax.rsqrt(var + EPS)
    z = z * gamma_ref[...] + beta_ref[...]
    z = jnp.maximum(z, 0.0)                                              # ReLU

    # ---- conv2 (64 -> 1, 3x3, pad 1): MXU channel contraction + 9 rolled masked adds --
    p = jnp.dot(w2m_ref[...], z, preferred_element_type=jnp.float32)     # (9, N)
    acc = jnp.zeros((1, N), jnp.float32)
    for t, off in enumerate(_TAP_OFFSETS):
        acc = acc + _roll_fwd(p[t:t + 1, :], off) * masks[t:t + 1, :]
    out_ref[...] = acc + b2_ref[0]                                       # (1, N) unmasked vst


# ------------------------------------------------- one-time parameter prep ---
def prepare_params(params):
    """Hoisted out of the per-call path: all weight transposes / paddings done once."""
    f32 = jnp.float32

    def pad_fc(w, b):
        # torch Linear weight (840, K) -> (K, 896) matmul operand with zero pad columns
        wt = jnp.zeros((w.shape[1], PADHW), f32).at[:, :HW].set(w.T.astype(f32))
        bt = jnp.zeros((1, PADHW), f32).at[:, :HW].set(b.astype(f32).reshape(1, HW))
        return wt, bt

    wfn, bfn = pad_fc(params["fc_noise_w"], params["fc_noise_b"])
    wfw, bfw = pad_fc(params["fc_word_w"], params["fc_word_b"])

    # conv1 weights as an (out, tap*in) im2col matrix, taps in (ky, kx)-major order
    w1m = jnp.transpose(params["conv1_w"], (0, 2, 3, 1)).reshape(C1, 18).astype(f32)
    # conv1_b intentionally dropped (cancelled by the batch-stat BatchNorm)
    gamma = params["bn1_gamma"].reshape(C1, 1).astype(f32)
    beta = params["bn1_beta"].reshape(C1, 1).astype(f32)

    # conv2 weights as a (tap, in_channel) matrix
    w2m = jnp.transpose(params["conv2_w"][0], (1, 2, 0)).reshape(9, C1).astype(f32)
    b2 = params["conv2_b"].reshape(1).astype(f32)

    return {"wfn": wfn, "bfn": bfn, "wfw": wfw, "bfw": bfw, "w1m": w1m,
            "gamma": gamma, "beta": beta, "w2m": w2m, "b2": b2}


def _build_masks():
    """Batch-independent per-tap validity masks on the 896-lane padded slab."""
    pos = np.arange(PADHW)
    row = pos // 8
    col = pos % 8
    valid = pos < HW
    masks = np.empty((9, PADHW), np.float32)
    for t, (dy, dx) in enumerate(_TAPS):
        ok = valid & (row + dy >= 0) & (row + dy < H) & (col + dx >= 0) & (col + dx < W)
        masks[t] = ok.astype(np.float32)
    return masks


# ------------------------------------------------------------------ wrapper ---
def generator_forward(noise, word_embedding, prep):
    B = noise.shape[0]
    N = B * PADHW
    f32 = jnp.float32

    masks = jnp.asarray(_build_masks())              # (9, 896) constant under jit

    vmem = pl.BlockSpec(memory_space=pltpu.MemorySpace.VMEM)
    smem = pl.BlockSpec(memory_space=pltpu.MemorySpace.SMEM)

    nd = noise.shape[1]
    wd = word_embedding.shape[1]
    flops = 2 * (B * (nd + wd) * PADHW + 18 * C1 * N + 9 * C1 * N)
    bytes_accessed = 4 * (int(noise.size) + int(word_embedding.size) + int(masks.size)
                          + sum(int(np.prod(v.shape)) for v in prep.values()) + N)
    cost = pl.CostEstimate(flops=int(flops), transcendentals=int(C1),
                           bytes_accessed=int(bytes_accessed))

    out = pl.pallas_call(
        _generator_kernel,
        out_shape=jax.ShapeDtypeStruct((1, N), f32),
        in_specs=[vmem] * 11 + [smem],
        out_specs=vmem,
        cost_estimate=cost,
    )(noise, word_embedding, masks,
      prep["wfn"], prep["bfn"], prep["wfw"], prep["bfw"],
      prep["w1m"], prep["gamma"], prep["beta"], prep["w2m"], prep["b2"])

    # strip the 56 pad lanes per batch slab and return PyTorch NCHW (cheap XLA reshape)
    return out.reshape(B, PADHW)[:, :HW].reshape(B, 1, H, W)


# ------------------------------------------------------------ pure-JAX ref ---
def reference_forward(noise, word_embedding, params):
    B = noise.shape[0]
    fcn = noise @ params["fc_noise_w"].T + params["fc_noise_b"]
    fcw = word_embedding @ params["fc_word_w"].T + params["fc_word_b"]
    x = jnp.concatenate(
        [fcn.reshape(B, 1, H, W), fcw.reshape(B, 1, H, W)], axis=1
    )
    z = lax.conv_general_dilated(
        x, params["conv1_w"], (1, 1), [(1, 1), (1, 1)],
        dimension_numbers=("NCHW", "OIHW", "NCHW"),
    ) + params["conv1_b"].reshape(1, -1, 1, 1)
    mean = jnp.mean(z, axis=(0, 2, 3), keepdims=True)
    var = jnp.mean((z - mean) ** 2, axis=(0, 2, 3), keepdims=True)
    z = (z - mean) / jnp.sqrt(var + EPS)
    z = z * params["bn1_gamma"].reshape(1, -1, 1, 1) + params["bn1_beta"].reshape(1, -1, 1, 1)
    z = jnp.maximum(z, 0.0)
    out = lax.conv_general_dilated(
        z, params["conv2_w"], (1, 1), [(1, 1), (1, 1)],
        dimension_numbers=("NCHW", "OIHW", "NCHW"),
    ) + params["conv2_b"].reshape(1, -1, 1, 1)
    return out


if __name__ == "__main__":
    B = 2
    noise_dim = 32
    word_embedding_dim = 48

    key = jax.random.PRNGKey(0)
    ks = jax.random.split(key, 12)
    f32 = jnp.float32

    params = {
        "fc_noise_w": 0.05 * jax.random.normal(ks[0], (HW, noise_dim), f32),
        "fc_noise_b": 0.05 * jax.random.normal(ks[1], (HW,), f32),
        "fc_word_w": 0.05 * jax.random.normal(ks[2], (HW, word_embedding_dim), f32),
        "fc_word_b": 0.05 * jax.random.normal(ks[3], (HW,), f32),
        "conv1_w": 0.1 * jax.random.normal(ks[4], (C1, 2, 3, 3), f32),
        "conv1_b": 0.1 * jax.random.normal(ks[5], (C1,), f32),
        "bn1_gamma": 1.0 + 0.1 * jax.random.normal(ks[6], (C1,), f32),
        "bn1_beta": 0.1 * jax.random.normal(ks[7], (C1,), f32),
        "conv2_w": 0.1 * jax.random.normal(ks[8], (1, C1, 3, 3), f32),
        "conv2_b": 0.1 * jax.random.normal(ks[9], (1,), f32),
    }

    noise = jax.random.normal(ks[10], (B, noise_dim), f32)
    word_embedding = jax.random.normal(ks[11], (B, word_embedding_dim), f32)

    prep = prepare_params(params)                       # one-time weight preprocessing
    fwd = jax.jit(generator_forward)

    out = fwd(noise, word_embedding, prep)
    out = jax.block_until_ready(out)

    ref = reference_forward(noise, word_embedding, params)
    assert out.shape == (B, 1, H, W), out.shape
    assert jnp.allclose(out, ref, atol=2e-3, rtol=2e-3), (
        float(jnp.max(jnp.abs(out - ref)))
    )

    print("KERNEL_OK")
</pallas_src>

<mosaic_0001>
module attributes {stable_mosaic.version = 11 : i64} {
  func.func @_generator_kernel(%arg0: memref<2x32xf32, #tpu.memory_space<vmem>>, %arg1: memref<2x48xf32, #tpu.memory_space<vmem>>, %arg2: memref<9x896xf32, #tpu.memory_space<vmem>>, %arg3: memref<32x896xf32, #tpu.memory_space<vmem>>, %arg4: memref<1x896xf32, #tpu.memory_space<vmem>>, %arg5: memref<48x896xf32, #tpu.memory_space<vmem>>, %arg6: memref<1x896xf32, #tpu.memory_space<vmem>>, %arg7: memref<64x18xf32, #tpu.memory_space<vmem>>, %arg8: memref<64x1xf32, #tpu.memory_space<vmem>>, %arg9: memref<64x1xf32, #tpu.memory_space<vmem>>, %arg10: memref<9x64xf32, #tpu.memory_space<vmem>>, %arg11: memref<1xf32, #tpu.memory_space<smem>>, %arg12: memref<1x1792xf32, #tpu.memory_space<vmem>>) attributes {dimension_semantics = [], scalar_prefetch = 0 : i64, scratch_operands = 0 : i64, tpu.core_type = #tpu.core_type<tc>} {
    %c0 = arith.constant 0 : index
    %c0_0 = arith.constant 0 : index
    %0 = vector.load %arg0[%c0, %c0_0] : memref<2x32xf32, #tpu.memory_space<vmem>>, vector<2x32xf32>
    %c0_1 = arith.constant 0 : index
    %c0_2 = arith.constant 0 : index
    %1 = vector.load %arg3[%c0_1, %c0_2] : memref<32x896xf32, #tpu.memory_space<vmem>>, vector<32x896xf32>
    %cst = arith.constant dense<0.000000e+00> : vector<2x896xf32>
    %2 = tpu.matmul %0, %1, %cst {dimension_numbers = #tpu.dot_dimension_numbers<[1], [0], [0], [1], [0, 0, 1, 1], [], []>} : vector<2x32xf32>, vector<32x896xf32>, vector<2x896xf32> -> vector<2x896xf32>
    %c0_3 = arith.constant 0 : index
    %c0_4 = arith.constant 0 : index
    %3 = vector.load %arg4[%c0_3, %c0_4] : memref<1x896xf32, #tpu.memory_space<vmem>>, vector<1x896xf32>
    %4 = vector.broadcast %3 : vector<1x896xf32> to vector<2x896xf32>
    %5 = arith.addf %2, %4 : vector<2x896xf32>
    %c0_5 = arith.constant 0 : index
    %c0_6 = arith.constant 0 : index
    %6 = vector.load %arg1[%c0_5, %c0_6] : memref<2x48xf32, #tpu.memory_space<vmem>>, vector<2x48xf32>
    %c0_7 = arith.constant 0 : index
    %c0_8 = arith.constant 0 : index
    %7 = vector.load %arg5[%c0_7, %c0_8] : memref<48x896xf32, #tpu.memory_space<vmem>>, vector<48x896xf32>
    %cst_9 = arith.constant dense<0.000000e+00> : vector<2x896xf32>
    %8 = tpu.matmul %6, %7, %cst_9 {dimension_numbers = #tpu.dot_dimension_numbers<[1], [0], [0], [1], [0, 0, 1, 1], [], []>} : vector<2x48xf32>, vector<48x896xf32>, vector<2x896xf32> -> vector<2x896xf32>
    %c0_10 = arith.constant 0 : index
    %c0_11 = arith.constant 0 : index
    %9 = vector.load %arg6[%c0_10, %c0_11] : memref<1x896xf32, #tpu.memory_space<vmem>>, vector<1x896xf32>
    %10 = vector.broadcast %9 : vector<1x896xf32> to vector<2x896xf32>
    %11 = arith.addf %8, %10 : vector<2x896xf32>
    %12 = tpu.concatenate %5, %11 in 0 : vector<2x896xf32>, vector<2x896xf32> -> vector<4x896xf32>
    %13 = vector.shape_cast %12 : vector<4x896xf32> to vector<2x1792xf32>
    %c0_12 = arith.constant 0 : index
    %c0_13 = arith.constant 0 : index
    %14 = vector.load %arg2[%c0_12, %c0_13] : memref<9x896xf32, #tpu.memory_space<vmem>>, vector<9x896xf32>
    %15 = tpu.concatenate %14, %14 in 1 : vector<9x896xf32>, vector<9x896xf32> -> vector<9x1792xf32>
    %c9_i32 = arith.constant 9 : i32
    %16 = tpu.dynamic_rotate %13 by %c9_i32 dim 1 : vector<2x1792xf32>, i32 -> vector<2x1792xf32>
    %17 = vector.extract_strided_slice %15 {offsets = [0, 0], sizes = [1, 1792], strides = [1, 1]} : vector<9x1792xf32> to vector<1x1792xf32>
    %18 = vector.broadcast %17 : vector<1x1792xf32> to vector<2x1792xf32>
    %19 = arith.mulf %16, %18 : vector<2x1792xf32>
    %c8_i32 = arith.constant 8 : i32
    %20 = tpu.dynamic_rotate %13 by %c8_i32 dim 1 : vector<2x1792xf32>, i32 -> vector<2x1792xf32>
    %21 = vector.extract_strided_slice %15 {offsets = [1, 0], sizes = [1, 1792], strides = [1, 1]} : vector<9x1792xf32> to vector<1x1792xf32>
    %22 = vector.broadcast %21 : vector<1x1792xf32> to vector<2x1792xf32>
    %23 = arith.mulf %20, %22 : vector<2x1792xf32>
    %c7_i32 = arith.constant 7 : i32
    %24 = tpu.dynamic_rotate %13 by %c7_i32 dim 1 : vector<2x1792xf32>, i32 -> vector<2x1792xf32>
    %25 = vector.extract_strided_slice %15 {offsets = [2, 0], sizes = [1, 1792], strides = [1, 1]} : vector<9x1792xf32> to vector<1x1792xf32>
    %26 = vector.broadcast %25 : vector<1x1792xf32> to vector<2x1792xf32>
    %27 = arith.mulf %24, %26 : vector<2x1792xf32>
    %c1_i32 = arith.constant 1 : i32
    %28 = tpu.dynamic_rotate %13 by %c1_i32 dim 1 : vector<2x1792xf32>, i32 -> vector<2x1792xf32>
    %29 = vector.extract_strided_slice %15 {offsets = [3, 0], sizes = [1, 1792], strides = [1, 1]} : vector<9x1792xf32> to vector<1x1792xf32>
    %30 = vector.broadcast %29 : vector<1x1792xf32> to vector<2x1792xf32>
    %31 = arith.mulf %28, %30 : vector<2x1792xf32>
    %32 = vector.extract_strided_slice %15 {offsets = [4, 0], sizes = [1, 1792], strides = [1, 1]} : vector<9x1792xf32> to vector<1x1792xf32>
    %33 = vector.broadcast %32 : vector<1x1792xf32> to vector<2x1792xf32>
    %34 = arith.mulf %13, %33 : vector<2x1792xf32>
    %c1791_i32 = arith.constant 1791 : i32
    %35 = tpu.dynamic_rotate %13 by %c1791_i32 dim 1 : vector<2x1792xf32>, i32 -> vector<2x1792xf32>
    %36 = vector.extract_strided_slice %15 {offsets = [5, 0], sizes = [1, 1792], strides = [1, 1]} : vector<9x1792xf32> to vector<1x1792xf32>
    %37 = vector.broadcast %36 : vector<1x1792xf32> to vector<2x1792xf32>
    %38 = arith.mulf %35, %37 : vector<2x1792xf32>
    %c1785_i32 = arith.constant 1785 : i32
    %39 = tpu.dynamic_rotate %13 by %c1785_i32 dim 1 : vector<2x1792xf32>, i32 -> vector<2x1792xf32>
    %40 = vector.extract_strided_slice %15 {offsets = [6, 0], sizes = [1, 1792], strides = [1, 1]} : vector<9x1792xf32> to vector<1x1792xf32>
    %41 = vector.broadcast %40 : vector<1x1792xf32> to vector<2x1792xf32>
    %42 = arith.mulf %39, %41 : vector<2x1792xf32>
    %c1784_i32 = arith.constant 1784 : i32
    %43 = tpu.dynamic_rotate %13 by %c1784_i32 dim 1 : vector<2x1792xf32>, i32 -> vector<2x1792xf32>
    %44 = vector.extract_strided_slice %15 {offsets = [7, 0], sizes = [1, 1792], strides = [1, 1]} : vector<9x1792xf32> to vector<1x1792xf32>
    %45 = vector.broadcast %44 : vector<1x1792xf32> to vector<2x1792xf32>
    %46 = arith.mulf %43, %45 : vector<2x1792xf32>
    %c1783_i32 = arith.constant 1783 : i32
    %47 = tpu.dynamic_rotate %13 by %c1783_i32 dim 1 : vector<2x1792xf32>, i32 -> vector<2x1792xf32>
    %48 = vector.extract_strided_slice %15 {offsets = [8, 0], sizes = [1, 1792], strides = [1, 1]} : vector<9x1792xf32> to vector<1x1792xf32>
    %49 = vector.broadcast %48 : vector<1x1792xf32> to vector<2x1792xf32>
    %50 = arith.mulf %47, %49 : vector<2x1792xf32>
    %51 = tpu.concatenate %19, %23, %27, %31, %34, %38, %42, %46, %50 in 0 : vector<2x1792xf32>, vector<2x1792xf32>, vector<2x1792xf32>, vector<2x1792xf32>, vector<2x1792xf32>, vector<2x1792xf32>, vector<2x1792xf32>, vector<2x1792xf32>, vector<2x1792xf32> -> vector<18x1792xf32>
    %c0_14 = arith.constant 0 : index
    %c0_15 = arith.constant 0 : index
    %52 = vector.load %arg7[%c0_14, %c0_15] : memref<64x18xf32, #tpu.memory_space<vmem>>, vector<64x18xf32>
    %cst_16 = arith.constant dense<0.000000e+00> : vector<64x1792xf32>
    %53 = tpu.matmul %52, %51, %cst_16 {dimension_numbers = #tpu.dot_dimension_numbers<[1], [0], [0], [1], [0, 0, 1, 1], [], []>} : vector<64x18xf32>, vector<18x1792xf32>, vector<64x1792xf32> -> vector<64x1792xf32>
    %cst_17 = arith.constant dense<0.000000e+00> : vector<64xf32>
    %54 = vector.multi_reduction <add>, %53, %cst_17 [1] : vector<64x1792xf32> to vector<64xf32>
    %55 = vector.shape_cast %54 : vector<64xf32> to vector<64x1xf32>
    %56 = arith.mulf %53, %53 : vector<64x1792xf32>
    %cst_18 = arith.constant dense<0.000000e+00> : vector<64xf32>
    %57 = vector.multi_reduction <add>, %56, %cst_18 [1] : vector<64x1792xf32> to vector<64xf32>
    %58 = vector.shape_cast %57 : vector<64xf32> to vector<64x1xf32>
    %cst_19 = arith.constant 5.95238118E-4 : f32
    %59 = vector.broadcast %cst_19 : f32 to vector<64x1xf32>
    %60 = arith.mulf %55, %59 : vector<64x1xf32>
    %cst_20 = arith.constant 5.95238118E-4 : f32
    %61 = vector.broadcast %cst_20 : f32 to vector<64x1xf32>
    %62 = arith.mulf %58, %61 : vector<64x1xf32>
    %63 = arith.mulf %60, %60 : vector<64x1xf32>
    %64 = arith.subf %62, %63 : vector<64x1xf32>
    %65 = vector.broadcast %60 : vector<64x1xf32> to vector<64x1792xf32>
    %66 = arith.subf %53, %65 : vector<64x1792xf32>
    %cst_21 = arith.constant 9.99999974E-6 : f32
    %67 = vector.broadcast %cst_21 : f32 to vector<64x1xf32>
    %68 = arith.addf %64, %67 : vector<64x1xf32>
    %69 = math.rsqrt %68 : vector<64x1xf32>
    %70 = vector.broadcast %69 : vector<64x1xf32> to vector<64x1792xf32>
    %71 = arith.mulf %66, %70 : vector<64x1792xf32>
    %c0_22 = arith.constant 0 : index
    %c0_23 = arith.constant 0 : index
    %72 = vector.load %arg8[%c0_22, %c0_23] : memref<64x1xf32, #tpu.memory_space<vmem>>, vector<64x1xf32>
    %73 = vector.broadcast %72 : vector<64x1xf32> to vector<64x1792xf32>
    %74 = arith.mulf %71, %73 : vector<64x1792xf32>
    %c0_24 = arith.constant 0 : index
    %c0_25 = arith.constant 0 : index
    %75 = vector.load %arg9[%c0_24, %c0_25] : memref<64x1xf32, #tpu.memory_space<vmem>>, vector<64x1xf32>
    %76 = vector.broadcast %75 : vector<64x1xf32> to vector<64x1792xf32>
    %77 = arith.addf %74, %76 : vector<64x1792xf32>
    %cst_26 = arith.constant 0.000000e+00 : f32
    %78 = vector.broadcast %cst_26 : f32 to vector<64x1792xf32>
    %79 = arith.maximumf %77, %78 : vector<64x1792xf32>
    %c0_27 = arith.constant 0 : index
    %c0_28 = arith.constant 0 : index
    %80 = vector.load %arg10[%c0_27, %c0_28] : memref<9x64xf32, #tpu.memory_space<vmem>>, vector<9x64xf32>
    %cst_29 = arith.constant dense<0.000000e+00> : vector<9x1792xf32>
    %81 = tpu.matmul %80, %79, %cst_29 {dimension_numbers = #tpu.dot_dimension_numbers<[1], [0], [0], [1], [0, 0, 1, 1], [], []>} : vector<9x64xf32>, vector<64x1792xf32>, vector<9x1792xf32> -> vector<9x1792xf32>
    %cst_30 = arith.constant 0.000000e+00 : f32
    %82 = vector.broadcast %cst_30 : f32 to vector<1x1792xf32>
    %83 = vector.extract_strided_slice %81 {offsets = [0, 0], sizes = [1, 1792], strides = [1, 1]} : vector<9x1792xf32> to vector<1x1792xf32>
    %c9_i32_31 = arith.constant 9 : i32
    %84 = tpu.dynamic_rotate %83 by %c9_i32_31 dim 1 : vector<1x1792xf32>, i32 -> vector<1x1792xf32>
    %85 = vector.extract_strided_slice %15 {offsets = [0, 0], sizes = [1, 1792], strides = [1, 1]} : vector<9x1792xf32> to vector<1x1792xf32>
    %86 = arith.mulf %84, %85 : vector<1x1792xf32>
    %87 = arith.addf %82, %86 : vector<1x1792xf32>
    %88 = vector.extract_strided_slice %81 {offsets = [1, 0], sizes = [1, 1792], strides = [1, 1]} : vector<9x1792xf32> to vector<1x1792xf32>
    %c8_i32_32 = arith.constant 8 : i32
    %89 = tpu.dynamic_rotate %88 by %c8_i32_32 dim 1 : vector<1x1792xf32>, i32 -> vector<1x1792xf32>
    %90 = vector.extract_strided_slice %15 {offsets = [1, 0], sizes = [1, 1792], strides = [1, 1]} : vector<9x1792xf32> to vector<1x1792xf32>
    %91 = arith.mulf %89, %90 : vector<1x1792xf32>
    %92 = arith.addf %87, %91 : vector<1x1792xf32>
    %93 = vector.extract_strided_slice %81 {offsets = [2, 0], sizes = [1, 1792], strides = [1, 1]} : vector<9x1792xf32> to vector<1x1792xf32>
    %c7_i32_33 = arith.constant 7 : i32
    %94 = tpu.dynamic_rotate %93 by %c7_i32_33 dim 1 : vector<1x1792xf32>, i32 -> vector<1x1792xf32>
    %95 = vector.extract_strided_slice %15 {offsets = [2, 0], sizes = [1, 1792], strides = [1, 1]} : vector<9x1792xf32> to vector<1x1792xf32>
    %96 = arith.mulf %94, %95 : vector<1x1792xf32>
    %97 = arith.addf %92, %96 : vector<1x1792xf32>
    %98 = vector.extract_strided_slice %81 {offsets = [3, 0], sizes = [1, 1792], strides = [1, 1]} : vector<9x1792xf32> to vector<1x1792xf32>
    %c1_i32_34 = arith.constant 1 : i32
    %99 = tpu.dynamic_rotate %98 by %c1_i32_34 dim 1 : vector<1x1792xf32>, i32 -> vector<1x1792xf32>
    %100 = vector.extract_strided_slice %15 {offsets = [3, 0], sizes = [1, 1792], strides = [1, 1]} : vector<9x1792xf32> to vector<1x1792xf32>
    %101 = arith.mulf %99, %100 : vector<1x1792xf32>
    %102 = arith.addf %97, %101 : vector<1x1792xf32>
    %103 = vector.extract_strided_slice %81 {offsets = [4, 0], sizes = [1, 1792], strides = [1, 1]} : vector<9x1792xf32> to vector<1x1792xf32>
    %104 = vector.extract_strided_slice %15 {offsets = [4, 0], sizes = [1, 1792], strides = [1, 1]} : vector<9x1792xf32> to vector<1x1792xf32>
    %105 = arith.mulf %103, %104 : vector<1x1792xf32>
    %106 = arith.addf %102, %105 : vector<1x1792xf32>
    %107 = vector.extract_strided_slice %81 {offsets = [5, 0], sizes = [1, 1792], strides = [1, 1]} : vector<9x1792xf32> to vector<1x1792xf32>
    %c1791_i32_35 = arith.constant 1791 : i32
    %108 = tpu.dynamic_rotate %107 by %c1791_i32_35 dim 1 : vector<1x1792xf32>, i32 -> vector<1x1792xf32>
    %109 = vector.extract_strided_slice %15 {offsets = [5, 0], sizes = [1, 1792], strides = [1, 1]} : vector<9x1792xf32> to vector<1x1792xf32>
    %110 = arith.mulf %108, %109 : vector<1x1792xf32>
    %111 = arith.addf %106, %110 : vector<1x1792xf32>
    %112 = vector.extract_strided_slice %81 {offsets = [6, 0], sizes = [1, 1792], strides = [1, 1]} : vector<9x1792xf32> to vector<1x1792xf32>
    %c1785_i32_36 = arith.constant 1785 : i32
    %113 = tpu.dynamic_rotate %112 by %c1785_i32_36 dim 1 : vector<1x1792xf32>, i32 -> vector<1x1792xf32>
    %114 = vector.extract_strided_slice %15 {offsets = [6, 0], sizes = [1, 1792], strides = [1, 1]} : vector<9x1792xf32> to vector<1x1792xf32>
    %115 = arith.mulf %113, %114 : vector<1x1792xf32>
    %116 = arith.addf %111, %115 : vector<1x1792xf32>
    %117 = vector.extract_strided_slice %81 {offsets = [7, 0], sizes = [1, 1792], strides = [1, 1]} : vector<9x1792xf32> to vector<1x1792xf32>
    %c1784_i32_37 = arith.constant 1784 : i32
    %118 = tpu.dynamic_rotate %117 by %c1784_i32_37 dim 1 : vector<1x1792xf32>, i32 -> vector<1x1792xf32>
    %119 = vector.extract_strided_slice %15 {offsets = [7, 0], sizes = [1, 1792], strides = [1, 1]} : vector<9x1792xf32> to vector<1x1792xf32>
    %120 = arith.mulf %118, %119 : vector<1x1792xf32>
    %121 = arith.addf %116, %120 : vector<1x1792xf32>
    %122 = vector.extract_strided_slice %81 {offsets = [8, 0], sizes = [1, 1792], strides = [1, 1]} : vector<9x1792xf32> to vector<1x1792xf32>
    %c1783_i32_38 = arith.constant 1783 : i32
    %123 = tpu.dynamic_rotate %122 by %c1783_i32_38 dim 1 : vector<1x1792xf32>, i32 -> vector<1x1792xf32>
    %124 = vector.extract_strided_slice %15 {offsets = [8, 0], sizes = [1, 1792], strides = [1, 1]} : vector<9x1792xf32> to vector<1x1792xf32>
    %125 = arith.mulf %123, %124 : vector<1x1792xf32>
    %126 = arith.addf %121, %125 : vector<1x1792xf32>
    %c0_39 = arith.constant 0 : index
    %127 = memref.load %arg11[%c0_39] : memref<1xf32, #tpu.memory_space<smem>>
    %128 = vector.broadcast %127 : f32 to vector<1x1792xf32>
    %129 = arith.addf %126, %128 : vector<1x1792xf32>
    %c0_40 = arith.constant 0 : index
    %c0_41 = arith.constant 0 : index
    %130 = vector.load %arg12[%c0_40, %c0_41] : memref<1x1792xf32, #tpu.memory_space<vmem>>, vector<1x1792xf32>
    tpu.vector_store %arg12[%c0_40, %c0_41], %129 {strides = array<i32>} : memref<1x1792xf32, #tpu.memory_space<vmem>>, vector<1x1792xf32>,
    return
  }
}

</mosaic_0001>

<bundles_post_ra>
// kernel: generator_forward.1
= control target key start
LH: loop header
LB: loop body
LE: loop exit
PB: predicated region body
PF: predicated region fallthrough
CT: control target
= control target key end

     0   :  { %18 = vsyncpa [#allocation4], 0  ;;  %s10547_s0 = inlined_call_operand.vmem [shape: f32[2,32], index: 0, kind: input, shape index: {}]   ;;  %s10548_s1 = inlined_call_operand.vmem [shape: f32[2,48], index: 1, kind: input, shape index: {}]   ;;  %s10549_s2 = inlined_call_operand.hbm [shape: f32[9,896], index: 2, kind: input, shape index: {}]   ;;  %s10550_s3 = inlined_call_operand.vmem [shape: f32[32,896], index: 3, kind: input, shape index: {}]   ;;  %s10551_s4 = inlined_call_operand.vmem [shape: f32[1,896], index: 4, kind: input, shape index: {}]   ;;  %s10552_s5 = inlined_call_operand.hbm [shape: f32[48,896], index: 5, kind: input, shape index: {}]   ;;  %s10553_s6 = inlined_call_operand.hbm [shape: f32[1,896], index: 6, kind: input, shape index: {}]   ;;  %s10554_s7 = inlined_call_operand.vmem [shape: f32[64,18], index: 7, kind: input, shape index: {}]   ;;  %s10555_s8 = inlined_call_operand.vmem [shape: f32[64,1], index: 8, kind: input, shape index: {}]   ;;  %s10556_s9 = inlined_call_operand.vmem [shape: f32[64,1], index: 9, kind: input, shape index: {}]   ;;  %s10557_s10 = inlined_call_operand.vmem [shape: f32[9,64], index: 10, kind: input, shape index: {}]   ;;  %s10558_s11 = inlined_call_operand.<no memory space> [shape: f32[1], index: 11, kind: input, shape index: {}]   ;;  %s10559_s12 = inlined_call_operand.vmem [shape: f32[1,1792], index: 12, kind: output, shape index: {}]  }
   0x1   :  { %19 = vsyncpa [#allocation6], 0  ;;  %s5928_s21 = smov [#allocation5]   ;;  %s5929_s23 = smov [#allocation3]  }
   0x2   :  { %s45_s22 = sshll.u32 %s5928_s21, 4  ;;  %s29_s24 = sshll.u32 %s5929_s23, 4  ;;  %s46_s22 = int_to_ptr.vmem [resolvable:$true] %s45_s22  ;;  %s6011_s24 = int_to_ptr.vmem [resolvable:$true] %s29_s24 }
   0x3   :  { %s5858_s27 = scalar_lea.hbm %s10552_s5, 5376 }
   0x4   :  { %p5859_p0 = scmp.ne.s32.totalorder %s10552_s5, %s5858_s27  ;;  %p5862_p1 = scmp.lt.u32.totalorder %s5858_s27, %s10552_s5 }
   0x6   :  { %p5864_p2 = pnand %p5862_p1, %p5859_p0 }
   0x8   :  { %5867 = shalt.err (!%p5864_p2)
}
   0x9   :  { %s5868_s14 = scalar_lea.vmem %s46_s22, 5376  ;;  %p5873_p4 = scmp.lt.s32.totalorder %s46_s22, %s46_s22 }
   0xa   :  { %p5869_p3 = scmp.ne.s32.totalorder %s46_s22, %s5868_s14  ;;  %p5874_p5 = scmp.lt.s32.totalorder %s5868_s14, %s5868_s14 }
   0xc   :  { %p5875_p6 = por %p5874_p5, %p5873_p4 }
   0xe   :  { %p5876_p7 = pnand %p5875_p6, %p5869_p3 }
  0x10   :  { %5879 = shalt.err (!%p5876_p7)
}
  0x11   :  { %s5930_s15 = smov 896   ;;  %s5931_s16 = smov 56  }
  0x12   :  { %51 = dma.hbm_to_vmem [thread:$0]  %s10552_s5, 5376, %s46_s22, [#allocation6], %s5930_s15, %s5930_s15, %s5931_s16  }
  0x13   :  { %s5880_s21 = scalar_lea.hbm %s10549_s2, 1792 }
  0x14   :  { %p5881_p8 = scmp.ne.s32.totalorder %s10549_s2, %s5880_s21  ;;  %p5884_p9 = scmp.lt.u32.totalorder %s5880_s21, %s10549_s2 }
  0x16   :  { %p5886_p10 = pnand %p5884_p9, %p5881_p8 }
  0x18   :  { %5889 = shalt.err (!%p5886_p10)
}
  0x19   :  { %s5890_s28 = scalar_lea.vmem %s6011_s24, 1792  ;;  %p5895_p12 = scmp.lt.s32.totalorder %s6011_s24, %s6011_s24 }
  0x1a   :  { %p5891_p11 = scmp.ne.s32.totalorder %s6011_s24, %s5890_s28  ;;  %p5896_p13 = scmp.lt.s32.totalorder %s5890_s28, %s5890_s28 }
  0x1c   :  { %p5897_p0 = por %p5896_p13, %p5895_p12 }
  0x1e   :  { %p5898_p1 = pnand %p5897_p0, %p5891_p11 }
  0x20   :  { %5901 = shalt.err (!%p5898_p1)
}
  0x21   :  { %35 = dma.hbm_to_vmem [thread:$0]  %s10549_s2, 1792, %s6011_s24, [#allocation4], %s5930_s15, %s5930_s15, %s5931_s16  }
  0x22   :  { %s5932_s29 = smov [#allocation7]   ;;  %s5902_s17 = scalar_lea.hbm %s10553_s6, 112 }
  0x23   :  { %s58_s30 = sshll.u32 %s5932_s29, 4  ;;  %p5903_p2 = scmp.ne.s32.totalorder %s10553_s6, %s5902_s17  ;;  %s59_s30 = int_to_ptr.vmem [resolvable:$true] %s58_s30 }
  0x24   :  { %p5906_p3 = scmp.lt.u32.totalorder %s5902_s17, %s10553_s6 }
  0x26   :  { %p5908_p4 = pnand %p5906_p3, %p5903_p2 }
  0x28   :  { %5911 = shalt.err (!%p5908_p4)
}
  0x29   :  { %s5912_s23 = scalar_lea.vmem %s59_s30, 112  ;;  %s5916_s2 = scalar_lea.vmem %s59_s30, 128 }
  0x2a   :  { %p5913_p5 = scmp.ne.s32.totalorder %s59_s30, %s5912_s23  ;;  %p5917_p6 = scmp.lt.s32.totalorder %s59_s30, %s59_s30 }
  0x2b   :  { %p5918_p7 = scmp.lt.s32.totalorder %s5916_s2, %s5912_s23 }
  0x2d   :  { %p5919_p8 = por %p5918_p7, %p5917_p6 }
  0x2f   :  { %p5920_p9 = pnand %p5919_p8, %p5913_p5 }
  0x31   :  { %5923 = shalt.err (!%p5920_p9)
}
  0x32   :  { %61 = dma.hbm_to_vmem [thread:$0]  %s10553_s6, 112, %s59_s30, [#allocation6]  }
  0x33   :  { %5924 = dma.done.wait [#allocation4], 1792  }
  0x34   :  { %5925 = vsyncadd [#allocation4], 4294965504 }
  0x35   :  { %5926 = dma.done.wait [#allocation6], 5488  }
  0x36   :  { %5927 = vsyncadd [#allocation6], 4294961808  ;;  %v10561_v0 = vmov 0.0   ;;  %v87_v1 = vld [vmem:[%s10550_s3 + $0x28] sm:$0xff]  ;;  %v94_v2 = vld [vmem:[%s10550_s3 + $0x60] sm:$0xff]  ;;  %vm147_vm0 = vcmask 261120  }
  0x37   :  { %357 = vmatprep.mubr.f32.mxu0 %v10561_v0  ;;  %215 = vmatprep.mubr.f32.mxu1 %v10561_v0  ;;  %v86_v3 = vld [vmem:[%s10550_s3 + $0x20] sm:$0xff]  ;;  %v5602_v4 = vpack.c.bf16 %v94_v2, %v87_v1  ;;  %v93_v5 = vld [vmem:[%s10550_s3 + $0x58] sm:$0xff]  ;;  %v108_v7 = vld [vmem:[%s10550_s3 + $0xd0] sm:$0xff]  ;;  %vm514_vm1 = vcmask 392192   ;;  %vm5935_vm2 = vmmov 0   ;;  %vm822_vm3 = vcmask 1041408  }
  0x38   :  { %v101_v6 = vld [vmem:[%s10550_s3 + $0x98] sm:$0xff]  ;;  %v5604_v8 = vpack.c.bf16 %v93_v5, %v86_v3  ;;  %v100_v10 = vld [vmem:[%s10550_s3 + $0x90] sm:$0xff]  ;;  %v107_v11 = vld [vmem:[%s10550_s3 + $0xc8] sm:$0xff]  ;;  %vm830_vm4 = vcmask 1040384   ;;  %vm833_vm5 = vcmask 1041409   ;;  %s5937_s21 = smov 8  }
  0x39   :  { %v5606_v9 = vpack.c.bf16 %v108_v7, %v101_v6  ;;  %5603 = vmatprep.subr.bf16.mxu0 %v5602_v4  ;;  %v436_v12 = vld [vmem:[#allocation5 + $0x8] sm:$0xff]  ;;  %v443_v13 = vld [vmem:[#allocation5 + $0x40] sm:$0xff]  ;;  %v5608_v14 = vpack.c.bf16 %v107_v11, %v100_v10  ;;  %v442_v16 = vld [vmem:[#allocation5 + $0x38] sm:$0xff]  ;;  %v5934_v10 = vmov 0.0|0.0   ;;  %s5938_s23 = smov 127   ;;  %s5939_s2 = smov 9  }
  0x3a   :  { %5605 = vmatpush1.bf16.msra.mxu0 %v5604_v8  ;;  %v435_v15 = vld [vmem:[#allocation5] sm:$0xff]  ;;  %v5616_v17 = vpack.c.bf16 %v443_v13, %v436_v12  ;;  %v450_v18 = vld [vmem:[#allocation5 + $0x78] sm:$0xff]  ;;  %v90_v20 = vld [vmem:[%s10550_s3 + $0x40] sm:$0xff]  ;;  %s5940_s24 = smov 1   ;;  %s5941_s15 = smov 120   ;;  %vm1878_vm13 = vcmask 1043456  }
  0x3b   :  { %5607 = vmatprep.subr.bf16.mxu0 %v5606_v9  ;;  %v83_v19 = vld [vmem:[%s10550_s3 + $0x8] sm:$0xff]  ;;  %v457_v21 = vld [vmem:[#allocation5 + $0xb0] sm:$0xff]  ;;  %v89_v24 = vld [vmem:[%s10550_s3 + $0x38] sm:$0xff]  ;;  %v5618_v28 = vpack.c.bf16 %v442_v16, %v435_v15  ;;  %s5942_s16 = smov 121   ;;  %s5943_s25 = smov 119   ;;  %vm1893_vm14 = vcmask 1045504  }
  0x3c   :  { %v5586_v22 = vpack.c.bf16 %v90_v20, %v83_v19  ;;  %v82_v23 = vld [vmem:[%s10550_s3] sm:$0xff]  ;;  %v97_v26 = vld [vmem:[%s10550_s3 + $0x78] sm:$0xff]  ;;  %v104_v30 = vld [vmem:[%s10550_s3 + $0xb0] sm:$0xff]  ;;  %v5620_v31 = vpack.c.bf16 %v457_v21, %v450_v18 }
  0x3d   :  { %v5588_v25 = vpack.c.bf16 %v89_v24, %v82_v23  ;;  %v6098_v27 = vld [vmem:[%s10547_s0] sm:$0x3]  ;;  %v456_v32 = vld [vmem:[#allocation5 + $0xa8] sm:$0xff]  ;;  %v5590_v33 = vpack.c.bf16 %v104_v30, %v97_v26  ;;  %v96_v34 = vld [vmem:[%s10550_s3 + $0x70] sm:$0xff] }
  0x3e   :  { %5609 = vmatpush1.bf16.msra.mxu0 %v5608_v14  ;;  %5587 = vmatprep.subr.bf16.mxu1 %v5586_v22  ;;  %v449_v29 = vld [vmem:[#allocation5 + $0x70] sm:$0xff]  ;;  %v103_v35 = vld [vmem:[%s10550_s3 + $0xa8] sm:$0xff]  ;;  %v464_v36 = vld [vmem:[#allocation5 + $0xe8] sm:$0xff] }
  0x3f   :  { %5617 = vmatprep.subr.bf16.mxu0 %v5616_v17  ;;  %5589 = vmatpush1.bf16.msra.mxu1 %v5588_v25  ;;  %v471_v37 = vld [vmem:[#allocation5 + $0x120] sm:$0xff]  ;;  %v5592_v38 = vpack.c.bf16 %v103_v35, %v96_v34  ;;  %v5622_v39 = vpack.c.bf16 %v456_v32, %v449_v29  ;;  %v470_v42 = vld [vmem:[#allocation5 + $0x118] sm:$0xff]  ;;  %v440_v43 = vld [vmem:[#allocation5 + $0x28] sm:$0xff] }
  0x40   :  { %5591 = vmatprep.subr.bf16.mxu1 %v5590_v33  ;;  %v463_v40 = vld [vmem:[#allocation5 + $0xe0] sm:$0xff]  ;;  %v5624_v41 = vpack.c.bf16 %v471_v37, %v464_v36  ;;  %v85_v45 = vld [vmem:[%s10550_s3 + $0x18] sm:$0xff]  ;;  %v91_v49 = vld [vmem:[%s10550_s3 + $0x48] sm:$0xff] }
  0x41   :  { %5458 = vmatmul.mubr.msk.f32.vlgmr.msra.gmra.mrb[0].mxu0 %vm147_vm0, %v6098_v27  ;;  %v447_v44 = vld [vmem:[#allocation5 + $0x60] sm:$0xff]  ;;  %v99_v50 = vld [vmem:[%s10550_s3 + $0x88] sm:$0xff]  ;;  %v106_v51 = vld [vmem:[%s10550_s3 + $0xc0] sm:$0xff]  ;;  %v5626_v52 = vpack.c.bf16 %v470_v42, %v463_v40 }
  0x42   :  { %5619 = vmatpush1.bf16.msra.mxu0 %v5618_v28  ;;  %582 = vmatprep.mubr.f32.mxu0 %v10561_v0  ;;  %v92_v46 = vld [vmem:[%s10550_s3 + $0x50] sm:$0xff]  ;;  %v5598_v54 = vpack.c.bf16 %v106_v51, %v99_v50  ;;  %v98_v55 = vld [vmem:[%s10550_s3 + $0x80] sm:$0xff]  ;;  %v105_v56 = vld [vmem:[%s10550_s3 + $0xb8] sm:$0xff]  ;;  %v5640_v57 = vpack.c.bf16 %v447_v44, %v440_v43 }
  0x43   :  { %5621 = vmatprep.subr.bf16.mxu0 %v5620_v31  ;;  %5593 = vmatpush1.bf16.msra.mxu1 %v5592_v38  ;;  %v84_v47 = vld [vmem:[%s10550_s3 + $0x10] sm:$0xff]  ;;  %v5594_v48 = vpack.c.bf16 %v92_v46, %v85_v45  ;;  %v446_v59 = vld [vmem:[#allocation5 + $0x58] sm:$0xff]  ;;  %v461_v61 = vld [vmem:[#allocation5 + $0xd0] sm:$0xff]  ;;  %v5600_v62 = vpack.c.bf16 %v105_v56, %v98_v55  ;;  %v10560_v46 = vlaneseq }
  0x44   :  { %v5596_v53 = vpack.c.bf16 %v91_v49, %v84_v47  ;;  %v439_v58 = vld [vmem:[#allocation5 + $0x20] sm:$0xff]  ;;  %v454_v60 = vld [vmem:[#allocation5 + $0x98] sm:$0xff]  ;;  %v6148_v2 = vld [vmem:[%s10548_s1] sm:$0x3] }
  0x45   :  { %5595 = vmatprep.subr.bf16.mxu1 %v5594_v48  ;;  %v88_v63 = vld [vmem:[%s10550_s3 + $0x30] sm:$0xff]  ;;  %v95_v1 = vld [vmem:[%s10550_s3 + $0x68] sm:$0xff]  ;;  %v5642_v3 = vpack.c.bf16 %v446_v59, %v439_v58  ;;  %v5644_v4 = vpack.c.bf16 %v461_v61, %v454_v60  ;;  %v453_v5 = vld [vmem:[#allocation5 + $0x90] sm:$0xff]  ;;  %v6182_v49 = vshrl.u32 %v10560_v46, 7 }
  0x46   :  { %5623 = vmatpush1.bf16.msra.mxu0 %v5622_v39  ;;  %5456 = vmatmul.mubr.msk.f32.vlgmr.msra.gmra.mrb[0].mxu1 %vm147_vm0, %v6098_v27  ;;  %v460_v6 = vld [vmem:[#allocation5 + $0xc8] sm:$0xff]  ;;  %v475_v8 = vld [vmem:[#allocation5 + $0x140] sm:$0xff]  ;;  %v5611_v9 = vpack.c.bf16 %v95_v1, %v88_v63  ;;  %v102_v11 = vld [vmem:[%s10550_s3 + $0xa0] sm:$0xff] }
  0x47   :  { %5625 = vmatprep.subr.bf16.mxu0 %v5624_v41  ;;  %5597 = vmatpush1.bf16.msra.mxu1 %v5596_v53  ;;  %v468_v7 = vld [vmem:[#allocation5 + $0x108] sm:$0xff]  ;;  %v5646_v13 = vpack.c.bf16 %v460_v6, %v453_v5  ;;  %v438_v14 = vld [vmem:[#allocation5 + $0x18] sm:$0xff]  ;;  %v445_v15 = vld [vmem:[#allocation5 + $0x50] sm:$0xff]  ;;  %10812 = vst [vmem:[#allocation10_spill] sm:$0xff] %v6182_v49  ;;  %v6185_v50 = vsub.s32 0, %v6182_v49  ;;  %v6190_v53 = vsub.s32 1, %v6182_v49 }
  0x48   :  { %286 = vmatprep.mubr.f32.mxu1 %v10561_v0  ;;  %5599 = vmatprep.subr.bf16.mxu1 %v5598_v54  ;;  %v109_v12 = vld [vmem:[%s10550_s3 + $0xd8] sm:$0xff]  ;;  %v5648_v16 = vpack.c.bf16 %v475_v8, %v468_v7  ;;  %v467_v17 = vld [vmem:[#allocation5 + $0x100] sm:$0xff]  ;;  %v474_v18 = vld [vmem:[#allocation5 + $0x138] sm:$0xff]  ;;  %v5628_v20 = vpack.c.bf16 %v445_v15, %v438_v14 }
  0x49   :  { %v5614_v19 = vpack.c.bf16 %v109_v12, %v102_v11  ;;  %v437_v21 = vld [vmem:[#allocation5 + $0x10] sm:$0xff]  ;;  %v444_v22 = vld [vmem:[#allocation5 + $0x48] sm:$0xff]  ;;  %v5650_v23 = vpack.c.bf16 %v474_v18, %v467_v17  ;;  %v459_v25 = vld [vmem:[#allocation5 + $0xc0] sm:$0xff]  ;;  %10813 = vst [vmem:[#allocation11_spill] sm:$0xff] %v6185_v50  ;;  %v6215_v11 = vsub.s32 4, %v6182_v49  ;;  %v6218_v12 = vsub.s32 5, %v6182_v49 }
  0x4a   :  { %5627 = vmatpush1.bf16.msra.mxu0 %v5626_v52  ;;  %v452_v24 = vld [vmem:[#allocation5 + $0x88] sm:$0xff]  ;;  %v5630_v26 = vpack.c.bf16 %v444_v22, %v437_v21  ;;  %v451_v29 = vld [vmem:[#allocation5 + $0x80] sm:$0xff]  ;;  %v458_v30 = vld [vmem:[#allocation5 + $0xb8] sm:$0xff] }
  0x4b   :  { %5641 = vmatprep.subr.bf16.mxu0 %v5640_v57  ;;  %5601 = vmatpush1.bf16.msra.mxu1 %v5600_v62  ;;  %v5632_v28 = vpack.c.bf16 %v459_v25, %v452_v24  ;;  %v466_v31 = vld [vmem:[#allocation5 + $0xf8] sm:$0xff]  ;;  %v473_v32 = vld [vmem:[#allocation5 + $0x130] sm:$0xff]  ;;  %v5634_v33 = vpack.c.bf16 %v458_v30, %v451_v29  ;;  %v472_v36 = vld [vmem:[#allocation5 + $0x128] sm:$0xff] }
  0x4c   :  { %5610 = vmatprep.subr.bf16.mxu1 %v5934_v10  ;;  %v5636_v34 = vpack.c.bf16 %v473_v32, %v466_v31  ;;  %v465_v35 = vld [vmem:[#allocation5 + $0xf0] sm:$0xff]  ;;  %v448_v39 = vld [vmem:[#allocation5 + $0x68] sm:$0xff]  ;;  %v455_v40 = vld [vmem:[#allocation5 + $0xa0] sm:$0xff]  ;;  %v6248_v31 = vsub.s32 3, %v6182_v49 }
  0x4d   :  { %5460 = vmatmul.mubr.msk.f32.vlgmr.msra.gmra.mrb[2].mxu0 %vm514_vm1, %v6148_v2  ;;  %v5638_v37 = vpack.c.bf16 %v472_v36, %v465_v35  ;;  %v441_v38 = vld [vmem:[#allocation5 + $0x30] sm:$0xff]  ;;  %v462_v41 = vld [vmem:[#allocation5 + $0xd8] sm:$0xff]  ;;  %v476_v44 = vld [vmem:[#allocation5 + $0x148] sm:$0xff] }
  0x4e   :  { %5643 = vmatpush1.bf16.msra.mxu0 %v5642_v3  ;;  %724 = vmatprep.mubr.f32.mxu0 %v10561_v0  ;;  %v5656_v42 = vpack.c.bf16 %v462_v41, %v455_v40  ;;  %v469_v43 = vld [vmem:[#allocation5 + $0x110] sm:$0xff]  ;;  %10814 = vst [vmem:[#allocation12_spill] sm:$0xff] %v6248_v31 }
  0x4f   :  { %5645 = vmatprep.subr.bf16.mxu0 %v5644_v4  ;;  %5457 = vmatmul.mubr.msk.f32.vlgmr.msra.gmra.mrb[2].mxu1 %vm147_vm0, %v6098_v27  ;;  %v5659_v45 = vpack.c.bf16 %v476_v44, %v469_v43  ;;  %v6187_v52 = vld [vmem:[#allocation7] sm:$0xff] }
  0x50   :  { %5612 = vmatpush3.bf16.msra.mxu1 %v5611_v9  ;;  %5568 = vmatprep.mubr.msk.f32.mxu1 %vm5935_vm2, %v10561_v0  ;;  %v6195_v55 = vld [vmem:[%s10551_s4] sm:$0xff]  ;;  %v482_v56 = vrot.slane %v6187_v52, %v6185_v50  ;;  %v486_v58 = vrot.slane %v6187_v52, %v6190_v53  ;;  %s5936_s4 = smov 7   ;;  %v498_v14 = vrot.slane %v6187_v52, %v6215_v11 }
  0x51   :  { %5613 = vmatprep.subr.bf16.mxu1 %v5934_v10  ;;  %v115_v57 = vrot.slane %v6195_v55, %v6185_v50  ;;  %v119_v59 = vrot.slane %v6195_v55, %v6190_v53  ;;  %v502_v15 = vrot.slane %v6187_v52, %v6218_v12  ;;  %v131_v17 = vrot.slane %v6195_v55, %v6215_v11 }
  0x52   :  { %5647 = vmatpush1.bf16.msra.mxu0 %v5646_v13  ;;  %v494_v43 = vrot.slane %v6187_v52, %v6248_v31 }
  0x53   :  { %5649 = vmatprep.subr.bf16.mxu0 %v5648_v16 }
  0x54   :  { %5615 = vmatpush3.bf16.msra.mxu1 %v5614_v19  ;;  %v135_v19 = vrot.slane %v6195_v55, %v6218_v12 }
  0x55   :  { %5629 = vmatprep.subr.bf16.mxu1 %v5628_v20 }
  0x56   :  { %5651 = vmatpush1.bf16.msra.mxu0 %v5650_v23 }
  0x57   :  { %5569 = vmatmul.mubr.msk.f32.vlgmr.msra.gmra.mrb[4].mxu1 %vm147_vm0, %v6098_v27  ;;  %v5653_v27 = vpack.c.bf16 %v448_v39, %v441_v38  ;;  %vm1958_vm0 = vcmask 146432  }
  0x58   :  { %5631 = vmatpush1.bf16.msra.mxu1 %v5630_v26  ;;  %653 = vmatprep.mubr.f32.mxu1 %v10561_v0  ;;  %v6244_v26 = vsub.s32 2, %v6182_v49 }
  0x59   :  { %5462 = vmatmul.mubr.msk.f32.vlgmr.msra.gmra.mrb[4].mxu0 %vm514_vm1, %v6148_v2  ;;  %5633 = vmatprep.subr.bf16.mxu1 %v5632_v28 }
  0x5a   :  { %2089 = vmatprep.mubr.f32.mxu0 %v10561_v0  ;;  %v123_v39 = vrot.slane %v6195_v55, %v6244_v26 }
  0x5c   :  { %5635 = vmatpush1.bf16.msra.mxu1 %v5634_v33 }
  0x5d   :  { %5637 = vmatprep.subr.bf16.mxu1 %v5636_v34 }
  0x60   :  { %5639 = vmatpush1.bf16.msra.mxu1 %v5638_v37 }
  0x61   :  { %5652 = vmatprep.subr.bf16.mxu1 %v5934_v10 }
  0x63   :  { %5461 = vmatmul.mubr.msk.f32.vlgmr.msra.gmra.mrb[6].mxu1 %vm514_vm1, %v6148_v2 }
  0x64   :  { %5654 = vmatpush3.bf16.msra.mxu1 %v5653_v27  ;;  %5583 = vmatprep.mubr.msk.f32.mxu1 %vm5935_vm2, %v10561_v0  ;;  %v490_v27 = vrot.slane %v6187_v52, %v6244_v26 }
  0x65   :  { %5655 = vmatprep.subr.bf16.mxu1 %v5934_v10 }
  0x68   :  { %5657 = vmatpush3.bf16.msra.mxu1 %v5656_v42  ;;  %v127_v42 = vrot.slane %v6195_v55, %v6248_v31 }
  0x69   :  { %5658 = vmatprep.subr.bf16.mxu1 %v5934_v10 }
  0x6c   :  { %5660 = vmatpush3.bf16.msra.mxu1 %v5659_v45 }
  0x6f   :  { %5584 = vmatmul.mubr.msk.f32.vlgmr.msra.gmra.mrb[8].mxu1 %vm514_vm1, %v6148_v2  ;;  %vm3874_vm1 = vcmask 523264  }
  0x70   :  { %2202 = vmatprep.mubr.f32.mxu1 %v10561_v0  ;;  %v6605_v0 = vld [vmem:[#allocation3 + $0x18] sm:$0xff] }
 0x114   :  { %v359_v47 = vpop.f32.mrb[0].mxu0 }
 0x115   :  { %v361_v48 = vpop.f32.mrb[1].mxu0  ;;  %v360_v24 = vadd.f32 %v359_v47, %v131_v17 }
 0x116   :  { %v362_v28 = vadd.f32 %v361_v48, %v135_v19 }
 0x119   :  { %v217_v51 = vpop.f32.mrb[0].mxu1 }
 0x11a   :  { %v219_v54 = vpop.f32.mrb[1].mxu1  ;;  %v218_v62 = vadd.f32 %v217_v51, %v115_v57 }
 0x11b   :  { %v220_v2 = vadd.f32 %v219_v54, %v119_v59 }
 0x120   :  { %v584_v60 = vpop.f32.mrb[2].mxu0 }
 0x121   :  { %v585_v61 = vadd.f32 %v584_v60, %v482_v56  ;;  %v586_v63 = vpop.f32.mrb[3].mxu0 }
 0x122   :  { %v587_v1 = vadd.f32 %v586_v63, %v486_v58  ;;  %v288_v3 = vpop.f32.mrb[2].mxu1 }
 0x123   :  { %v808_v4 = vrot.slane %v585_v61, 6  ;;  %v290_v5 = vpop.f32.mrb[3].mxu1  ;;  %v289_v51 = vadd.f32 %v288_v3, %v123_v39  ;;  %v6300_v61 = vsub.s32 6, %v6182_v49 }
 0x124   :  { %v809_v6 = vrot.slane %v587_v1, 6  ;;  %v291_v57 = vadd.f32 %v290_v5, %v127_v42 }
 0x125   :  { %v6206_v7 = vsel %vm822_vm3, %v218_v62, %v808_v4 }
 0x126   :  { %v831_v8 = vsel %vm830_vm4, %v6206_v7, 0.0  ;;  %v832_v9 = vrot.slane %v6206_v7, 1  ;;  %v6212_v10 = vsel %vm822_vm3, %v220_v2, %v809_v6 }
 0x127   :  { %v836_v29 = vrot.slane %v6212_v10, 1  ;;  %v835_v32 = vsel %vm830_vm4, %v6212_v10, 0.0 }
 0x128   :  { %v6223_v13 = vsel %vm833_vm5, %v832_v9, %v831_v8  ;;  %v139_v8 = vrot.slane %v6195_v55, %v6300_v61 }
 0x129   :  { %1060 = vrot.lane.b32.xlu1 %v6223_v13, %s5936_s4  ;;  %975 = vrot.lane.b32.xlu0 %v6223_v13, %s5937_s21  ;;  %v6273_v40 = vsel %vm833_vm5, %v836_v29, %v835_v32 }
 0x12a   :  { %v6233_v16 = vpop.f32.mrb[4].mxu1 }
 0x12b   :  { %v5570_v18 = vpop.f32.mrb[5].mxu1 }
 0x12c   :  { %v726_v20 = vpop.f32.mrb[4].mxu0 }
 0x12d   :  { %v727_v21 = vadd.f32 %v726_v20, %v498_v14  ;;  %v728_v22 = vpop.f32.mrb[5].mxu0  ;;  %1272 = vrot.lane.b32.xlu1 %v6223_v13, %s5938_s23  ;;  %888 = vrot.lane.b32.xlu0 %v6223_v13, %s5939_s2  ;;  %v506_v20 = vrot.slane %v6187_v52, %v6300_v61  ;;  %v853_v52 = vsel %vm830_vm4, %v832_v9, 0.0  ;;  %v856_v9 = vsel %vm830_vm4, %v836_v29, 0.0 }
 0x12e   :  { %v729_v23 = vadd.f32 %v728_v22, %v502_v15  ;;  %v431_v22 = vadd.f32 %v6233_v16, %v139_v8 }
 0x12f   :  { %v812_v25 = vrot.slane %v727_v21, 6 }
 0x130   :  { %v813_v30 = vrot.slane %v729_v23, 6 }
 0x131   :  { %v6253_v33 = vsel %vm822_vm3, %v360_v24, %v812_v25  ;;  %1145 = vrot.lane.b32.xlu1 %v6223_v13, %s5940_s24  ;;  %1442 = vrot.lane.b32.xlu0 %v6223_v13, %s5941_s15  ;;  %v854_v25 = vrot.slane %v6206_v7, 2 }
 0x132   :  { %v845_v34 = vrot.slane %v6253_v33, 1  ;;  %v866_v35 = vrot.slane %v6253_v33, 2  ;;  %v6262_v36 = vsel %vm822_vm3, %v362_v28, %v813_v30  ;;  %v857_v30 = vrot.slane %v6212_v10, 2 }
 0x133   :  { %v848_v37 = vrot.slane %v6262_v36, 1  ;;  %v869_v38 = vrot.slane %v6262_v36, 2  ;;  %v6344_v16 = vsel %vm833_vm5, %v854_v25, %v853_v52  ;;  %v844_v39 = vsel %vm830_vm4, %v6253_v33, 0.0 }
 0x134   :  { %v865_v41 = vsel %vm830_vm4, %v845_v34, 0.0  ;;  %v6364_v10 = vsel %vm833_vm5, %v857_v30, %v856_v9  ;;  %v6369_v29 = vsel %vm833_vm5, %v845_v34, %v844_v39  ;;  %v847_v33 = vsel %vm830_vm4, %v6262_v36, 0.0  ;;  %v6597_v39 = vld [vmem:[#allocation3 + $0x28] sm:$0xff] }
 0x135   :  { %v6283_v44 = vsel %vm833_vm5, %v866_v35, %v865_v41  ;;  %v868_v45 = vsel %vm830_vm4, %v848_v37, 0.0  ;;  %1357 = vrot.lane.b32.xlu1 %v6223_v13, %s5942_s16  ;;  %977 = vrot.lane.b32.xlu0 %v6273_v40, %s5937_s21  ;;  %10820 = vst [vmem:[#allocation18_spill] sm:$0xff] %v6364_v10  ;;  %v6392_v34 = vsel %vm833_vm5, %v848_v37, %v847_v33 }
 0x136   :  { %10815 = vst [vmem:[#allocation13_spill] sm:$0xff] %v6283_v44  ;;  %v6293_v47 = vsel %vm833_vm5, %v869_v38, %v868_v45  ;;  %v655_v48 = vpop.f32.mrb[6].mxu1 }
 0x137   :  { %10816 = vst [vmem:[#allocation14_spill] sm:$0xff] %v6293_v47  ;;  %v656_v54 = vadd.f32 %v655_v48, %v490_v27  ;;  %v657_v56 = vpop.f32.mrb[7].mxu1 }
 0x138   :  { %v658_v58 = vadd.f32 %v657_v56, %v494_v43 }
 0x139   :  { %1527 = vrot.lane.b32.xlu1 %v6223_v13, %s5943_s25  ;;  %1062 = vrot.lane.b32.xlu0 %v6273_v40, %s5936_s4  ;;  %v810_v59 = vrot.slane %v656_v54, 6 }
 0x13a   :  { %v811_v60 = vrot.slane %v658_v58, 6 }
 0x13b   :  { %v825_v62 = vsel %vm822_vm3, %v289_v51, %v810_v59 }
 0x13c   :  { %v838_v63 = vsel %vm830_vm4, %v825_v62, 0.0  ;;  %v839_v1 = vrot.slane %v825_v62, 1  ;;  %v860_v2 = vrot.slane %v825_v62, 2  ;;  %v826_v3 = vsel %vm822_vm3, %v291_v57, %v811_v60 }
 0x13d   :  { %1274 = vrot.lane.b32.xlu1 %v6273_v40, %s5938_s23  ;;  %1359 = vrot.lane.b32.xlu0 %v6273_v40, %s5942_s16  ;;  %v841_v4 = vsel %vm830_vm4, %v826_v3, 0.0  ;;  %v842_v5 = vrot.slane %v826_v3, 1  ;;  %v863_v6 = vrot.slane %v826_v3, 2 }
 0x13e   :  { %v6313_v14 = vsel %vm833_vm5, %v839_v1, %v838_v63  ;;  %v859_v15 = vsel %vm830_vm4, %v839_v1, 0.0 }
 0x13f   :  { %v6317_v17 = vsel %vm833_vm5, %v860_v2, %v859_v15  ;;  %v6320_v18 = vsel %vm833_vm5, %v842_v5, %v841_v4  ;;  %v862_v19 = vsel %vm830_vm4, %v842_v5, 0.0 }
 0x140   :  { %10817 = vst [vmem:[#allocation15_spill] sm:$0xff] %v6317_v17  ;;  %v6326_v21 = vsel %vm833_vm5, %v863_v6, %v862_v19 }
 0x141   :  { %10818 = vst [vmem:[#allocation16_spill] sm:$0xff] %v6326_v21  ;;  %890 = vrot.lane.b32.xlu1 %v6273_v40, %s5939_s2  ;;  %1147 = vrot.lane.b32.xlu0 %v6273_v40, %s5940_s24 }
 0x142   :  { %v797_v55 = vpop.f32.mrb[8].mxu1 }
 0x143   :  { %v798_v23 = vadd.f32 %v797_v55, %v506_v20  ;;  %v5585_v24 = vpop.f32.mrb[9].mxu1 }
 0x145   :  { %1529 = vrot.lane.b32.xlu1 %v6273_v40, %s5943_s25  ;;  %1444 = vrot.lane.b32.xlu0 %v6273_v40, %s5941_s15  ;;  %v814_v28 = vrot.slane %v798_v23, 6 }
 0x147   :  { %v829_v32 = vsel %vm822_vm3, %v431_v22, %v814_v28 }
 0x148   :  { %v850_v35 = vsel %vm830_vm4, %v829_v32, 0.0  ;;  %v851_v38 = vrot.slane %v829_v32, 1  ;;  %v872_v7 = vrot.slane %v829_v32, 2  ;;  %v6583_v32 = vand.u32 127, %v10560_v46  ;;  %v6603_v46 = vld [vmem:[#allocation3 + $0x10] sm:$0xff] }
 0x149   :  { %989 = vrot.lane.b32.xlu1 %v6344_v16, %s5937_s21  ;;  %1286 = vrot.lane.b32.xlu0 %v6344_v16, %s5938_s23 }
 0x14a   :  { %v6357_v27 = vsel %vm833_vm5, %v851_v38, %v850_v35  ;;  %v871_v41 = vsel %vm830_vm4, %v851_v38, 0.0  ;;  %10841 = vst [vmem:[#allocation39_spill] sm:$0xff] %v6583_v32  ;;  %v6585_v35 = vld [vmem:[#allocation3 + $0x8] sm:$0xff]  ;;  %v6587_v38 = vld [vmem:[#allocation3] sm:$0xff]  ;;  %vm918_vm6 = vcmp.lt.s32.totalorder %v6583_v32, 9  ;;  %vm1003_vm7 = vcmp.lt.s32.totalorder %v6583_v32, 8 }
 0x14b   :  { %v6361_v42 = vsel %vm833_vm5, %v872_v7, %v871_v41  ;;  %v6593_v7 = vld [vmem:[#allocation3 + $0x20] sm:$0xff]  ;;  %v1233_v9 = vrot.slane %v6587_v38, %v6215_v11  ;;  %vm1088_vm8 = vcmp.lt.s32.totalorder %v6583_v32, 7  ;;  %vm1173_vm9 = vcmp.lt.s32.totalorder %v6583_v32, 1 }
 0x14c   :  { %10819 = vst [vmem:[#allocation17_spill] sm:$0xff] %v6361_v42  ;;  %vm1300_vm10 = vcmp.lt.s32.totalorder %v6583_v32, 127  ;;  %vm1385_vm11 = vcmp.lt.s32.totalorder %v6583_v32, 121  ;;  %vm1470_vm12 = vcmp.lt.s32.totalorder %v6583_v32, 120  ;;  %vm1555_vm15 = vcmp.lt.s32.totalorder %v6583_v32, 119 }
 0x14d   :  { %1288 = vrot.lane.b32.xlu1 %v6364_v10, %s5938_s23  ;;  %983 = vrot.lane.b32.xlu0 %v6369_v29, %s5937_s21 }
 0x151   :  { %1280 = vrot.lane.b32.xlu1 %v6369_v29, %s5938_s23  ;;  %1068 = vrot.lane.b32.xlu0 %v6369_v29, %s5936_s4 }
 0x155   :  { %1365 = vrot.lane.b32.xlu1 %v6369_v29, %s5942_s16  ;;  %896 = vrot.lane.b32.xlu0 %v6369_v29, %s5939_s2 }
 0x159   :  { %1450 = vrot.lane.b32.xlu1 %v6369_v29, %s5941_s15  ;;  %1153 = vrot.lane.b32.xlu0 %v6369_v29, %s5940_s24 }
 0x15d   :  { %1535 = vrot.lane.b32.xlu1 %v6369_v29, %s5943_s25  ;;  %1282 = vrot.lane.b32.xlu0 %v6392_v34, %s5938_s23 }
 0x161   :  { %985 = vrot.lane.b32.xlu1 %v6392_v34, %s5937_s21  ;;  %1367 = vrot.lane.b32.xlu0 %v6392_v34, %s5942_s16 }
 0x165   :  { %1070 = vrot.lane.b32.xlu1 %v6392_v34, %s5936_s4  ;;  %1452 = vrot.lane.b32.xlu0 %v6392_v34, %s5941_s15 }
 0x169   :  { %898 = vrot.lane.b32.xlu1 %v6392_v34, %s5939_s2  ;;  %1537 = vrot.lane.b32.xlu0 %v6392_v34, %s5943_s25 }
 0x16d   :  { %1155 = vrot.lane.b32.xlu1 %v6392_v34, %s5940_s24  ;;  %1531 = vrot.lane.b32.xlu0 %v6313_v14, %s5943_s25 }
 0x171   :  { %1276 = vrot.lane.b32.xlu1 %v6313_v14, %s5938_s23  ;;  %979 = vrot.lane.b32.xlu0 %v6313_v14, %s5937_s21 }
 0x175   :  { %1361 = vrot.lane.b32.xlu1 %v6313_v14, %s5942_s16  ;;  %1064 = vrot.lane.b32.xlu0 %v6313_v14, %s5936_s4 }
 0x179   :  { %1446 = vrot.lane.b32.xlu1 %v6313_v14, %s5941_s15  ;;  %892 = vrot.lane.b32.xlu0 %v6313_v14, %s5939_s2 }
 0x17d   :  { %981 = vrot.lane.b32.xlu1 %v6320_v18, %s5937_s21  ;;  %1149 = vrot.lane.b32.xlu0 %v6313_v14, %s5940_s24 }
 0x181   :  { %1066 = vrot.lane.b32.xlu1 %v6320_v18, %s5936_s4  ;;  %1278 = vrot.lane.b32.xlu0 %v6320_v18, %s5938_s23 }
 0x185   :  { %894 = vrot.lane.b32.xlu1 %v6320_v18, %s5939_s2  ;;  %1363 = vrot.lane.b32.xlu0 %v6320_v18, %s5942_s16 }
 0x189   :  { %1151 = vrot.lane.b32.xlu1 %v6320_v18, %s5940_s24  ;;  %1448 = vrot.lane.b32.xlu0 %v6320_v18, %s5941_s15 }
 0x18d   :  { %1284 = vrot.lane.b32.xlu1 %v6357_v27, %s5938_s23  ;;  %1533 = vrot.lane.b32.xlu0 %v6320_v18, %s5943_s25 }
 0x191   :  { %1369 = vrot.lane.b32.xlu1 %v6357_v27, %s5942_s16  ;;  %987 = vrot.lane.b32.xlu0 %v6357_v27, %s5937_s21 }
 0x195   :  { %1454 = vrot.lane.b32.xlu1 %v6357_v27, %s5941_s15  ;;  %1072 = vrot.lane.b32.xlu0 %v6357_v27, %s5936_s4 }
 0x199   :  { %1539 = vrot.lane.b32.xlu1 %v6357_v27, %s5943_s25  ;;  %1001 = vrot.lane.b32.xlu0 %v6361_v42, %s5937_s21 }
 0x19b   :  { %v6458_v36 = vpop.permute.xlu1 %1060  ;;  %v6460_v37 = vpop.permute.xlu0 %975 }
 0x19c   :  { %10821 = vst [vmem:[#allocation19_spill] sm:$0xff] %v6458_v36  ;;  %10822 = vst [vmem:[#allocation20_spill] sm:$0xff] %v6460_v37 }
 0x19d   :  { %1171 = vrot.lane.b32.xlu1 %v6361_v42, %s5940_s24  ;;  %1086 = vrot.lane.b32.xlu0 %v6361_v42, %s5936_s4 }
 0x19f   :  { %v6466_v43 = vpop.permute.xlu1 %1272  ;;  %v6468_v45 = vpop.permute.xlu0 %888 }
 0x1a0   :  { %10823 = vst [vmem:[#allocation21_spill] sm:$0xff] %v6466_v43  ;;  %10824 = vst [vmem:[#allocation22_spill] sm:$0xff] %v6468_v45 }
 0x1a1   :  { %1074 = vrot.lane.b32.xlu1 %v6344_v16, %s5936_s4  ;;  %914 = vrot.lane.b32.xlu0 %v6361_v42, %s5939_s2 }
 0x1a3   :  { %v6474_v48 = vpop.permute.xlu1 %1145  ;;  %v6476_v51 = vpop.permute.xlu0 %1442 }
 0x1a4   :  { %10825 = vst [vmem:[#allocation23_spill] sm:$0xff] %v6474_v48  ;;  %10826 = vst [vmem:[#allocation24_spill] sm:$0xff] %v6476_v51 }
 0x1a5   :  { %1373 = vrot.lane.b32.xlu1 %v6364_v10, %s5942_s16  ;;  %1371 = vrot.lane.b32.xlu0 %v6344_v16, %s5942_s16 }
 0x1a7   :  { %v6482_v54 = vpop.permute.xlu1 %1357  ;;  %v6484_v56 = vpop.permute.xlu0 %977 }
 0x1a8   :  { %10827 = vst [vmem:[#allocation25_spill] sm:$0xff] %v6482_v54 }
 0x1a9   :  { %902 = vrot.lane.b32.xlu1 %v6344_v16, %s5939_s2  ;;  %900 = vrot.lane.b32.xlu0 %v6357_v27, %s5939_s2 }
 0x1ab   :  { %v6490_v57 = vpop.permute.xlu1 %1527  ;;  %v6492_v58 = vpop.permute.xlu0 %1062 }
 0x1ac   :  { %10828 = vst [vmem:[#allocation26_spill] sm:$0xff] %v6490_v57 }
 0x1ad   :  { %1159 = vrot.lane.b32.xlu1 %v6344_v16, %s5940_s24  ;;  %1157 = vrot.lane.b32.xlu0 %v6357_v27, %s5940_s24 }
 0x1af   :  { %v6498_v59 = vpop.permute.xlu1 %1274  ;;  %v6500_v60 = vpop.permute.xlu0 %1359 }
 0x1b1   :  { %1458 = vrot.lane.b32.xlu1 %v6364_v10, %s5941_s15  ;;  %1456 = vrot.lane.b32.xlu0 %v6344_v16, %s5941_s15 }
 0x1b3   :  { %v6506_v62 = vpop.permute.xlu1 %890  ;;  %v6508_v63 = vpop.permute.xlu0 %1147 }
 0x1b5   :  { %993 = vrot.lane.b32.xlu1 %v6317_v17, %s5937_s21  ;;  %991 = vrot.lane.b32.xlu0 %v6364_v10, %s5937_s21 }
 0x1b7   :  { %v6514_v1 = vpop.permute.xlu1 %1529  ;;  %v6516_v2 = vpop.permute.xlu0 %1444 }
 0x1b8   :  { %10829 = vst [vmem:[#allocation27_spill] sm:$0xff] %v6514_v1 }
 0x1b9   :  { %1292 = vrot.lane.b32.xlu1 %v6326_v21, %s5938_s23  ;;  %1290 = vrot.lane.b32.xlu0 %v6317_v17, %s5938_s23 }
 0x1bb   :  { %v6522_v3 = vpop.permute.xlu1 %989  ;;  %v6524_v4 = vpop.permute.xlu0 %1286 }
 0x1bc   :  { %10830 = vst [vmem:[#allocation28_spill] sm:$0xff] %v6522_v3  ;;  %10831 = vst [vmem:[#allocation29_spill] sm:$0xff] %v6524_v4  ;;  %v6620_v3 = vrot.slane %v6593_v7, %v6215_v11  ;;  %v6646_v4 = vmul.f32 %v1233_v9, %v6223_v13  ;;  %v6668_v13 = vrot.slane %v6587_v38, %v6218_v12 }
 0x1bd   :  { %1078 = vrot.lane.b32.xlu1 %v6317_v17, %s5936_s4  ;;  %1076 = vrot.lane.b32.xlu0 %v6364_v10, %s5936_s4 }
 0x1be   :  { %10845 = vst [vmem:[#allocation43_spill] sm:$0xff] %v6620_v3  ;;  %10850 = vst [vmem:[#allocation48_spill] sm:$0xff] %v6646_v4 }
 0x1bf   :  { %v6530_v5 = vpop.permute.xlu1 %1288  ;;  %v6532_v6 = vpop.permute.xlu0 %983 }
 0x1c0   :  { %10832 = vst [vmem:[#allocation30_spill] sm:$0xff] %v6530_v5  ;;  %10833 = vst [vmem:[#allocation31_spill] sm:$0xff] %v6532_v6 }
 0x1c1   :  { %1377 = vrot.lane.b32.xlu1 %v6326_v21, %s5942_s16  ;;  %1375 = vrot.lane.b32.xlu0 %v6317_v17, %s5942_s16 }
 0x1c3   :  { %v6538_v8 = vpop.permute.xlu1 %1280  ;;  %v6540_v15 = vpop.permute.xlu0 %1068 }
 0x1c4   :  { %10834 = vst [vmem:[#allocation32_spill] sm:$0xff] %v6540_v15 }
 0x1c5   :  { %906 = vrot.lane.b32.xlu1 %v6317_v17, %s5939_s2  ;;  %904 = vrot.lane.b32.xlu0 %v6364_v10, %s5939_s2 }
 0x1c7   :  { %v6546_v19 = vpop.permute.xlu1 %1365  ;;  %v6548_v20 = vpop.permute.xlu0 %896 }
 0x1c8   :  { %10835 = vst [vmem:[#allocation33_spill] sm:$0xff] %v6548_v20  ;;  %v6635_v20 = vrot.slane %v6605_v0, %v6215_v11 }
 0x1c9   :  { %1163 = vrot.lane.b32.xlu1 %v6317_v17, %s5940_s24  ;;  %1161 = vrot.lane.b32.xlu0 %v6364_v10, %s5940_s24 }
 0x1ca   :  { %10847 = vst [vmem:[#allocation45_spill] sm:$0xff] %v6635_v20 }
 0x1cb   :  { %v6554_v55 = vpop.permute.xlu1 %1450  ;;  %v6556_v22 = vpop.permute.xlu0 %1153 }
 0x1cc   :  { %10836 = vst [vmem:[#allocation34_spill] sm:$0xff] %v6556_v22  ;;  %v6631_v22 = vrot.slane %v6603_v46, %v6215_v11 }
 0x1cd   :  { %1462 = vrot.lane.b32.xlu1 %v6326_v21, %s5941_s15  ;;  %1460 = vrot.lane.b32.xlu0 %v6317_v17, %s5941_s15 }
 0x1ce   :  { %10846 = vst [vmem:[#allocation44_spill] sm:$0xff] %v6631_v22 }
 0x1cf   :  { %v6562_v23 = vpop.permute.xlu1 %1535  ;;  %v6564_v24 = vpop.permute.xlu0 %1282 }
 0x1d0   :  { %10837 = vst [vmem:[#allocation35_spill] sm:$0xff] %v6562_v23  ;;  %v6844_v23 = vrot.slane %v6593_v7, %v6244_v26 }
 0x1d1   :  { %1543 = vrot.lane.b32.xlu1 %v6364_v10, %s5943_s25  ;;  %1541 = vrot.lane.b32.xlu0 %v6344_v16, %s5943_s25  ;;  %v6609_v10 = vrot.slane %v6585_v35, %v6215_v11 }
 0x1d2   :  { %10884 = vst [vmem:[#allocation82_spill] sm:$0xff] %v6844_v23 }
 0x1d3   :  { %v6570_v25 = vpop.permute.xlu1 %985  ;;  %v6572_v52 = vpop.permute.xlu0 %1367  ;;  %10844 = vst [vmem:[#allocation42_spill] sm:$0xff] %v6609_v10  ;;  %v6656_v1 = vmul.f32 %v6609_v10, %v6273_v40  ;;  %v6684_v40 = vrot.slane %v6585_v35, %v6248_v31  ;;  %v6688_v10 = vmul.f32 %v6620_v3, %v6369_v29  ;;  %v1016_v29 = vsel %vm1003_vm7, %v6460_v37, %v6484_v56  ;;  %v6738_v37 = vld [vmem:[#allocation3 + $0x58] ss:$0 sm:$0xff] }
 0x1d4   :  { %10838 = vst [vmem:[#allocation36_spill] sm:$0xff] %v6570_v25  ;;  %v6712_v3 = vrot.slane %v6593_v7, %v6218_v12  ;;  %10869 = vst [vmem:[#allocation67_spill] sm:$0xff] %v6738_v37 }
 0x1d5   :  { %1547 = vrot.lane.b32.xlu1 %v6326_v21, %s5943_s25  ;;  %1545 = vrot.lane.b32.xlu0 %v6317_v17, %s5943_s25  ;;  %v6613_v17 = vld [vmem:[#allocation3 + $0x30] sm:$0xff]  ;;  %10858 = vst [vmem:[#allocation56_spill] sm:$0xff] %v6684_v40  ;;  %10859 = vst [vmem:[#allocation57_spill] sm:$0xff] %v6688_v10 }
 0x1d6   :  { %v6660_v15 = vrot.slane %v6613_v17, %v6215_v11  ;;  %10863 = vst [vmem:[#allocation61_spill] sm:$0xff] %v6712_v3 }
 0x1d7   :  { %v6578_v28 = vpop.permute.xlu1 %1070  ;;  %v6580_v30 = vpop.permute.xlu0 %1452 }
 0x1d8   :  { %10839 = vst [vmem:[#allocation37_spill] sm:$0xff] %v6578_v28  ;;  %10840 = vst [vmem:[#allocation38_spill] sm:$0xff] %v6580_v30  ;;  %v6643_v30 = vrot.slane %v6585_v35, %v6190_v53  ;;  %v6664_v28 = vrot.slane %v6585_v35, %v6244_v26 }
 0x1d9   :  { %997 = vrot.lane.b32.xlu1 %v6283_v44, %s5937_s21  ;;  %995 = vrot.lane.b32.xlu0 %v6326_v21, %s5937_s21  ;;  %10854 = vst [vmem:[#allocation52_spill] sm:$0xff] %v6660_v15 }
 0x1da   :  { %10849 = vst [vmem:[#allocation47_spill] sm:$0xff] %v6643_v30  ;;  %10855 = vst [vmem:[#allocation53_spill] sm:$0xff] %v6664_v28  ;;  %v1047_v37 = vmul.f32 %v6643_v30, %v1016_v29  ;;  %v6782_v29 = vrot.slane %v6597_v39, %v6248_v31 }
 0x1db   :  { %v6599_v41 = vpop.permute.xlu1 %898  ;;  %v6601_v33 = vpop.permute.xlu0 %1537 }
 0x1dc   :  { %10842 = vst [vmem:[#allocation40_spill] sm:$0xff] %v6599_v41  ;;  %10843 = vst [vmem:[#allocation41_spill] sm:$0xff] %v6601_v33  ;;  %v6627_v33 = vsub.s32 7, %v6182_v49  ;;  %v6639_v41 = vrot.slane %v6597_v39, %v6215_v11  ;;  %v6648_v49 = vld [vmem:[#allocation3 + $0x38] ss:$0 sm:$0xff]  ;;  %v6680_v11 = vrot.slane %v6585_v35, %v6185_v50 }
 0x1dd   :  { %1296 = vrot.lane.b32.xlu1 %v6293_v47, %s5938_s23  ;;  %1294 = vrot.lane.b32.xlu0 %v6283_v44, %s5938_s23  ;;  %10851 = vst [vmem:[#allocation49_spill] sm:$0xff] %v6648_v49  ;;  %v6675_v49 = vmul.f32 %v1233_v9, %v6344_v16  ;;  %v6700_v9 = vmul.f32 %v6631_v22, %v6313_v14  ;;  %10875 = vst [vmem:[#allocation73_spill] sm:$0xff] %v6782_v29 }
 0x1de   :  { %10848 = vst [vmem:[#allocation46_spill] sm:$0xff] %v6639_v41  ;;  %10857 = vst [vmem:[#allocation55_spill] sm:$0xff] %v6680_v11  ;;  %v6696_v16 = vrot.slane %v6587_v38, %v6627_v33  ;;  %v6720_v14 = vmul.f32 %v6660_v15, %v6357_v27  ;;  %v6732_v22 = vrot.slane %v6593_v7, %v6300_v61  ;;  %v6740_v27 = vld [vmem:[#allocation3 + $0x40] ss:$0 sm:$0xff] }
 0x1df   :  { %v6650_v5 = vpop.permute.xlu1 %1155  ;;  %v6652_v57 = vpop.permute.xlu0 %1531  ;;  %10856 = vst [vmem:[#allocation54_spill] sm:$0xff] %v6675_v49  ;;  %10861 = vst [vmem:[#allocation59_spill] sm:$0xff] %v6700_v9  ;;  %v6704_v49 = vmul.f32 %v6639_v41, %v6392_v34  ;;  %v6724_v34 = vmul.f32 %v6635_v20, %v6320_v18  ;;  %v6728_v41 = vrot.slane %v6597_v39, %v6190_v53  ;;  %v6880_v9 = vld [vmem:[#allocation3 + $0x48] ss:$0 sm:$0xff] }
 0x1e0   :  { %10852 = vst [vmem:[#allocation50_spill] sm:$0xff] %v6650_v5  ;;  %10853 = vst [vmem:[#allocation51_spill] sm:$0xff] %v6652_v57  ;;  %v6672_v5 = vrot.slane %v6587_v38, %v6300_v61  ;;  %v6744_v18 = vrot.slane %v6585_v35, %v6218_v12  ;;  %v931_v15 = vsel %vm918_vm6, %v6468_v45, %v6506_v62 }
 0x1e1   :  { %1082 = vrot.lane.b32.xlu1 %v6283_v44, %s5936_s4  ;;  %1080 = vrot.lane.b32.xlu0 %v6326_v21, %s5936_s4  ;;  %10860 = vst [vmem:[#allocation58_spill] sm:$0xff] %v6696_v16  ;;  %10862 = vst [vmem:[#allocation60_spill] sm:$0xff] %v6704_v49  ;;  %v6736_v49 = vrot.slane %v6597_v39, %v6244_v26  ;;  %v6770_v45 = vrot.slane %v6593_v7, %v6627_v33 }
 0x1e2   :  { %10864 = vst [vmem:[#allocation62_spill] sm:$0xff] %v6720_v14  ;;  %10865 = vst [vmem:[#allocation63_spill] sm:$0xff] %v6724_v34  ;;  %v6761_v14 = vrot.slane %v6585_v35, %v6300_v61  ;;  %v962_v57 = vmul.f32 %v6680_v11, %v931_v15  ;;  %v6806_v15 = vrot.slane %v6585_v35, %v6627_v33 }
 0x1e3   :  { %v6714_v10 = vpop.permute.xlu1 %1276  ;;  %v6716_v4 = vpop.permute.xlu0 %979  ;;  %10866 = vst [vmem:[#allocation64_spill] sm:$0xff] %v6728_v41  ;;  %10867 = vst [vmem:[#allocation65_spill] sm:$0xff] %v6732_v22  ;;  %v1186_v41 = vsel %vm1173_vm9, %v6474_v48, %v6508_v63  ;;  %v6823_v35 = vrot.slane %v6605_v0, %v6190_v53  ;;  %v6878_v34 = vrot.slane %v6605_v0, %v6300_v61 }
 0x1e4   :  { %10868 = vst [vmem:[#allocation66_spill] sm:$0xff] %v6736_v49  ;;  %10870 = vst [vmem:[#allocation68_spill] sm:$0xff] %v6740_v27  ;;  %v1312_v20 = vsel %vm1300_vm10, %v6498_v59, %v6714_v10  ;;  %v1101_v27 = vsel %vm1088_vm8, %v6458_v36, %v6492_v58  ;;  %v6774_v49 = vrot.slane %v6597_v39, %v6185_v50 }
 0x1e5   :  { %10871 = vst [vmem:[#allocation69_spill] sm:$0xff] %v6744_v18  ;;  %1381 = vrot.lane.b32.xlu1 %v6293_v47, %s5942_s16  ;;  %1379 = vrot.lane.b32.xlu0 %v6283_v44, %s5942_s16  ;;  %10872 = vst [vmem:[#allocation70_spill] sm:$0xff] %v6761_v14  ;;  %v1132_v6 = vmul.f32 %v6664_v28, %v1101_v27  ;;  %v1217_v11 = vmul.f32 %v6684_v40, %v1186_v41 }
 0x1e6   :  { %10873 = vst [vmem:[#allocation71_spill] sm:$0xff] %v6770_v45  ;;  %10874 = vst [vmem:[#allocation72_spill] sm:$0xff] %v6774_v49  ;;  %v1344_v45 = vmul.f32 %v6744_v18, %v1312_v20  ;;  %v6792_v49 = vrot.slane %v6603_v46, %v6190_v53  ;;  %v1627_v20 = vrot.slane %v1047_v37, 6  ;;  %v6811_v18 = vrot.slane %v6603_v46, %v6244_v26 }
 0x1e7   :  { %v6784_v30 = vpop.permute.xlu1 %1361  ;;  %v6786_v36 = vpop.permute.xlu0 %1064  ;;  %10877 = vst [vmem:[#allocation75_spill] sm:$0xff] %v6806_v15  ;;  %10880 = vst [vmem:[#allocation78_spill] sm:$0xff] %v6823_v35  ;;  %v6827_v37 = vrot.slane %v6593_v7, %v6190_v53  ;;  %v6831_v41 = vrot.slane %v6603_v46, %v6248_v31  ;;  %v6835_v40 = vrot.slane %v6605_v0, %v6244_v26 }
 0x1e8   :  { %10876 = vst [vmem:[#allocation74_spill] sm:$0xff] %v6792_v49  ;;  %v1397_v48 = vsel %vm1385_vm11, %v6500_v60, %v6784_v30  ;;  %10878 = vst [vmem:[#allocation76_spill] sm:$0xff] %v6811_v18  ;;  %v1753_v25 = vrot.slane %v1344_v45, 6  ;;  %v6853_v45 = vrot.slane %v6603_v46, %v6218_v12 }
 0x1e9   :  { %v1429_v29 = vmul.f32 %v6761_v14, %v1397_v48  ;;  %910 = vrot.lane.b32.xlu1 %v6283_v44, %s5939_s2  ;;  %908 = vrot.lane.b32.xlu0 %v6326_v21, %s5939_s2  ;;  %v6815_v48 = vrot.slane %v6603_v46, %v6185_v50  ;;  %10881 = vst [vmem:[#allocation79_spill] sm:$0xff] %v6827_v37  ;;  %10882 = vst [vmem:[#allocation80_spill] sm:$0xff] %v6831_v41  ;;  %v1669_v37 = vrot.slane %v1132_v6, 4 }
 0x1ea   :  { %10883 = vst [vmem:[#allocation81_spill] sm:$0xff] %v6835_v40  ;;  %v1865_v14 = vsel %vm822_vm3, %v962_v57, %v1627_v20  ;;  %10885 = vst [vmem:[#allocation83_spill] sm:$0xff] %v6853_v45  ;;  %v1711_v57 = vrot.slane %v1217_v11, 2  ;;  %v6857_v20 = vrot.slane %v6605_v0, %v6218_v12  ;;  %v6861_v6 = vrot.slane %v6605_v0, %v6185_v50 }
 0x1eb   :  { %10879 = vst [vmem:[#allocation77_spill] sm:$0xff] %v6815_v48  ;;  %v6817_v27 = vpop.permute.xlu1 %1446  ;;  %v6819_v28 = vpop.permute.xlu0 %892  ;;  %v1795_v3 = vrot.slane %v1429_v29, 4  ;;  %v1880_v23 = vsel %vm1878_vm13, %v1865_v14, %v1669_v37  ;;  %v6874_v11 = vrot.slane %v6603_v46, %v6300_v61  ;;  %10890 = vst [vmem:[#allocation88_spill] sm:$0xff] %v6878_v34  ;;  %v6890_v14 = vrot.slane %v6593_v7, %v6248_v31 }
 0x1ec   :  { %v1482_v22 = vsel %vm1470_vm12, %v6516_v2, %v6817_v27  ;;  %10886 = vst [vmem:[#allocation84_spill] sm:$0xff] %v6857_v20  ;;  %10887 = vst [vmem:[#allocation85_spill] sm:$0xff] %v6861_v6  ;;  %v6894_v37 = vrot.slane %v6603_v46, %v6627_v33  ;;  %v1895_v46 = vsel %vm1893_vm14, %v1880_v23, %v1711_v57 }
 0x1ed   :  { %v1514_v16 = vmul.f32 %v6806_v15, %v1482_v22  ;;  %1167 = vrot.lane.b32.xlu1 %v6283_v44, %s5940_s24  ;;  %1165 = vrot.lane.b32.xlu0 %v6326_v21, %s5940_s24  ;;  %v6865_v22 = vrot.slane %v6593_v7, %v6185_v50  ;;  %10889 = vst [vmem:[#allocation87_spill] sm:$0xff] %v6874_v11  ;;  %10891 = vst [vmem:[#allocation89_spill] sm:$0xff] %v6880_v9  ;;  %v6896_v50 = vld [vmem:[#allocation3 + $0x50] ss:$0 sm:$0xff] }
 0x1ee   :  { %10893 = vst [vmem:[#allocation91_spill] sm:$0xff] %v6890_v14  ;;  %10894 = vst [vmem:[#allocation92_spill] sm:$0xff] %v6894_v37  ;;  %v6909_v7 = vrot.slane %v6597_v39, %v6218_v12  ;;  %v6915_v9 = vrot.slane %v6613_v17, %v6218_v12  ;;  %v6927_v23 = vrot.slane %v6597_v39, %v6300_v61 }
 0x1ef   :  { %10888 = vst [vmem:[#allocation86_spill] sm:$0xff] %v6865_v22  ;;  %v1837_v29 = vrot.slane %v1514_v16, 2  ;;  %v6867_v15 = vpop.permute.xlu1 %981  ;;  %v6869_v21 = vpop.permute.xlu0 %1149  ;;  %v1909_v22 = vsel %vm822_vm3, %v6656_v1, %v1753_v25  ;;  %v6886_v16 = vrot.slane %v6605_v0, %v6248_v31  ;;  %10895 = vst [vmem:[#allocation93_spill] sm:$0xff] %v6896_v50  ;;  %v6905_v25 = vrot.slane %v6605_v0, %v6627_v33  ;;  %v6917_v50 = vld [vmem:[#allocation3 + $0x60] ss:$0 sm:$0xff] }
 0x1f0   :  { %v1923_v1 = vsel %vm1878_vm13, %v1909_v22, %v1795_v3  ;;  %10897 = vst [vmem:[#allocation95_spill] sm:$0xff] %v6909_v7  ;;  %v1015_v0 = vsel %vm1003_vm7, %v6484_v56, %v6716_v4  ;;  %10898 = vst [vmem:[#allocation96_spill] sm:$0xff] %v6927_v23  ;;  %v1014_v12 = vsel %vm1003_vm7, %v6716_v4, %v6867_v15 }
 0x1f1   :  { %10892 = vst [vmem:[#allocation90_spill] sm:$0xff] %v6886_v16  ;;  %1466 = vrot.lane.b32.xlu1 %v6293_v47, %s5941_s15  ;;  %1464 = vrot.lane.b32.xlu0 %v6283_v44, %s5941_s15  ;;  %10896 = vst [vmem:[#allocation94_spill] sm:$0xff] %v6905_v25  ;;  %v1937_v14 = vsel %vm1893_vm14, %v1923_v1, %v1837_v29  ;;  %v6935_v57 = vrot.slane %v6587_v38, %v6190_v53 }
 0x1f2   :  { %v5661_v31 = vpack.c.bf16 %v1937_v14, %v1895_v46  ;;  %v6939_v56 = vrot.slane %v6613_v17, %v6190_v53  ;;  %v6943_v29 = vrot.slane %v6597_v39, %v6627_v33  ;;  %v1313_v14 = vsel %vm1300_vm10, %v6466_v43, %v6498_v59 }
 0x1f3   :  { %v6923_v3 = vpop.permute.xlu1 %1066  ;;  %v1279_v22 = vpop.permute.xlu0 %1278  ;;  %v6954_v1 = vrot.slane %v6613_v17, %v6244_v26  ;;  %v1398_v53 = vsel %vm1385_vm11, %v6482_v54, %v6500_v60  ;;  %v1048_v39 = vmul.f32 %v6792_v49, %v1015_v0  ;;  %v1049_v60 = vmul.f32 %v6823_v35, %v1014_v12 }
 0x1f4   :  { %10899 = vst [vmem:[#allocation97_spill] sm:$0xff] %v6943_v29  ;;  %v1311_v4 = vsel %vm1300_vm10, %v6714_v10, %v1279_v22  ;;  %5662 = vmatprep.subr.bf16.mxu0 %v5661_v31  ;;  %v1310_v59 = vsel %vm1300_vm10, %v1279_v22, %v6538_v8  ;;  %v1100_v31 = vsel %vm1088_vm8, %v6492_v58, %v6786_v36 }
 0x1f5   :  { %1298 = vrot.lane.b32.xlu1 %v6361_v42, %s5938_s23  ;;  %999 = vrot.lane.b32.xlu0 %v6293_v47, %s5937_s21  ;;  %v930_v10 = vsel %vm918_vm6, %v6506_v62, %v6819_v28  ;;  %v1099_v46 = vsel %vm1088_vm8, %v6786_v36, %v6923_v3  ;;  %v1345_v54 = vmul.f32 %v6853_v45, %v1311_v4  ;;  %v1628_v49 = vrot.slane %v1048_v39, 6 }
 0x1f6   :  { %v6995_v36 = vmul.f32 %v6668_v13, %v1313_v14  ;;  %v1185_v4 = vsel %vm1173_vm9, %v6508_v63, %v6869_v21  ;;  %v1346_v43 = vmul.f32 %v6857_v20, %v1310_v59  ;;  %v7004_v35 = vmul.f32 %v6672_v5, %v1398_v53 }
 0x1f7   :  { %v6981_v0 = vpop.permute.xlu1 %894  ;;  %v1364_v22 = vpop.permute.xlu0 %1363  ;;  %v1133_v63 = vmul.f32 %v6811_v18, %v1100_v31  ;;  %v963_v14 = vmul.f32 %v6815_v48, %v930_v10  ;;  %v1629_v59 = vrot.slane %v1049_v60, 6  ;;  %v1134_v53 = vmul.f32 %v6835_v40, %v1099_v46 }
 0x1f8   :  { %v929_v58 = vsel %vm918_vm6, %v6819_v28, %v6981_v0  ;;  %v1395_v62 = vsel %vm1385_vm11, %v1364_v22, %v6546_v19  ;;  %v1396_v12 = vsel %vm1385_vm11, %v6784_v30, %v1364_v22 }
 0x1f9   :  { %v964_v28 = vmul.f32 %v6861_v6, %v929_v58  ;;  %v1430_v45 = vmul.f32 %v6874_v11, %v1396_v12  ;;  %v1431_v30 = vmul.f32 %v6878_v34, %v1395_v62  ;;  %1383 = vrot.lane.b32.xlu1 %v6361_v42, %s5942_s16  ;;  %1084 = vrot.lane.b32.xlu0 %v6293_v47, %s5936_s4  ;;  %v1754_v62 = vrot.slane %v1345_v54, 6 }
 0x1fa   :  { %v1218_v58 = vmul.f32 %v6831_v41, %v1185_v4  ;;  %v1755_v6 = vrot.slane %v1346_v43, 6  ;;  %v1309_v43 = vsel %vm1300_vm10, %v6538_v8, %v6564_v24 }
 0x1fb   :  { %v7016_v39 = vpop.permute.xlu1 %1151  ;;  %v1449_v22 = vpop.permute.xlu0 %1448  ;;  %v1867_v10 = vsel %vm822_vm3, %v964_v28, %v1629_v59  ;;  %v1796_v4 = vrot.slane %v1430_v45, 4  ;;  %v1797_v54 = vrot.slane %v1431_v30, 4  ;;  %v1394_v59 = vsel %vm1385_vm11, %v6546_v19, %v6572_v52 }
 0x1fc   :  { %v1184_v12 = vsel %vm1173_vm9, %v6869_v21, %v7016_v39  ;;  %v1480_v31 = vsel %vm1470_vm12, %v1449_v22, %v6554_v55  ;;  %v1481_v46 = vsel %vm1470_vm12, %v6817_v27, %v1449_v22  ;;  %v1483_v21 = vsel %vm1470_vm12, %v6476_v51, %v6516_v2 }
 0x1fd   :  { %v1219_v60 = vmul.f32 %v6886_v16, %v1184_v12  ;;  %v1515_v40 = vmul.f32 %v6894_v37, %v1481_v46  ;;  %v1516_v34 = vmul.f32 %v6905_v25, %v1480_v31  ;;  %1169 = vrot.lane.b32.xlu1 %v6293_v47, %s5940_s24  ;;  %912 = vrot.lane.b32.xlu0 %v6293_v47, %s5939_s2  ;;  %v1671_v27 = vrot.slane %v1134_v53, 4  ;;  %v10900_v46 = vld [vmem:[#allocation59_spill] sm:$0xff]  ;;  %v10921_v37 = vld [vmem:[#allocation89_spill] sm:$0xff] }
 0x1fe   :  { %v1866_v22 = vsel %vm822_vm3, %v963_v14, %v1628_v49  ;;  %v1712_v2 = vrot.slane %v1218_v58, 2  ;;  %v1910_v51 = vsel %vm822_vm3, %v10900_v46, %v1754_v62  ;;  %v10901_v53 = vld [vmem:[#allocation63_spill] sm:$0xff]  ;;  %v1670_v16 = vrot.slane %v1133_v63, 4  ;;  %v10903_v62 = vld [vmem:[#allocation61_spill] sm:$0xff] }
 0x1ff   :  { %v1713_v45 = vrot.slane %v1219_v60, 2  ;;  %v7045_v28 = vpop.permute.xlu1 %1284  ;;  %v1534_v30 = vpop.permute.xlu0 %1533  ;;  %v1838_v12 = vrot.slane %v1515_v40, 2  ;;  %v1839_v31 = vrot.slane %v1516_v34, 2  ;;  %v1882_v8 = vsel %vm1878_vm13, %v1867_v10, %v1671_v27  ;;  %v10902_v34 = vld [vmem:[#allocation58_spill] sm:$0xff] }
 0x200   :  { %v1911_v60 = vsel %vm822_vm3, %v10901_v53, %v1755_v6  ;;  %v1924_v25 = vsel %vm1878_vm13, %v1910_v51, %v1796_v4  ;;  %v1752_v40 = vrot.slane %v6995_v36, 6  ;;  %v1513_v14 = vmul.f32 %v10902_v34, %v1483_v21  ;;  %v10904_v4 = vld [vmem:[#allocation35_spill] sm:$0xff]  ;;  %v10905_v36 = vld [vmem:[#allocation65_spill] sm:$0xff] }
 0x201   :  { %1549 = vrot.lane.b32.xlu1 %v6283_v44, %s5943_s25  ;;  %1468 = vrot.lane.b32.xlu0 %v6361_v42, %s5941_s15  ;;  %v1897_v49 = vsel %vm1893_vm14, %v1882_v8, %v1713_v45  ;;  %v1925_v19 = vsel %vm1878_vm13, %v1911_v60, %v1797_v54  ;;  %v1938_v63 = vsel %vm1893_vm14, %v1924_v25, %v1838_v12  ;;  %v10906_v8 = vld [vmem:[#allocation12_spill] sm:$0xff]  ;;  %v10908_v12 = vld [vmem:[#allocation31_spill] sm:$0xff]  ;;  %v10910_v60 = vld [vmem:[#allocation37_spill] sm:$0xff] }
 0x202   :  { %v1939_v51 = vsel %vm1893_vm14, %v1925_v19, %v1839_v31  ;;  %v1347_v10 = vmul.f32 %v10903_v62, %v1309_v43  ;;  %v1565_v27 = vsel %vm1555_vm15, %v1534_v30, %v10904_v4  ;;  %v1881_v54 = vsel %vm1878_vm13, %v1866_v22, %v1670_v16  ;;  %v10907_v43 = vld [vmem:[#allocation36_spill] sm:$0xff]  ;;  %v10912_v19 = vld [vmem:[#allocation51_spill] sm:$0xff]  ;;  %v10916_v62 = vld [vmem:[#allocation26_spill] sm:$0xff] }
 0x203   :  { %v7066_v58 = vpop.permute.xlu1 %1369  ;;  %v7068_v6 = vpop.permute.xlu0 %987  ;;  %v5665_v45 = vpack.c.bf16 %v1939_v51, %v1897_v49  ;;  %v1432_v46 = vmul.f32 %v10905_v36, %v1394_v59  ;;  %v1896_v21 = vsel %vm1893_vm14, %v1881_v54, %v1712_v2  ;;  %v7081_v53 = vrot.slane %v6587_v38, %v10906_v8  ;;  %v10909_v59 = vld [vmem:[#allocation11_spill] sm:$0xff]  ;;  %v10911_v49 = vld [vmem:[#allocation32_spill] sm:$0xff] }
 0x204   :  { %v7085_v25 = vrot.slane %v6587_v38, %v6244_v26  ;;  %v1012_v31 = vsel %vm1003_vm7, %v10908_v12, %v10907_v43  ;;  %v5667_v16 = vpack.c.bf16 %v1938_v63, %v1896_v21  ;;  %v7095_v22 = vrot.slane %v6587_v38, %v10909_v59  ;;  %v10914_v21 = vld [vmem:[#allocation48_spill] sm:$0xff] }
 0x205   :  { %5666 = vmatprep.subr.bf16.mxu1 %v5665_v45  ;;  %1553 = vrot.lane.b32.xlu1 %v6361_v42, %s5943_s25  ;;  %v1794_v2 = vrot.slane %v7004_v35, 4  ;;  %v1097_v26 = vsel %vm1088_vm8, %v10911_v49, %v10910_v60  ;;  %v1566_v51 = vsel %vm1555_vm15, %v10912_v19, %v1534_v30  ;;  %v10913_v45 = vld [vmem:[#allocation93_spill] sm:$0xff]  ;;  %v1908_v35 = vsel %vm822_vm3, %v10914_v21, %v1752_v40  ;;  %v10915_v30 = vld [vmem:[#allocation27_spill] sm:$0xff] }
 0x206   :  { %v1601_v54 = vmul.f32 %v10913_v45, %v1565_v27  ;;  %1551 = vrot.lane.b32.xlu0 %v6293_v47, %s5943_s25  ;;  %v1836_v42 = vrot.slane %v1513_v14, 2  ;;  %v1756_v44 = vrot.slane %v1347_v10, 6  ;;  %5668 = vmatpush1.bf16.msra.mxu1 %v5667_v16  ;;  %v7116_v36 = vrot.slane %v6613_v17, %v6300_v61  ;;  %v10917_v45 = vld [vmem:[#allocation64_spill] sm:$0xff]  ;;  %v10918_v14 = vld [vmem:[#allocation30_spill] sm:$0xff]  ;;  %v10919_v10 = vld [vmem:[#allocation29_spill] sm:$0xff] }
 0x207   :  { %v7108_v63 = vpop.permute.xlu1 %1454  ;;  %v7110_v38 = vpop.permute.xlu0 %1072  ;;  %v1568_v27 = vsel %vm1555_vm15, %v10916_v62, %v10915_v30  ;;  %v7123_v47 = vmul.f32 %v10917_v45, %v1012_v31  ;;  %v1798_v20 = vrot.slane %v1432_v46, 4  ;;  %v7128_v40 = vrot.slane %v6613_v17, %v10909_v59  ;;  %v10920_v16 = vld [vmem:[#allocation66_spill] sm:$0xff] }
 0x208   :  { %5474 = vmatprep.subr.msk.mxu1 %vm822_vm3, %v1601_v54  ;;  %v1306_v61 = vsel %vm1300_vm10, %v10919_v10, %v10918_v14  ;;  %v7135_v21 = vmul.f32 %v10920_v16, %v1097_v26  ;;  %v1600_v62 = vmul.f32 %v10921_v37, %v1566_v51  ;;  %v7140_v31 = vrot.slane %v6613_v17, %v10906_v8  ;;  %v10922_v54 = vld [vmem:[#allocation38_spill] sm:$0xff]  ;;  %v10924_v51 = vld [vmem:[#allocation49_spill] sm:$0xff]  ;;  %v10942_v14 = vld [vmem:[#allocation91_spill] sm:$0xff] }
 0x209   :  { %v1922_v46 = vsel %vm1878_vm13, %v1908_v35, %v1794_v2  ;;  %v1479_v59 = vsel %vm1470_vm12, %v6554_v55, %v10922_v54  ;;  %v7153_v26 = vrot.slane %v6613_v17, %v6627_v33  ;;  %v7156_v16 = vmul.f32 %v10924_v51, %v1568_v27  ;;  %v10925_v8 = vld [vmem:[#allocation57_spill] sm:$0xff]  ;;  %v10926_v35 = vld [vmem:[#allocation40_spill] sm:$0xff] }
 0x20a   :  { %v1912_v2 = vsel %vm822_vm3, %v10925_v8, %v1756_v44  ;;  %v10927_v37 = vld [vmem:[#allocation33_spill] sm:$0xff]  ;;  %5475 = vmatpush1.msk.msra.mxu1 %vm822_vm3, %v1600_v62  ;;  %v7166_v48 = vsel %vm1893_vm14, %v1922_v46, %v1836_v42  ;;  %v7174_v33 = vmul.f32 %v6668_v13, %v1306_v61  ;;  %v1631_v44 = vrot.slane %v7123_v47, 6  ;;  %v10928_v46 = vld [vmem:[#allocation71_spill] sm:$0xff]  ;;  %v10929_v13 = vld [vmem:[#allocation20_spill] sm:$0xff] }
 0x20b   :  { %v7147_v45 = vpop.permute.xlu1 %1539  ;;  %v7149_v41 = vpop.permute.xlu0 %1001  ;;  %v927_v55 = vsel %vm918_vm6, %v10927_v37, %v10926_v35  ;;  %v7171_v17 = vld [vmem:[%s10554_s7] sm:$0xff]  ;;  %v7178_v27 = vsel %vm1878_vm13, %v1912_v2, %v1798_v20  ;;  %v1013_v62 = vsel %vm1003_vm7, %v6867_v15, %v10908_v12  ;;  %v1517_v8 = vmul.f32 %v10928_v46, %v1479_v59  ;;  %v10931_v15 = vld [vmem:[#allocation72_spill] sm:$0xff]  ;;  %v10932_v59 = vld [vmem:[#allocation34_spill] sm:$0xff] }
 0x20c   :  { %10923 = vst [vmem:[#allocation59_spill] sm:$0xff] %v7149_v41  ;;  %5476 = vmatmul.mubr.msk.f32.vlgmr.msra.gmra.mrb[10].mxu1 %vm1958_vm0, %v7171_v17  ;;  %v1098_v47 = vsel %vm1088_vm8, %v6923_v3, %v10911_v49  ;;  %v1017_v20 = vsel %vm1003_vm7, %v7149_v41, %v10929_v13  ;;  %v10930_v61 = vmov 0.0   ;;  %v966_v12 = vmul.f32 %v10931_v15, %v927_v55  ;;  %v10935_v55 = vld [vmem:[#allocation79_spill] sm:$0xff]  ;;  %v7230_v46 = vld [vmem:[%s10554_s7 + $0x8] sm:$0xff] }
 0x20d   :  { %2208 = vmatprep.mubr.f32.mxu1 %v10930_v61  ;;  %v928_v2 = vsel %vm918_vm6, %v6981_v0, %v10927_v37  ;;  %v1183_v42 = vsel %vm1173_vm9, %v7016_v39, %v10932_v59  ;;  %v1308_v3 = vsel %vm1300_vm10, %v6564_v24, %v7045_v28  ;;  %v1050_v15 = vmul.f32 %v10935_v55, %v1013_v62  ;;  %v10936_v0 = vld [vmem:[#allocation23_spill] sm:$0xff]  ;;  %v10939_v62 = vld [vmem:[#allocation50_spill] sm:$0xff] }
 0x20e   :  { %v1393_v37 = vsel %vm1385_vm11, %v6572_v52, %v7066_v58  ;;  %v10937_v41 = vld [vmem:[#allocation19_spill] sm:$0xff]  ;;  %10938 = vst [vmem:[#allocation12_spill] sm:$0xff] %v7230_v46  ;;  %v1182_v52 = vsel %vm1173_vm9, %v10932_v59, %v10939_v62  ;;  %v10940_v55 = vld [vmem:[#allocation82_spill] sm:$0xff]  ;;  %v1220_v18 = vmul.f32 %v10942_v14, %v1183_v42  ;;  %v1348_v11 = vmul.f32 %v6909_v7, %v1308_v3  ;;  %v10944_v3 = vld [vmem:[#allocation73_spill] sm:$0xff] }
 0x20f   :  { %v7210_v49 = vpop.permute.xlu1 %1171  ;;  %v7212_v13 = vpop.permute.xlu0 %1086  ;;  %v1135_v51 = vmul.f32 %v10940_v55, %v1098_v47  ;;  %v1840_v47 = vrot.slane %v1517_v8, 2  ;;  %v10943_v55 = vld [vmem:[#allocation41_spill] sm:$0xff]  ;;  %v1221_v7 = vmul.f32 %v10944_v3, %v1182_v52  ;;  %v10945_v8 = vld [vmem:[#allocation22_spill] sm:$0xff] }
 0x210   :  { %10933 = vst [vmem:[#allocation63_spill] sm:$0xff] %v7210_v49  ;;  %10934 = vst [vmem:[#allocation35_spill] sm:$0xff] %v7212_v13  ;;  %v1187_v39 = vsel %vm1173_vm9, %v7210_v49, %v10936_v0  ;;  %v1102_v24 = vsel %vm1088_vm8, %v7212_v13, %v10937_v41  ;;  %v1478_v0 = vsel %vm1470_vm12, %v10922_v54, %v7108_v63  ;;  %5477 = vmatmul.mubr.msk.f32.gmra.mrb[12].mxu1 %vm1958_vm0, %v7230_v46  ;;  %v10941_v41 = vld [vmem:[#allocation86_spill] sm:$0xff] }
 0x211   :  { %v1046_v49 = vmul.f32 %v6935_v57, %v1017_v20  ;;  %v965_v13 = vmul.f32 %v10941_v41, %v928_v2  ;;  %v1131_v59 = vmul.f32 %v7085_v25, %v1102_v24  ;;  %2214 = vmatprep.mubr.f32.mxu1 %v10930_v61  ;;  %v7253_v54 = vsel %vm1555_vm15, %v10904_v4, %v10943_v55  ;;  %v7270_v4 = vld [vmem:[%s10554_s7 + $0x10] sm:$0xff] }
 0x212   :  { %v1433_v20 = vmul.f32 %v6927_v23, %v1393_v37  ;;  %v1216_v46 = vmul.f32 %v7081_v53, %v1187_v39  ;;  %v1630_v24 = vrot.slane %v1050_v15, 6  ;;  %v1518_v14 = vmul.f32 %v6943_v29, %v1478_v0 }
 0x213   :  { %v7257_v2 = vpop.permute.xlu1 %1074  ;;  %v7259_v42 = vpop.permute.xlu0 %914  ;;  %v1869_v37 = vsel %vm822_vm3, %v966_v12, %v1631_v44  ;;  %v1672_v39 = vrot.slane %v1135_v51, 4  ;;  %v1626_v23 = vrot.slane %v1046_v49, 6  ;;  %v1714_v52 = vrot.slane %v1220_v18, 2 }
 0x214   :  { %v932_v41 = vsel %vm918_vm6, %v7259_v42, %v10945_v8  ;;  %5478 = vmatmul.mubr.msk.f32.gmra.mrb[14].mxu1 %vm1958_vm0, %v7270_v4  ;;  %v1868_v15 = vsel %vm822_vm3, %v965_v13, %v1630_v24  ;;  %v1757_v0 = vrot.slane %v1348_v11, 6  ;;  %v1668_v29 = vrot.slane %v1131_v59, 4  ;;  %v7293_v59 = vld [vmem:[%s10554_s7 + $0x18] sm:$0xff] }
 0x215   :  { %v961_v34 = vmul.f32 %v7095_v22, %v932_v41  ;;  %2220 = vmatprep.mubr.f32.mxu1 %v10930_v61  ;;  %v1799_v8 = vrot.slane %v1433_v20, 4  ;;  %v1011_v44 = vsel %vm1003_vm7, %v10907_v43, %v7068_v6  ;;  %v1710_v51 = vrot.slane %v1216_v46, 2  ;;  %v10948_v46 = vld [vmem:[#allocation68_spill] sm:$0xff] }
 0x216   :  { %v1715_v3 = vrot.slane %v1221_v7, 2  ;;  %v1567_v18 = vsel %vm1555_vm15, %v10915_v30, %v10912_v19  ;;  %v1841_v11 = vrot.slane %v1518_v14, 2  ;;  %v1940_v43 = vsel %vm1893_vm14, %v7178_v27, %v1840_v47 }
 0x217   :  { %v1864_v12 = vsel %vm822_vm3, %v961_v34, %v1626_v23  ;;  %v7283_v49 = vpop.permute.xlu1 %1373  ;;  %v1372_v41 = vpop.permute.xlu0 %1371  ;;  %v1307_v23 = vsel %vm1300_vm10, %v7045_v28, %v10919_v10  ;;  %v1883_v34 = vsel %vm1878_vm13, %v1868_v15, %v1672_v39  ;;  %v1052_v30 = vmul.f32 %v6939_v56, %v1011_v44  ;;  %v10947_v28 = vld [vmem:[#allocation60_spill] sm:$0xff] }
 0x218   :  { %v1879_v13 = vsel %vm1878_vm13, %v1864_v12, %v1668_v29  ;;  %5479 = vmatmul.mubr.msk.f32.gmra.mrb[16].mxu1 %vm1958_vm0, %v7293_v59  ;;  %v10946_v29 = vld [vmem:[#allocation28_spill] sm:$0xff]  ;;  %v1913_v10 = vsel %vm822_vm3, %v10947_v28, %v1757_v0  ;;  %v1599_v20 = vmul.f32 %v10948_v46, %v1567_v18  ;;  %v10949_v24 = vrot.slane %v7135_v21, 4 }
 0x219   :  { %v1894_v7 = vsel %vm1893_vm14, %v1879_v13, %v1710_v51  ;;  %v1010_v19 = vsel %vm1003_vm7, %v7068_v6, %v10946_v29  ;;  %2226 = vmatprep.mubr.f32.mxu1 %v10930_v61  ;;  %v1927_v6 = vsel %vm1878_vm13, %v1913_v10, %v1799_v8  ;;  %v1898_v15 = vsel %vm1893_vm14, %v1883_v34, %v1714_v52 }
 0x21a   :  { %v5663_v14 = vpack.c.bf16 %v7166_v48, %v1894_v7  ;;  %v1884_v39 = vsel %vm1878_vm13, %v1869_v37, %v10949_v24  ;;  %v1392_v48 = vsel %vm1385_vm11, %v7066_v58, %v1372_v41  ;;  %v1941_v51 = vsel %vm1893_vm14, %v1927_v6, %v1841_v11 }
 0x21b   :  { %v7315_v27 = vpop.permute.xlu1 %902  ;;  %v901_v47 = vpop.permute.xlu0 %900  ;;  %v1899_v44 = vsel %vm1893_vm14, %v1884_v39, %v1715_v3  ;;  %v1349_v21 = vmul.f32 %v6915_v9, %v1307_v23  ;;  %v1053_v37 = vmul.f32 %v6935_v57, %v1010_v19  ;;  %v1391_v52 = vsel %vm1385_vm11, %v1372_v41, %v7283_v49 }
 0x21c   :  { %v926_v0 = vsel %vm918_vm6, %v10926_v35, %v901_v47  ;;  %5664 = vmatpush1.bf16.msra.mxu0 %v5663_v14  ;;  %v925_v58 = vsel %vm918_vm6, %v901_v47, %v7315_v27  ;;  %v7342_v35 = vld [vmem:[%s10554_s7 + $0x20] sm:$0xff]  ;;  %v1632_v3 = vrot.slane %v1052_v30, 6  ;;  %v1096_v57 = vsel %vm1088_vm8, %v10910_v60, %v7110_v38 }
 0x21d   :  { %5464 = vmatprep.subr.msk.mxu0 %vm822_vm3, %v1599_v20  ;;  %v1563_v8 = vsel %vm1555_vm15, %v10943_v55, %v7147_v45  ;;  %v5671_v12 = vpack.c.bf16 %v1940_v43, %v1898_v15  ;;  %5480 = vmatmul.mubr.msk.f32.gmra.mrb[18].mxu1 %vm1958_vm0, %v7342_v35  ;;  %v1095_v41 = vsel %vm1088_vm8, %v7110_v38, %v7257_v2  ;;  %v5944_v15 = vmov 0  }
 0x21e   :  { %v1434_v18 = vmul.f32 %v7116_v36, %v1392_v48  ;;  %v967_v11 = vmul.f32 %v7128_v40, %v926_v0  ;;  %v5669_v23 = vpack.c.bf16 %v1941_v51, %v1899_v44  ;;  %2232 = vmatprep.mubr.f32.mxu1 %v10930_v61  ;;  %v1435_v55 = vmul.f32 %v6672_v5, %v1391_v52  ;;  %v3440_v48 = vld [vmem:[%s10555_s8] sm:$0xff]  ;;  %v10952_v52 = vld [vmem:[#allocation12_spill] sm:$0xff] }
 0x21f   :  { %v7360_v13 = vpop.permute.xlu1 %1159  ;;  %v1158_v60 = vpop.permute.xlu0 %1157  ;;  %v968_v7 = vmul.f32 %v7095_v22, %v925_v58  ;;  %v1603_v43 = vmul.f32 %v6917_v50, %v1563_v8  ;;  %v1758_v5 = vrot.slane %v1349_v21, 6  ;;  %v1633_v22 = vrot.slane %v1053_v37, 6  ;;  %5819 = vset.pattern.permute.xlu1 %v5944_v15  ;;  %v10951_v21 = vld [vmem:[#allocation58_spill] sm:$0xff]  ;;  %v7417_v8 = vld [vmem:[%s10554_s7 + $0x30] sm:$0xff]  ;;  %5820 = vset.pattern.permute.xlu0 %v5944_v15  ;;  %v10957_v15 = vld [vmem:[#allocation44_spill] sm:$0xff] }
 0x220   :  { %v1180_v34 = vsel %vm1173_vm9, %v1158_v60, %v7360_v13  ;;  %v1181_v38 = vsel %vm1173_vm9, %v10939_v62, %v1158_v60  ;;  %5465 = vmatpush1.msk.msra.mxu0 %vm822_vm3, %v7156_v16  ;;  %v1137_v14 = vmul.f32 %v6954_v1, %v1096_v57  ;;  %v1138_v28 = vmul.f32 %v7085_v25, %v1095_v41  ;;  %v7384_v16 = vld [vmem:[%s10554_s7 + $0x28] sm:$0xff]  ;;  %v10950_v62 = vld [vmem:[#allocation67_spill] sm:$0xff] }
 0x221   :  { %v1222_v19 = vmul.f32 %v7140_v31, %v1181_v38  ;;  %v1223_v30 = vmul.f32 %v7081_v53, %v1180_v34  ;;  %5466 = vmatmul.mubr.msk.f32.vlgmr.msra.gmra.mrb[6].mxu0 %vm1958_vm0, %v7171_v17  ;;  %5670 = vmatprep.subr.bf16.mxu0 %v5669_v23  ;;  %v1759_v53 = vrot.slane %v7174_v33, 6  ;;  %v1602_v10 = vmul.f32 %v10950_v62, %v7253_v54  ;;  %v10953_v58 = vld [vmem:[#allocation62_spill] sm:$0xff] }
 0x222   :  { %5672 = vmatpush1.bf16.msra.mxu0 %v5671_v12  ;;  %2095 = vmatprep.mubr.f32.mxu0 %v10930_v61  ;;  %v1800_v20 = vrot.slane %v1434_v18, 4  ;;  %v1870_v47 = vsel %vm822_vm3, %v967_v11, %v1632_v3  ;;  %v1801_v25 = vrot.slane %v1435_v55, 4  ;;  %v1871_v6 = vsel %vm822_vm3, %v968_v7, %v1633_v22  ;;  %v10954_v23 = vld [vmem:[#allocation54_spill] sm:$0xff] }
 0x223   :  { %v7390_v24 = vpop.permute.xlu1 %1458  ;;  %v1457_v39 = vpop.permute.xlu0 %1456  ;;  %5484 = vmatprep.subr.msk.mxu0 %vm822_vm3, %v1603_v43  ;;  %5481 = vmatmul.mubr.msk.f32.gmra.mrb[20].mxu1 %vm1958_vm0, %v7384_v16  ;;  %v1716_v0 = vrot.slane %v1222_v19, 2  ;;  %v1717_v44 = vrot.slane %v1223_v30, 2  ;;  %v1674_v3 = vrot.slane %v1137_v14, 4  ;;  %v1675_v57 = vrot.slane %v1138_v28, 4  ;;  %v7440_v28 = vld [vmem:[%s10554_s7 + $0x38] sm:$0xff] }
 0x224   :  { %v1476_v33 = vsel %vm1470_vm12, %v1457_v39, %v7390_v24  ;;  %v1477_v54 = vsel %vm1470_vm12, %v7108_v63, %v1457_v39  ;;  %2238 = vmatprep.mubr.f32.mxu1 %v10930_v61  ;;  %v1914_v63 = vsel %vm822_vm3, %v10953_v58, %v1758_v5  ;;  %v1915_v55 = vsel %vm822_vm3, %v10954_v23, %v1759_v53 }
 0x225   :  { %v1519_v51 = vmul.f32 %v7153_v26, %v1477_v54  ;;  %v1520_v37 = vmul.f32 %v10951_v21, %v1476_v33  ;;  %5467 = vmatmul.mubr.msk.f32.gmra.mrb[8].mxu0 %vm1958_vm0, %v10952_v52  ;;  %v1928_v12 = vsel %vm1878_vm13, %v1914_v63, %v1800_v20  ;;  %3450 = vperm.xlu1 %5819, %v3440_v48   ;;  %v10956_v54 = vld [vmem:[#allocation15_spill] sm:$0xff]  ;;  %v10958_v63 = vld [vmem:[#allocation74_spill] sm:$0xff] }
 0x226   :  { %5485 = vmatpush1.msk.msra.mxu0 %vm822_vm3, %v1602_v10  ;;  %2101 = vmatprep.mubr.f32.mxu0 %v10930_v61  ;;  %v1886_v7 = vsel %vm1878_vm13, %v1871_v6, %v1675_v57  ;;  %v1929_v34 = vsel %vm1878_vm13, %v1915_v55, %v1801_v25  ;;  %v1885_v38 = vsel %vm1878_vm13, %v1870_v47, %v1674_v3  ;;  %v10955_v47 = vld [vmem:[#allocation83_spill] sm:$0xff] }
 0x227   :  { %v1842_v41 = vrot.slane %v1519_v51, 2  ;;  %v1843_v18 = vrot.slane %v1520_v37, 2  ;;  %v7420_v11 = vpop.permute.xlu1 %993  ;;  %v992_v60 = vpop.permute.xlu0 %991  ;;  %5482 = vmatmul.mubr.msk.f32.gmra.mrb[22].mxu1 %vm1958_vm0, %v7417_v8  ;;  %v1901_v43 = vsel %vm1893_vm14, %v1886_v7, %v1717_v44  ;;  %v1900_v30 = vsel %vm1893_vm14, %v1885_v38, %v1716_v0  ;;  %v10959_v57 = vld [vmem:[#allocation87_spill] sm:$0xff]  ;;  %v10961_v38 = vld [vmem:[#allocation30_spill] sm:$0xff] }
 0x228   :  { %2244 = vmatprep.mubr.f32.mxu1 %v10930_v61  ;;  %v1267_v48 = vmul.f32 %v10957_v15, %v10956_v54  ;;  %v1008_v44 = vsel %vm1003_vm7, %v992_v60, %v7420_v11  ;;  %v1009_v23 = vsel %vm1003_vm7, %v10946_v29, %v992_v60  ;;  %v10962_v60 = vld [vmem:[#allocation77_spill] sm:$0xff]  ;;  %v10965_v54 = vld [vmem:[#allocation70_spill] sm:$0xff] }
 0x229   :  { %5468 = vmatmul.mubr.msk.f32.gmra.mrb[10].mxu0 %vm1958_vm0, %v7270_v4  ;;  %v1943_v19 = vsel %vm1893_vm14, %v1929_v34, %v1843_v18  ;;  %v1942_v5 = vsel %vm1893_vm14, %v1928_v12, %v1842_v41  ;;  %v1055_v3 = vmul.f32 %v10958_v63, %v1008_v44  ;;  %v10960_v41 = vld [vmem:[#allocation76_spill] sm:$0xff]  ;;  %v10967_v63 = vld [vmem:[#allocation53_spill] sm:$0xff] }
 0x22a   :  { %2107 = vmatprep.mubr.f32.mxu0 %v10930_v61  ;;  %v5673_v22 = vpack.c.bf16 %v1943_v19, %v1901_v43  ;;  %v5675_v14 = vpack.c.bf16 %v1942_v5, %v1900_v30 }
 0x22b   :  { %v7442_v53 = vpop.permute.xlu1 %1292  ;;  %v1291_v10 = vpop.permute.xlu0 %1290  ;;  %5483 = vmatmul.mubr.msk.f32.gmra.mrb[24].mxu1 %vm1958_vm0, %v7440_v28  ;;  %v1635_v5 = vrot.slane %v1055_v3, 6 }
 0x22c   :  { %v1304_v20 = vsel %vm1300_vm10, %v1291_v10, %v7442_v53  ;;  %5674 = vmatprep.subr.bf16.mxu1 %v5673_v22  ;;  %2428 = vmatprep.mubr.f32.mxu1 %v10930_v61  ;;  %v1305_v43 = vsel %vm1300_vm10, %v10961_v38, %v1291_v10  ;;  %v10963_v10 = vld [vmem:[#allocation47_spill] sm:$0xff] }
 0x22d   :  { %v1352_v39 = vmul.f32 %v10955_v47, %v1304_v20  ;;  %5469 = vmatmul.mubr.msk.f32.gmra.mrb[12].mxu0 %vm1958_vm0, %v7293_v59  ;;  %5676 = vmatpush1.bf16.msra.mxu1 %v5675_v14  ;;  %v1054_v20 = vmul.f32 %v10963_v10, %v1009_v23 }
 0x22e   :  { %2113 = vmatprep.mubr.f32.mxu0 %v10930_v61 }
 0x22f   :  { %v1761_v25 = vrot.slane %v1352_v39, 6  ;;  %v7454_v6 = vpop.permute.xlu1 %1078  ;;  %v1077_v33 = vpop.permute.xlu0 %1076  ;;  %v10964_v39 = vld [vmem:[#allocation69_spill] sm:$0xff]  ;;  %v1634_v23 = vrot.slane %v1054_v20, 6 }
 0x230   :  { %v1093_v51 = vsel %vm1088_vm8, %v1077_v33, %v7454_v6 }
 0x231   :  { %5470 = vmatmul.mubr.msk.f32.gmra.mrb[14].mxu0 %vm1958_vm0, %v7342_v35  ;;  %v1917_v0 = vsel %vm822_vm3, %v1267_v48, %v1761_v25  ;;  %v1140_v18 = vmul.f32 %v10960_v41, %v1093_v51  ;;  %v1351_v25 = vmul.f32 %v10964_v39, %v1305_v43  ;;  %v10966_v51 = vld [vmem:[#allocation55_spill] sm:$0xff]  ;;  %v10969_v41 = vld [vmem:[#allocation80_spill] sm:$0xff] }
 0x232   :  { %2119 = vmatprep.mubr.f32.mxu0 %v10930_v61  ;;  %v10973_v39 = vld [vmem:[#allocation92_spill] sm:$0xff] }
 0x233   :  { %v7468_v21 = vpop.permute.xlu1 %1377  ;;  %v1376_v37 = vpop.permute.xlu0 %1375  ;;  %v1677_v47 = vrot.slane %v1140_v18, 4 }
 0x234   :  { %v1389_v58 = vsel %vm1385_vm11, %v1376_v37, %v7468_v21  ;;  %v1390_v19 = vsel %vm1385_vm11, %v7283_v49, %v1376_v37  ;;  %v1094_v49 = vsel %vm1088_vm8, %v7257_v2, %v1077_v33  ;;  %v7517_v33 = vld [vmem:[#allocation3 + $0x68] ss:$0 sm:$0xff] }
 0x235   :  { %v1437_v12 = vmul.f32 %v10959_v57, %v1389_v58  ;;  %5471 = vmatmul.mubr.msk.f32.gmra.mrb[16].mxu0 %vm1958_vm0, %v7384_v16  ;;  %v1139_v3 = vmul.f32 %v10967_v63, %v1094_v49  ;;  %v10968_v57 = vld [vmem:[#allocation56_spill] sm:$0xff]  ;;  %v10972_v49 = vld [vmem:[#allocation75_spill] sm:$0xff] }
 0x236   :  { %2125 = vmatprep.mubr.f32.mxu0 %v10930_v61 }
 0x237   :  { %v1803_v55 = vrot.slane %v1437_v12, 4  ;;  %v7482_v7 = vpop.permute.xlu1 %906  ;;  %v905_v34 = vpop.permute.xlu0 %904  ;;  %v1676_v20 = vrot.slane %v1139_v3, 4 }
 0x238   :  { %v923_v30 = vsel %vm918_vm6, %v905_v34, %v7482_v7  ;;  %v924_v29 = vsel %vm918_vm6, %v7315_v27, %v905_v34  ;;  %v1436_v27 = vmul.f32 %v10965_v54, %v1390_v19  ;;  %v10971_v34 = vld [vmem:[#allocation42_spill] sm:$0xff] }
 0x239   :  { %v970_v22 = vmul.f32 %v10962_v60, %v923_v30  ;;  %5472 = vmatmul.mubr.msk.f32.gmra.mrb[18].mxu0 %vm1958_vm0, %v7417_v8  ;;  %v1931_v14 = vsel %vm1878_vm13, %v1917_v0, %v1803_v55  ;;  %v969_v0 = vmul.f32 %v10966_v51, %v924_v29  ;;  %v10970_v55 = vld [vmem:[#allocation18_spill] sm:$0xff] }
 0x23a   :  { %2131 = vmatprep.mubr.f32.mxu0 %v10930_v61  ;;  %v1266_v38 = vmul.f32 %v10971_v34, %v10970_v55  ;;  %v1802_v43 = vrot.slane %v1436_v27, 4 }
 0x23b   :  { %v1873_v15 = vsel %vm822_vm3, %v970_v22, %v1635_v5  ;;  %v7508_v48 = vpop.permute.xlu1 %1163  ;;  %v1162_v44 = vpop.permute.xlu0 %1161  ;;  %v1872_v29 = vsel %vm822_vm3, %v969_v0, %v1634_v23 }
 0x23c   :  { %v1178_v37 = vsel %vm1173_vm9, %v1162_v44, %v7508_v48  ;;  %v1179_v2 = vsel %vm1173_vm9, %v7360_v13, %v1162_v44  ;;  %v1888_v58 = vsel %vm1878_vm13, %v1873_v15, %v1677_v47  ;;  %v1760_v13 = vrot.slane %v1351_v25, 6 }
 0x23d   :  { %v1224_v12 = vmul.f32 %v10968_v57, %v1179_v2  ;;  %v1225_v18 = vmul.f32 %v10969_v41, %v1178_v37  ;;  %5473 = vmatmul.mubr.msk.f32.gmra.mrb[20].mxu0 %vm1958_vm0, %v7440_v28  ;;  %v10974_v57 = vld [vmem:[#allocation49_spill] sm:$0xff] }
 0x23e   :  { %2315 = vmatprep.mubr.f32.mxu0 %v10930_v61  ;;  %v1916_v27 = vsel %vm822_vm3, %v1266_v38, %v1760_v13  ;;  %v10975_v13 = vld [vmem:[#allocation89_spill] sm:$0xff] }
 0x23f   :  { %v1719_v19 = vrot.slane %v1225_v18, 2  ;;  %v7528_v30 = vpop.permute.xlu1 %1462  ;;  %v1461_v5 = vpop.permute.xlu0 %1460  ;;  %v1718_v60 = vrot.slane %v1224_v12, 2  ;;  %v1930_v37 = vsel %vm1878_vm13, %v1916_v27, %v1802_v43 }
 0x240   :  { %v1474_v22 = vsel %vm1470_vm12, %v1461_v5, %v7528_v30  ;;  %v1475_v10 = vsel %vm1470_vm12, %v7390_v24, %v1461_v5  ;;  %v1887_v24 = vsel %vm1878_vm13, %v1872_v29, %v1676_v20 }
 0x241   :  { %v1521_v47 = vmul.f32 %v10972_v49, %v1475_v10  ;;  %v1522_v25 = vmul.f32 %v10973_v39, %v1474_v22  ;;  %5486 = vmatmul.mubr.msk.f32.vlgmr.msra.gmra.mrb[22].mxu0 %vm1958_vm0, %v7171_v17  ;;  %v1903_v54 = vsel %vm1893_vm14, %v1888_v58, %v1719_v19  ;;  %v1902_v58 = vsel %vm1893_vm14, %v1887_v24, %v1718_v60  ;;  %v10978_v24 = vld [vmem:[#allocation84_spill] sm:$0xff] }
 0x242   :  { %2321 = vmatprep.mubr.f32.mxu0 %v10930_v61 }
 0x243   :  { %v1844_v15 = vrot.slane %v1521_v47, 2  ;;  %v1845_v44 = vrot.slane %v1522_v25, 2  ;;  %v1544_v51 = vpop.permute.xlu1 %1543  ;;  %v1542_v0 = vpop.permute.xlu0 %1541 }
 0x244   :  { %v1561_v2 = vsel %vm1555_vm15, %v1542_v0, %v1544_v51  ;;  %v1562_v63 = vsel %vm1555_vm15, %v7147_v45, %v1542_v0 }
 0x245   :  { %v1604_v3 = vmul.f32 %v7517_v33, %v1562_v63  ;;  %v1605_v12 = vmul.f32 %v10974_v57, %v1561_v2  ;;  %5487 = vmatmul.mubr.msk.f32.gmra.mrb[24].mxu0 %vm1958_vm0, %v10952_v52  ;;  %v1945_v41 = vsel %vm1893_vm14, %v1931_v14, %v1845_v44  ;;  %v1944_v18 = vsel %vm1893_vm14, %v1930_v37, %v1844_v15  ;;  %v10976_v15 = vld [vmem:[#allocation78_spill] sm:$0xff] }
 0x246   :  { %2327 = vmatprep.mubr.f32.mxu0 %v10930_v61  ;;  %v5677_v23 = vpack.c.bf16 %v1945_v41, %v1903_v54  ;;  %v5679_v55 = vpack.c.bf16 %v1944_v18, %v1902_v58 }
 0x247   :  { %v7559_v34 = vpop.permute.xlu1 %1547  ;;  %5494 = vmatprep.subr.msk.mxu1 %vm822_vm3, %v1605_v12  ;;  %v1546_v45 = vpop.permute.xlu0 %1545  ;;  %v10979_v12 = vld [vmem:[#allocation61_spill] sm:$0xff] }
 0x248   :  { %v1559_v38 = vsel %vm1555_vm15, %v1546_v45, %v7559_v34  ;;  %5495 = vmatpush1.msk.msra.mxu1 %vm822_vm3, %v1604_v3  ;;  %5678 = vmatprep.subr.bf16.mxu0 %v5677_v23  ;;  %v1560_v14 = vsel %vm1555_vm15, %v1544_v51, %v1546_v45 }
 0x249   :  { %v1607_v43 = vmul.f32 %v10975_v13, %v1559_v38  ;;  %5488 = vmatmul.mubr.msk.f32.gmra.mrb[26].mxu0 %vm1958_vm0, %v7270_v4  ;;  %5496 = vmatmul.mubr.msk.f32.vlgmr.msra.gmra.mrb[26].mxu1 %vm1958_vm0, %v7171_v17  ;;  %v1606_v29 = vmul.f32 %v10948_v46, %v1560_v14  ;;  %v10981_v38 = vld [vmem:[#allocation65_spill] sm:$0xff] }
 0x24a   :  { %5680 = vmatpush1.bf16.msra.mxu0 %v5679_v55  ;;  %2333 = vmatprep.mubr.f32.mxu0 %v10930_v61  ;;  %v10980_v55 = vld [vmem:[#allocation88_spill] sm:$0xff]  ;;  %v10982_v13 = vld [vmem:[#allocation81_spill] sm:$0xff] }
 0x24b   :  { %v7574_v19 = vpop.permute.xlu1 %997  ;;  %v996_v5 = vpop.permute.xlu0 %995  ;;  %5504 = vmatprep.subr.msk.mxu0 %vm822_vm3, %v1607_v43  ;;  %2434 = vmatprep.mubr.f32.mxu1 %v10930_v61 }
 0x24c   :  { %v1007_v47 = vsel %vm1003_vm7, %v7420_v11, %v996_v5  ;;  %v1006_v39 = vsel %vm1003_vm7, %v996_v5, %v7574_v19  ;;  %v10977_v11 = vld [vmem:[#allocation79_spill] sm:$0xff] }
 0x24d   :  { %5489 = vmatmul.mubr.msk.f32.gmra.mrb[28].mxu0 %vm1958_vm0, %v7293_v59  ;;  %5497 = vmatmul.mubr.msk.f32.gmra.mrb[28].mxu1 %vm1958_vm0, %v10952_v52  ;;  %v1056_v44 = vmul.f32 %v10976_v15, %v1007_v47  ;;  %v1057_v51 = vmul.f32 %v10977_v11, %v1006_v39  ;;  %v10984_v39 = vld [vmem:[#allocation86_spill] sm:$0xff] }
 0x24e   :  { %5505 = vmatpush1.msk.msra.mxu0 %vm822_vm3, %v1606_v29  ;;  %2339 = vmatprep.mubr.f32.mxu0 %v10930_v61  ;;  %v10985_v11 = vld [vmem:[#allocation82_spill] sm:$0xff] }
 0x24f   :  { %v7585_v60 = vpop.permute.xlu1 %1296  ;;  %v1295_v22 = vpop.permute.xlu0 %1294  ;;  %2440 = vmatprep.mubr.f32.mxu1 %v10930_v61  ;;  %v1636_v57 = vrot.slane %v1056_v44, 6 }
 0x250   :  { %v1303_v27 = vsel %vm1300_vm10, %v7442_v53, %v1295_v22  ;;  %v1302_v0 = vsel %vm1300_vm10, %v1295_v22, %v7585_v60 }
 0x251   :  { %5490 = vmatmul.mubr.msk.f32.gmra.mrb[30].mxu0 %vm1958_vm0, %v7342_v35  ;;  %5498 = vmatmul.mubr.msk.f32.gmra.mrb[30].mxu1 %vm1958_vm0, %v7270_v4  ;;  %v1353_v53 = vmul.f32 %v10978_v24, %v1303_v27  ;;  %v1354_v41 = vmul.f32 %v10979_v12, %v1302_v0  ;;  %v10986_v0 = vld [vmem:[#allocation94_spill] sm:$0xff]  ;;  %v10987_v24 = vld [vmem:[#allocation71_spill] sm:$0xff] }
 0x252   :  { %2345 = vmatprep.mubr.f32.mxu0 %v10930_v61  ;;  %2446 = vmatprep.mubr.f32.mxu1 %v10930_v61  ;;  %v10989_v12 = vld [vmem:[#allocation91_spill] sm:$0xff] }
 0x253   :  { %v7594_v46 = vpop.permute.xlu1 %1082  ;;  %v1081_v10 = vpop.permute.xlu0 %1080  ;;  %v1763_v44 = vrot.slane %v1354_v41, 6  ;;  %v10991_v41 = vld [vmem:[#allocation45_spill] sm:$0xff] }
 0x254   :  { %v1092_v3 = vsel %vm1088_vm8, %v7454_v6, %v1081_v10  ;;  %v1091_v6 = vsel %vm1088_vm8, %v1081_v10, %v7594_v46 }
 0x255   :  { %5491 = vmatmul.mubr.msk.f32.gmra.mrb[32].mxu0 %vm1958_vm0, %v7384_v16  ;;  %5499 = vmatmul.mubr.msk.f32.gmra.mrb[32].mxu1 %vm1958_vm0, %v7293_v59  ;;  %v1141_v43 = vmul.f32 %v10982_v13, %v1092_v3  ;;  %v10994_v13 = vld [vmem:[#allocation13_spill] sm:$0xff] }
 0x256   :  { %2351 = vmatprep.mubr.f32.mxu0 %v10930_v61  ;;  %2452 = vmatprep.mubr.f32.mxu1 %v10930_v61 }
 0x257   :  { %v7602_v20 = vpop.permute.xlu1 %1381  ;;  %v1380_v49 = vpop.permute.xlu0 %1379 }
 0x258   :  { %v1387_v37 = vsel %vm1385_vm11, %v1380_v49, %v7602_v20  ;;  %v1388_v2 = vsel %vm1385_vm11, %v7468_v21, %v1380_v49  ;;  %v1637_v21 = vrot.slane %v1057_v51, 6  ;;  %v10983_v49 = vld [vmem:[#allocation85_spill] sm:$0xff]  ;;  %v1142_v51 = vmul.f32 %v10985_v11, %v1091_v6  ;;  %v10992_v6 = vld [vmem:[#allocation14_spill] sm:$0xff] }
 0x259   :  { %5492 = vmatmul.mubr.msk.f32.gmra.mrb[34].mxu0 %vm1958_vm0, %v7417_v8  ;;  %5500 = vmatmul.mubr.msk.f32.gmra.mrb[34].mxu1 %vm1958_vm0, %v7342_v35  ;;  %v1438_v45 = vmul.f32 %v10980_v55, %v1388_v2  ;;  %v1439_v14 = vmul.f32 %v10981_v38, %v1387_v37  ;;  %v10993_v55 = vld [vmem:[#allocation46_spill] sm:$0xff] }
 0x25a   :  { %2357 = vmatprep.mubr.f32.mxu0 %v10930_v61  ;;  %2458 = vmatprep.mubr.f32.mxu1 %v10930_v61  ;;  %v7694_v38 = vmul.f32 %v10993_v55, %v10992_v6 }
 0x25b   :  { %v7616_v25 = vpop.permute.xlu1 %910  ;;  %v909_v54 = vpop.permute.xlu0 %908  ;;  %v1804_v37 = vrot.slane %v1438_v45, 4  ;;  %v1805_v2 = vrot.slane %v1439_v14, 4  ;;  %v10996_v45 = vld [vmem:[#allocation17_spill] sm:$0xff]  ;;  %v10997_v14 = vld [vmem:[#allocation52_spill] sm:$0xff] }
 0x25c   :  { %v921_v18 = vsel %vm918_vm6, %v909_v54, %v7616_v25  ;;  %v922_v23 = vsel %vm918_vm6, %v7482_v7, %v909_v54  ;;  %v1762_v7 = vrot.slane %v1353_v53, 6 }
 0x25d   :  { %5493 = vmatmul.mubr.msk.f32.gmra.mrb[36].mxu0 %vm1958_vm0, %v7440_v28  ;;  %5501 = vmatmul.mubr.msk.f32.gmra.mrb[36].mxu1 %vm1958_vm0, %v7384_v16  ;;  %v971_v47 = vmul.f32 %v10983_v49, %v922_v23  ;;  %v972_v54 = vmul.f32 %v10984_v39, %v921_v18  ;;  %v7700_v39 = vmul.f32 %v10997_v14, %v10996_v45 }
 0x25e   :  { %2464 = vmatprep.mubr.f32.mxu1 %v10930_v61  ;;  %2541 = vmatprep.mubr.f32.mxu0 %v10930_v61 }
 0x25f   :  { %v7639_v63 = vpop.permute.xlu1 %1167  ;;  %v1166_v58 = vpop.permute.xlu0 %1165 }
 0x260   :  { %v1176_v5 = vsel %vm1173_vm9, %v1166_v58, %v7639_v63  ;;  %v1177_v29 = vsel %vm1173_vm9, %v7508_v48, %v1166_v58  ;;  %v10988_v58 = vld [vmem:[#allocation90_spill] sm:$0xff] }
 0x261   :  { %5502 = vmatmul.mubr.msk.f32.gmra.mrb[38].mxu1 %vm1958_vm0, %v7417_v8  ;;  %5506 = vmatmul.mubr.msk.f32.vlgmr.msra.gmra.mrb[38].mxu0 %vm1958_vm0, %v7171_v17  ;;  %v1226_v3 = vmul.f32 %v10988_v58, %v1177_v29  ;;  %v1227_v18 = vmul.f32 %v10989_v12, %v1176_v5  ;;  %v1874_v5 = vsel %vm822_vm3, %v971_v47, %v1636_v57  ;;  %v1678_v58 = vrot.slane %v1141_v43, 4 }
 0x262   :  { %2470 = vmatprep.mubr.f32.mxu1 %v10930_v61  ;;  %2547 = vmatprep.mubr.f32.mxu0 %v10930_v61  ;;  %v1875_v29 = vsel %vm822_vm3, %v972_v54, %v1637_v21  ;;  %v1679_v12 = vrot.slane %v1142_v51, 4 }
 0x263   :  { %v7669_v22 = vpop.permute.xlu1 %1466  ;;  %v1465_v10 = vpop.permute.xlu0 %1464  ;;  %v1720_v6 = vrot.slane %v1226_v3, 2  ;;  %v1721_v55 = vrot.slane %v1227_v18, 2  ;;  %v1889_v54 = vsel %vm1878_vm13, %v1874_v5, %v1678_v58  ;;  %v11000_v18 = vld [vmem:[#allocation25_spill] sm:$0xff] }
 0x264   :  { %v1472_v27 = vsel %vm1470_vm12, %v1465_v10, %v7669_v22  ;;  %v1473_v15 = vsel %vm1470_vm12, %v7528_v30, %v1465_v10  ;;  %v10990_v30 = vld [vmem:[#allocation16_spill] sm:$0xff]  ;;  %v10995_v10 = vld [vmem:[#allocation43_spill] sm:$0xff]  ;;  %v1890_v47 = vsel %vm1878_vm13, %v1875_v29, %v1679_v12  ;;  %v11005_v12 = vld [vmem:[#allocation66_spill] sm:$0xff] }
 0x265   :  { %v1523_v48 = vmul.f32 %v10986_v0, %v1473_v15  ;;  %v1524_v53 = vmul.f32 %v10987_v24, %v1472_v27  ;;  %5503 = vmatmul.mubr.msk.f32.gmra.mrb[40].mxu1 %vm1958_vm0, %v7440_v28  ;;  %5507 = vmatmul.mubr.msk.f32.gmra.mrb[40].mxu0 %vm1958_vm0, %v10952_v52  ;;  %v1268_v23 = vmul.f32 %v10991_v41, %v10990_v30  ;;  %v11003_v29 = vld [vmem:[#allocation64_spill] sm:$0xff] }
 0x266   :  { %2553 = vmatprep.mubr.f32.mxu0 %v10930_v61  ;;  %2654 = vmatprep.mubr.f32.mxu1 %v10930_v61  ;;  %v1269_v49 = vmul.f32 %v10995_v10, %v10994_v13  ;;  %v11001_v13 = vld [vmem:[#allocation35_spill] sm:$0xff]  ;;  %v1904_v5 = vsel %vm1893_vm14, %v1889_v54, %v1720_v6 }
 0x267   :  { %v1846_v27 = vrot.slane %v1523_v48, 2  ;;  %v1847_v15 = vrot.slane %v1524_v53, 2  ;;  %v1299_v11 = vpop.permute.xlu1 %1298  ;;  %v1000_v0 = vpop.permute.xlu0 %999  ;;  %v1918_v24 = vsel %vm822_vm3, %v1268_v23, %v1762_v7  ;;  %v10998_v7 = vld [vmem:[#allocation21_spill] sm:$0xff]  ;;  %v11006_v6 = vld [vmem:[#allocation63_spill] sm:$0xff] }
 0x268   :  { %v1919_v30 = vsel %vm822_vm3, %v1269_v49, %v1763_v44  ;;  %v1932_v41 = vsel %vm1878_vm13, %v1918_v24, %v1804_v37  ;;  %v1301_v21 = vsel %vm1300_vm10, %v7585_v60, %v1299_v11  ;;  %v1314_v43 = vsel %vm1300_vm10, %v1299_v11, %v10998_v7  ;;  %v10999_v44 = vld [vmem:[#allocation59_spill] sm:$0xff] }
 0x269   :  { %5508 = vmatmul.mubr.msk.f32.gmra.mrb[42].mxu0 %vm1958_vm0, %v7270_v4  ;;  %v1933_v57 = vsel %vm1878_vm13, %v1919_v30, %v1805_v2  ;;  %v1004_v51 = vsel %vm1003_vm7, %v1000_v0, %v10999_v44  ;;  %v1005_v48 = vsel %vm1003_vm7, %v7574_v19, %v1000_v0  ;;  %v1946_v2 = vsel %vm1893_vm14, %v1932_v41, %v1846_v27  ;;  %v11002_v49 = vld [vmem:[#allocation95_spill] sm:$0xff] }
 0x26a   :  { %2559 = vmatprep.mubr.f32.mxu0 %v10930_v61  ;;  %v1947_v60 = vsel %vm1893_vm14, %v1933_v57, %v1847_v15  ;;  %v1355_v45 = vmul.f32 %v11002_v49, %v1301_v21  ;;  %v1356_v14 = vmul.f32 %v6915_v9, %v1314_v43  ;;  %v1058_v27 = vmul.f32 %v11003_v29, %v1005_v48  ;;  %v11010_v49 = vld [vmem:[#allocation97_spill] sm:$0xff] }
 0x26b   :  { %v1384_v53 = vpop.permute.xlu1 %1383  ;;  %v1085_v37 = vpop.permute.xlu0 %1084  ;;  %v1059_v15 = vmul.f32 %v6939_v56, %v1004_v51  ;;  %v5683_v0 = vpack.c.bf16 %v1946_v2, %v1904_v5 }
 0x26c   :  { %v1386_v3 = vsel %vm1385_vm11, %v7602_v20, %v1384_v53  ;;  %v1399_v23 = vsel %vm1385_vm11, %v1384_v53, %v11000_v18  ;;  %v1089_v10 = vsel %vm1088_vm8, %v1085_v37, %v11001_v13  ;;  %v1090_v19 = vsel %vm1088_vm8, %v7594_v46, %v1085_v37  ;;  %v11004_v46 = vld [vmem:[#allocation96_spill] sm:$0xff] }
 0x26d   :  { %5509 = vmatmul.mubr.msk.f32.gmra.mrb[44].mxu0 %vm1958_vm0, %v7293_v59  ;;  %v1905_v20 = vsel %vm1893_vm14, %v1890_v47, %v1721_v55  ;;  %v1440_v24 = vmul.f32 %v11004_v46, %v1386_v3  ;;  %v1441_v58 = vmul.f32 %v7116_v36, %v1399_v23  ;;  %v1143_v30 = vmul.f32 %v11005_v12, %v1090_v19 }
 0x26e   :  { %2565 = vmatprep.mubr.f32.mxu0 %v10930_v61  ;;  %v5681_v11 = vpack.c.bf16 %v1947_v60, %v1905_v20  ;;  %v1144_v9 = vmul.f32 %v6954_v1, %v1089_v10  ;;  %v1764_v36 = vrot.slane %v1355_v45, 6  ;;  %v11007_v1 = vld [vmem:[#allocation73_spill] sm:$0xff]  ;;  %v1638_v54 = vrot.slane %v1058_v27, 6  ;;  %v11009_v10 = vld [vmem:[#allocation24_spill] sm:$0xff] }
 0x26f   :  { %v1170_v41 = vpop.permute.xlu1 %1169  ;;  %v913_v55 = vpop.permute.xlu0 %912  ;;  %v1639_v44 = vrot.slane %v1059_v15, 6  ;;  %v1806_v53 = vrot.slane %v1440_v24, 4  ;;  %v1807_v37 = vrot.slane %v1441_v58, 4  ;;  %v1680_v60 = vrot.slane %v1143_v30, 4 }
 0x270   :  { %5682 = vmatprep.subr.bf16.mxu1 %v5681_v11  ;;  %v1174_v57 = vsel %vm1173_vm9, %v1170_v41, %v11006_v6  ;;  %v1175_v56 = vsel %vm1173_vm9, %v7639_v63, %v1170_v41  ;;  %v919_v21 = vsel %vm918_vm6, %v913_v55, %v7259_v42  ;;  %v920_v47 = vsel %vm918_vm6, %v7616_v25, %v913_v55  ;;  %v11008_v63 = vld [vmem:[#allocation72_spill] sm:$0xff] }
 0x271   :  { %5510 = vmatmul.mubr.msk.f32.gmra.mrb[46].mxu0 %vm1958_vm0, %v7342_v35  ;;  %5684 = vmatpush1.bf16.msra.mxu1 %v5683_v0  ;;  %v1228_v7 = vmul.f32 %v11007_v1, %v1175_v56  ;;  %v1229_v43 = vmul.f32 %v7140_v31, %v1174_v57  ;;  %v973_v51 = vmul.f32 %v11008_v63, %v920_v47  ;;  %v1765_v42 = vrot.slane %v1356_v14, 6  ;;  %v3600_v14 = vld [vmem:[%s10556_s9] sm:$0xff] }
 0x272   :  { %v974_v48 = vmul.f32 %v7128_v40, %v919_v21  ;;  %2571 = vmatprep.mubr.f32.mxu0 %v10930_v61  ;;  %v1681_v18 = vrot.slane %v1144_v9, 4  ;;  %3610 = vperm.xlu1 %5819, %v3600_v14   ;;  %v1920_v29 = vsel %vm822_vm3, %v7694_v38, %v1764_v36  ;;  %v11011_v9 = vld [vmem:[#allocation26_spill] sm:$0xff]  ;;  %v11012_v56 = vld [vmem:[#allocation93_spill] sm:$0xff] }
 0x273   :  { %v1550_v2 = vpop.permute.xlu1 %1549  ;;  %v1469_v3 = vpop.permute.xlu0 %1468  ;;  %v1876_v31 = vsel %vm822_vm3, %v973_v51, %v1638_v54  ;;  %v1722_v40 = vrot.slane %v1228_v7, 2  ;;  %v1723_v13 = vrot.slane %v1229_v43, 2  ;;  %v1921_v11 = vsel %vm822_vm3, %v7700_v39, %v1765_v42  ;;  %v3443_v43 = vld [vmem:[%s10555_s8 + $0x18] sm:$0xff]  ;;  %v3604_v47 = vld [vmem:[%s10556_s9 + $0x20] sm:$0xff] }
 0x274   :  { %v1877_v23 = vsel %vm822_vm3, %v974_v48, %v1639_v44  ;;  %v1471_v25 = vsel %vm1470_vm12, %v7669_v22, %v1469_v3  ;;  %v1484_v19 = vsel %vm1470_vm12, %v1469_v3, %v11009_v10  ;;  %v1891_v5 = vsel %vm1878_vm13, %v1876_v31, %v1680_v60 }
 0x275   :  { %5511 = vmatmul.mubr.msk.f32.gmra.mrb[48].mxu0 %vm1958_vm0, %v7384_v16  ;;  %v1525_v45 = vmul.f32 %v11010_v49, %v1471_v25  ;;  %v1526_v20 = vmul.f32 %v7153_v26, %v1484_v19  ;;  %v1892_v22 = vsel %vm1878_vm13, %v1877_v23, %v1681_v18  ;;  %v1934_v0 = vsel %vm1878_vm13, %v1920_v29, %v1806_v53 }
 0x276   :  { %2577 = vmatprep.mubr.f32.mxu0 %v10930_v61  ;;  %v1558_v46 = vsel %vm1555_vm15, %v7559_v34, %v1550_v2  ;;  %v1935_v58 = vsel %vm1878_vm13, %v1921_v11, %v1807_v37  ;;  %v1907_v39 = vsel %vm1893_vm14, %v1892_v22, %v1723_v13  ;;  %v1906_v12 = vsel %vm1893_vm14, %v1891_v5, %v1722_v40  ;;  %v3601_v34 = vld [vmem:[%s10556_s9 + $0x8] sm:$0xff] }
 0x277   :  { %v1848_v27 = vrot.slane %v1525_v45, 2  ;;  %v1554_v15 = vpop.permute.xlu1 %1553  ;;  %v1849_v26 = vrot.slane %v1526_v20, 2  ;;  %3615 = vperm.xlu1 %5819, %v3601_v34   ;;  %v1608_v21 = vmul.f32 %v11012_v56, %v1558_v46 }
 0x278   :  { %v1552_v24 = vpop.permute.xlu0 %1551  ;;  %v1569_v41 = vsel %vm1555_vm15, %v1554_v15, %v11011_v9 }
 0x279   :  { %5512 = vmatmul.mubr.msk.f32.gmra.mrb[50].mxu0 %vm1958_vm0, %v7417_v8  ;;  %v1557_v38 = vsel %vm1555_vm15, %v1550_v2, %v1552_v24  ;;  %v1948_v30 = vsel %vm1893_vm14, %v1934_v0, %v1848_v27  ;;  %v1949_v6 = vsel %vm1893_vm14, %v1935_v58, %v1849_v26  ;;  %v1611_v1 = vmul.f32 %v7517_v33, %v1569_v41 }
 0x27a   :  { %2583 = vmatprep.mubr.f32.mxu0 %v10930_v61  ;;  %v1609_v55 = vmul.f32 %v10950_v62, %v1557_v38  ;;  %v5687_v57 = vpack.c.bf16 %v1948_v30, %v1906_v12  ;;  %v5685_v36 = vpack.c.bf16 %v1949_v6, %v1907_v39  ;;  %v1556_v7 = vsel %vm1555_vm15, %v1552_v24, %v1554_v15  ;;  %v3442_v62 = vld [vmem:[%s10555_s8 + $0x10] sm:$0xff] }
 0x27b   :  { %v1610_v33 = vmul.f32 %v6917_v50, %v1556_v7  ;;  %3460 = vperm.xlu1 %5819, %v3442_v62   ;;  %v3602_v50 = vld [vmem:[%s10556_s9 + $0x10] sm:$0xff] }
 0x27c   :  { %5514 = vmatprep.subr.msk.mxu1 %vm822_vm3, %v1609_v55  ;;  %5686 = vmatprep.subr.bf16.mxu0 %v5685_v36 }
 0x27d   :  { %5513 = vmatmul.mubr.msk.f32.gmra.mrb[52].mxu0 %vm1958_vm0, %v7440_v28  ;;  %5515 = vmatpush1.msk.msra.mxu1 %vm822_vm3, %v1608_v21 }
 0x27e   :  { %5516 = vmatmul.mubr.msk.f32.vlgmr.msra.gmra.mrb[42].mxu1 %vm1958_vm0, %v7171_v17  ;;  %5688 = vmatpush1.bf16.msra.mxu0 %v5687_v57 }
 0x27f   :  { %5524 = vmatprep.subr.msk.mxu0 %vm822_vm3, %v1611_v1  ;;  %2660 = vmatprep.mubr.f32.mxu1 %v10930_v61 }
 0x280   :  { %2767 = vmatprep.mubr.f32.mxu0 %v10930_v61  ;;  %3465 = vperm.xlu1 %5819, %v3443_v43  }
 0x282   :  { %5517 = vmatmul.mubr.msk.f32.gmra.mrb[44].mxu1 %vm1958_vm0, %v10952_v52  ;;  %5525 = vmatpush1.msk.msra.mxu0 %vm822_vm3, %v1610_v33 }
 0x283   :  { %5526 = vmatmul.mubr.msk.f32.vlgmr.msra.gmra.mrb[54].mxu0 %vm1958_vm0, %v7171_v17  ;;  %2666 = vmatprep.mubr.f32.mxu1 %v10930_v61  ;;  %v3603_v17 = vld [vmem:[%s10556_s9 + $0x18] sm:$0xff] }
 0x284   :  { %2773 = vmatprep.mubr.f32.mxu0 %v10930_v61  ;;  %3620 = vperm.xlu1 %5819, %v3602_v50  }
 0x286   :  { %5518 = vmatmul.mubr.msk.f32.gmra.mrb[46].mxu1 %vm1958_vm0, %v7270_v4 }
 0x287   :  { %5527 = vmatmul.mubr.msk.f32.gmra.mrb[56].mxu0 %vm1958_vm0, %v10952_v52  ;;  %2672 = vmatprep.mubr.f32.mxu1 %v10930_v61  ;;  %v3444_v52 = vld [vmem:[%s10555_s8 + $0x20] sm:$0xff] }
 0x288   :  { %2779 = vmatprep.mubr.f32.mxu0 %v10930_v61  ;;  %3625 = vperm.xlu1 %5819, %v3603_v17  }
 0x28a   :  { %5519 = vmatmul.mubr.msk.f32.gmra.mrb[48].mxu1 %vm1958_vm0, %v7293_v59 }
 0x28b   :  { %5528 = vmatmul.mubr.msk.f32.gmra.mrb[58].mxu0 %vm1958_vm0, %v7270_v4  ;;  %2678 = vmatprep.mubr.f32.mxu1 %v10930_v61  ;;  %v3445_v4 = vld [vmem:[%s10555_s8 + $0x28] sm:$0xff] }
 0x28c   :  { %2785 = vmatprep.mubr.f32.mxu0 %v10930_v61  ;;  %3470 = vperm.xlu1 %5819, %v3444_v52  }
 0x28e   :  { %5520 = vmatmul.mubr.msk.f32.gmra.mrb[50].mxu1 %vm1958_vm0, %v7342_v35 }
 0x28f   :  { %5529 = vmatmul.mubr.msk.f32.gmra.mrb[60].mxu0 %vm1958_vm0, %v7293_v59  ;;  %2684 = vmatprep.mubr.f32.mxu1 %v10930_v61  ;;  %v3605_v59 = vld [vmem:[%s10556_s9 + $0x28] sm:$0xff] }
 0x290   :  { %2791 = vmatprep.mubr.f32.mxu0 %v10930_v61  ;;  %3475 = vperm.xlu1 %5819, %v3445_v4  }
 0x292   :  { %5521 = vmatmul.mubr.msk.f32.gmra.mrb[52].mxu1 %vm1958_vm0, %v7384_v16 }
 0x293   :  { %5530 = vmatmul.mubr.msk.f32.gmra.mrb[62].mxu0 %vm1958_vm0, %v7342_v35  ;;  %2690 = vmatprep.mubr.f32.mxu1 %v10930_v61  ;;  %v3447_v35 = vld [vmem:[%s10555_s8 + $0x38] sm:$0xff] }
 0x294   :  { %2797 = vmatprep.mubr.f32.mxu0 %v10930_v61  ;;  %3635 = vperm.xlu1 %5819, %v3605_v59  }
 0x296   :  { %5522 = vmatmul.mubr.msk.f32.gmra.mrb[54].mxu1 %vm1958_vm0, %v7417_v8 }
 0x297   :  { %5531 = vmatmul.mubr.msk.f32.gmra.mrb[64].mxu0 %vm1958_vm0, %v7384_v16  ;;  %2696 = vmatprep.mubr.f32.mxu1 %v10930_v61  ;;  %v3441_v16 = vld [vmem:[%s10555_s8 + $0x8] sm:$0xff] }
 0x298   :  { %2803 = vmatprep.mubr.f32.mxu0 %v10930_v61  ;;  %3485 = vperm.xlu1 %5819, %v3447_v35  }
 0x299   :  { %3455 = vperm.xlu0 %5820, %v3441_v16  }
 0x29a   :  { %5523 = vmatmul.mubr.msk.f32.gmra.mrb[56].mxu1 %vm1958_vm0, %v7440_v28 }
 0x29b   :  { %5532 = vmatmul.mubr.msk.f32.gmra.mrb[66].mxu0 %vm1958_vm0, %v7417_v8  ;;  %3945 = vmatprep.mubr.f32.mxu1 %v10930_v61  ;;  %v3446_v8 = vld [vmem:[%s10555_s8 + $0x30] sm:$0xff] }
 0x29c   :  { %2809 = vmatprep.mubr.f32.mxu0 %v10930_v61 }
 0x29d   :  { %3630 = vperm.xlu0 %5820, %v3604_v47  }
 0x29f   :  { %5533 = vmatmul.mubr.msk.f32.gmra.mrb[68].mxu0 %vm1958_vm0, %v7440_v28 }
 0x2a0   :  { %4099 = vmatprep.mubr.f32.mxu0 %v10930_v61 }
 0x2a1   :  { %3480 = vperm.xlu0 %5820, %v3446_v8  }
 0x2df   :  { %v7907_v54 = vpop.f32.mrb[10].mxu1 }
 0x2e0   :  { %11013 = vst [vmem:[#allocation36_spill] sm:$0xff] %v7907_v54  ;;  %v7909_v28 = vpop.f32.mrb[11].mxu1  ;;  %v2938_v25 = vmul.f32 %v7907_v54, %v7907_v54 }
 0x2e1   :  { %v2939_v45 = vmul.f32 %v7909_v28, %v7909_v28 }
 0x2e3   :  { %v7911_v44 = vpop.f32.mrb[12].mxu1 }
 0x2e4   :  { %11014 = vst [vmem:[#allocation31_spill] sm:$0xff] %v7911_v44  ;;  %v7913_v63 = vpop.f32.mrb[13].mxu1  ;;  %v2952_v22 = vmul.f32 %v7911_v44, %v7911_v44 }
 0x2e5   :  { %v2953_v38 = vmul.f32 %v7913_v63, %v7913_v63 }
 0x2e7   :  { %v7915_v51 = vpop.f32.mrb[14].mxu1 }
 0x2e8   :  { %11015 = vst [vmem:[#allocation11_spill] sm:$0xff] %v7915_v51  ;;  %v7917_v48 = vpop.f32.mrb[15].mxu1  ;;  %v2966_v30 = vmul.f32 %v7915_v51, %v7915_v51 }
 0x2e9   :  { %11016 = vst [vmem:[#allocation37_spill] sm:$0xff] %v7917_v48  ;;  %v2967_v7 = vmul.f32 %v7917_v48, %v7917_v48 }
 0x2eb   :  { %v7919_v42 = vpop.f32.mrb[16].mxu1 }
 0x2ec   :  { %11017 = vst [vmem:[#allocation32_spill] sm:$0xff] %v7919_v42  ;;  %v7921_v53 = vpop.f32.mrb[17].mxu1  ;;  %v2980_v43 = vmul.f32 %v7919_v42, %v7919_v42 }
 0x2ed   :  { %11018 = vst [vmem:[#allocation51_spill] sm:$0xff] %v7921_v53  ;;  %v2981_v8 = vmul.f32 %v7921_v53, %v7921_v53 }
 0x2f0   :  { %v7923_v37 = vpop.f32.mrb[18].mxu1 }
 0x2f1   :  { %11019 = vst [vmem:[#allocation48_spill] sm:$0xff] %v7923_v37  ;;  %v7925_v60 = vpop.f32.mrb[19].mxu1 }
 0x2f2   :  { %11020 = vst [vmem:[#allocation27_spill] sm:$0xff] %v7925_v60 }
 0x2f4   :  { %v7927_v2 = vpop.f32.mrb[6].mxu0 }
 0x2f5   :  { %v2936_v3 = vmul.f32 %v7927_v2, %v7927_v2  ;;  %v7931_v18 = vpop.f32.mrb[7].mxu0 }
 0x2f6   :  { %v2816_v31 = vadd.f32 %v7931_v18, %v7927_v2  ;;  %v2937_v23 = vmul.f32 %v7931_v18, %v7931_v18  ;;  %v7939_v40 = vpop.f32.mrb[20].mxu1 }
 0x2f7   :  { %11021 = vst [vmem:[#allocation29_spill] sm:$0xff] %v7939_v40  ;;  %v7941_v13 = vpop.f32.mrb[21].mxu1 }
 0x2f8   :  { %11022 = vst [vmem:[#allocation38_spill] sm:$0xff] %v7941_v13  ;;  %v3048_v10 = vadd.f32 %v2937_v23, %v2936_v3  ;;  %v7943_v19 = vpop.f32.mrb[8].mxu0  ;;  %v2817_v49 = vadd.f32 %v2816_v31, %v7907_v54  ;;  %v2994_v23 = vmul.f32 %v7923_v37, %v7923_v37 }
 0x2f9   :  { %v2950_v14 = vmul.f32 %v7943_v19, %v7943_v19  ;;  %v7950_v20 = vpop.f32.mrb[9].mxu0 }
 0x2fa   :  { %v2831_v5 = vadd.f32 %v7950_v20, %v7943_v19  ;;  %v2951_v29 = vmul.f32 %v7950_v20, %v7950_v20  ;;  %v3049_v27 = vadd.f32 %v3048_v10, %v2938_v25  ;;  %v7959_v15 = vadd.f32 %v2817_v49, %v7909_v28  ;;  %v7961_v11 = vpop.f32.mrb[22].mxu1 }
 0x2fb   :  { %11023 = vst [vmem:[#allocation57_spill] sm:$0xff] %v7961_v11  ;;  %v7963_v0 = vpop.f32.mrb[23].mxu1 }
 0x2fc   :  { %11024 = vst [vmem:[#allocation40_spill] sm:$0xff] %v7963_v0  ;;  %v3063_v46 = vadd.f32 %v2951_v29, %v2950_v14  ;;  %v7965_v26 = vpop.f32.mrb[10].mxu0  ;;  %v7967_v24 = vadd.f32 %v3049_v27, %v2939_v45  ;;  %v2832_v58 = vadd.f32 %v2831_v5, %v7911_v44  ;;  %v2995_v27 = vmul.f32 %v7925_v60, %v7925_v60 }
 0x2fd   :  { %v2964_v39 = vmul.f32 %v7965_v26, %v7965_v26  ;;  %v7974_v12 = vpop.f32.mrb[11].mxu0 }
 0x2fe   :  { %v2846_v34 = vadd.f32 %v7974_v12, %v7965_v26  ;;  %v2965_v9 = vmul.f32 %v7974_v12, %v7974_v12  ;;  %v3064_v41 = vadd.f32 %v3063_v46, %v2952_v22  ;;  %v7983_v55 = vadd.f32 %v2832_v58, %v7913_v63  ;;  %v7985_v6 = vpop.f32.mrb[24].mxu1 }
 0x2ff   :  { %11025 = vst [vmem:[#allocation33_spill] sm:$0xff] %v7985_v6  ;;  %v7987_v57 = vpop.f32.mrb[25].mxu1 }
 0x300   :  { %11026 = vst [vmem:[#allocation20_spill] sm:$0xff] %v7987_v57  ;;  %v3078_v56 = vadd.f32 %v2965_v9, %v2964_v39  ;;  %v7989_v21 = vpop.f32.mrb[12].mxu0  ;;  %v7991_v36 = vadd.f32 %v3064_v41, %v2953_v38  ;;  %v2847_v1 = vadd.f32 %v2846_v34, %v7915_v51  ;;  %v3008_v38 = vmul.f32 %v7939_v40, %v7939_v40 }
 0x301   :  { %11027 = vst [vmem:[#allocation34_spill] sm:$0xff] %v7989_v21  ;;  %v2978_v62 = vmul.f32 %v7989_v21, %v7989_v21  ;;  %v7998_v33 = vpop.f32.mrb[13].mxu0 }
 0x302   :  { %11028 = vst [vmem:[#allocation23_spill] sm:$0xff] %v7998_v33  ;;  %v2861_v50 = vadd.f32 %v7998_v33, %v7989_v21  ;;  %v2979_v17 = vmul.f32 %v7998_v33, %v7998_v33  ;;  %v3079_v52 = vadd.f32 %v3078_v56, %v2966_v30  ;;  %v8007_v4 = vadd.f32 %v2847_v1, %v7917_v48 }
 0x304   :  { %v3093_v59 = vadd.f32 %v2979_v17, %v2978_v62  ;;  %v8009_v35 = vpop.f32.mrb[14].mxu0  ;;  %v8011_v16 = vadd.f32 %v3079_v52, %v2967_v7  ;;  %v2862_v47 = vadd.f32 %v2861_v50, %v7919_v42  ;;  %v3009_v62 = vmul.f32 %v7941_v13, %v7941_v13 }
 0x305   :  { %11029 = vst [vmem:[#allocation19_spill] sm:$0xff] %v8009_v35  ;;  %v2992_v3 = vmul.f32 %v8009_v35, %v8009_v35  ;;  %v8018_v31 = vpop.f32.mrb[15].mxu0  ;;  %v3022_v17 = vmul.f32 %v7961_v11, %v7961_v11 }
 0x306   :  { %11030 = vst [vmem:[#allocation50_spill] sm:$0xff] %v8018_v31  ;;  %v2876_v25 = vadd.f32 %v8018_v31, %v8009_v35  ;;  %v2993_v10 = vmul.f32 %v8018_v31, %v8018_v31  ;;  %v3094_v49 = vadd.f32 %v3093_v59, %v2980_v43  ;;  %v8027_v45 = vadd.f32 %v2862_v47, %v7921_v53 }
 0x308   :  { %v3108_v14 = vadd.f32 %v2993_v10, %v2992_v3  ;;  %v8029_v22 = vpop.f32.mrb[16].mxu0  ;;  %v8031_v5 = vadd.f32 %v3094_v49, %v2981_v8  ;;  %v2877_v29 = vadd.f32 %v2876_v25, %v7923_v37  ;;  %v3023_v49 = vmul.f32 %v7963_v0, %v7963_v0 }
 0x309   :  { %11031 = vst [vmem:[#allocation41_spill] sm:$0xff] %v8029_v22  ;;  %v3006_v46 = vmul.f32 %v8029_v22, %v8029_v22  ;;  %v8038_v58 = vpop.f32.mrb[17].mxu0 }
 0x30a   :  { %11032 = vst [vmem:[#allocation22_spill] sm:$0xff] %v8038_v58  ;;  %v2891_v39 = vadd.f32 %v8038_v58, %v8029_v22  ;;  %v3007_v30 = vmul.f32 %v8038_v58, %v8038_v58  ;;  %v3109_v34 = vadd.f32 %v3108_v14, %v2994_v23  ;;  %v8047_v9 = vadd.f32 %v2877_v29, %v7925_v60 }
 0x30c   :  { %v3123_v41 = vadd.f32 %v3007_v30, %v3006_v46  ;;  %v8049_v56 = vpop.f32.mrb[18].mxu0  ;;  %v8051_v1 = vadd.f32 %v3109_v34, %v2995_v27  ;;  %v2892_v7 = vadd.f32 %v2891_v39, %v7939_v40  ;;  %v3036_v27 = vmul.f32 %v7985_v6, %v7985_v6 }
 0x30d   :  { %11033 = vst [vmem:[#allocation28_spill] sm:$0xff] %v8049_v56  ;;  %v3020_v43 = vmul.f32 %v8049_v56, %v8049_v56  ;;  %v8058_v50 = vpop.f32.mrb[19].mxu0 }
 0x30e   :  { %11034 = vst [vmem:[#allocation60_spill] sm:$0xff] %v8058_v50  ;;  %v2906_v52 = vadd.f32 %v8058_v50, %v8049_v56  ;;  %v3021_v59 = vmul.f32 %v8058_v50, %v8058_v50  ;;  %v3124_v47 = vadd.f32 %v3123_v41, %v3008_v38  ;;  %v8067_v8 = vadd.f32 %v2892_v7, %v7941_v13 }
 0x310   :  { %v3138_v3 = vadd.f32 %v3021_v59, %v3020_v43  ;;  %v8069_v23 = vpop.f32.mrb[20].mxu0  ;;  %v8071_v25 = vadd.f32 %v3124_v47, %v3009_v62  ;;  %v2907_v10 = vadd.f32 %v2906_v52, %v7961_v11  ;;  %v3037_v43 = vmul.f32 %v7987_v57, %v7987_v57 }
 0x311   :  { %11035 = vst [vmem:[#allocation68_spill] sm:$0xff] %v8069_v23  ;;  %v3034_v14 = vmul.f32 %v8069_v23, %v8069_v23  ;;  %v8078_v29 = vpop.f32.mrb[21].mxu0 }
 0x312   :  { %11036 = vst [vmem:[#allocation67_spill] sm:$0xff] %v8078_v29  ;;  %v2921_v46 = vadd.f32 %v8078_v29, %v8069_v23  ;;  %v3035_v38 = vmul.f32 %v8078_v29, %v8078_v29  ;;  %v3139_v39 = vadd.f32 %v3138_v3, %v3022_v17  ;;  %v8087_v30 = vadd.f32 %v2907_v10, %v7963_v0 }
 0x314   :  { %v3153_v34 = vadd.f32 %v3035_v38, %v3034_v14  ;;  %v8089_v41 = vpop.f32.mrb[22].mxu0  ;;  %v8091_v7 = vadd.f32 %v3139_v39, %v3023_v49  ;;  %v2922_v62 = vadd.f32 %v2921_v46, %v7985_v6 }
 0x315   :  { %v2819_v52 = vadd.f32 %v7959_v15, %v8089_v41  ;;  %v2940_v59 = vmul.f32 %v8089_v41, %v8089_v41  ;;  %v8100_v17 = vpop.f32.mrb[23].mxu0 }
 0x316   :  { %v2941_v47 = vmul.f32 %v8100_v17, %v8100_v17  ;;  %v3154_v3 = vadd.f32 %v3153_v34, %v3036_v27  ;;  %v8105_v10 = vadd.f32 %v2922_v62, %v7987_v57 }
 0x317   :  { %v3051_v49 = vadd.f32 %v7967_v24, %v2940_v59  ;;  %v2820_v14 = vadd.f32 %v2819_v52, %v8100_v17 }
 0x318   :  { %v8109_v46 = vpop.f32.mrb[24].mxu0  ;;  %v8111_v38 = vadd.f32 %v3154_v3, %v3037_v43 }
 0x319   :  { %v3052_v15 = vadd.f32 %v3051_v49, %v2941_v47  ;;  %v2834_v39 = vadd.f32 %v7983_v55, %v8109_v46  ;;  %v2954_v32 = vmul.f32 %v8109_v46, %v8109_v46  ;;  %v8117_v6 = vpop.f32.mrb[25].mxu0 }
 0x31a   :  { %v2955_v27 = vmul.f32 %v8117_v6, %v8117_v6 }
 0x31b   :  { %v3066_v24 = vadd.f32 %v7991_v36, %v2954_v32  ;;  %v2835_v34 = vadd.f32 %v2834_v39, %v8117_v6 }
 0x31c   :  { %v8123_v62 = vpop.f32.mrb[26].mxu0  ;;  %v8125_v43 = vpop.f32.mrb[26].mxu1 }
 0x31d   :  { %11037 = vst [vmem:[#allocation58_spill] sm:$0xff] %v8125_v43  ;;  %v3067_v52 = vadd.f32 %v3066_v24, %v2955_v27  ;;  %v2849_v55 = vadd.f32 %v8007_v4, %v8123_v62  ;;  %v2968_v59 = vmul.f32 %v8123_v62, %v8123_v62  ;;  %v2821_v47 = vadd.f32 %v2820_v14, %v8125_v43  ;;  %v8132_v3 = vpop.f32.mrb[27].mxu0  ;;  %v8134_v49 = vpop.f32.mrb[27].mxu1 }
 0x31e   :  { %11038 = vst [vmem:[#allocation12_spill] sm:$0xff] %v8134_v49  ;;  %v2942_v32 = vmul.f32 %v8125_v43, %v8125_v43  ;;  %v2969_v36 = vmul.f32 %v8132_v3, %v8132_v3  ;;  %v2943_v39 = vmul.f32 %v8134_v49, %v8134_v49 }
 0x31f   :  { %v3081_v4 = vadd.f32 %v8011_v16, %v2968_v59  ;;  %v2850_v27 = vadd.f32 %v2849_v55, %v8132_v3  ;;  %v8145_v24 = vadd.f32 %v2821_v47, %v8134_v49  ;;  %v11123_v49 = vld [vmem:[#allocation19_spill] sm:$0xff] }
 0x320   :  { %v3053_v14 = vadd.f32 %v3052_v15, %v2942_v32  ;;  %v8147_v11 = vpop.f32.mrb[28].mxu0  ;;  %v8149_v57 = vpop.f32.mrb[28].mxu1 }
 0x321   :  { %11039 = vst [vmem:[#allocation62_spill] sm:$0xff] %v8147_v11  ;;  %11040 = vst [vmem:[#allocation54_spill] sm:$0xff] %v8149_v57  ;;  %v3082_v0 = vadd.f32 %v3081_v4, %v2969_v36  ;;  %v2864_v40 = vadd.f32 %v8027_v45, %v8147_v11  ;;  %v2982_v37 = vmul.f32 %v8147_v11, %v8147_v11  ;;  %v8156_v16 = vpop.f32.mrb[29].mxu0  ;;  %v8158_v55 = vpop.f32.mrb[29].mxu1 }
 0x322   :  { %v2836_v13 = vadd.f32 %v2835_v34, %v8149_v57  ;;  %11041 = vst [vmem:[#allocation83_spill] sm:$0xff] %v8156_v16  ;;  %11042 = vst [vmem:[#allocation15_spill] sm:$0xff] %v8158_v55  ;;  %v8160_v59 = vadd.f32 %v3053_v14, %v2943_v39  ;;  %v2956_v15 = vmul.f32 %v8149_v57, %v8149_v57 }
 0x323   :  { %v2983_v47 = vmul.f32 %v8156_v16, %v8156_v16  ;;  %v2957_v45 = vmul.f32 %v8158_v55, %v8158_v55  ;;  %v3096_v32 = vadd.f32 %v8031_v5, %v2982_v37  ;;  %v2865_v36 = vadd.f32 %v2864_v40, %v8156_v16 }
 0x324   :  { %v8171_v34 = vadd.f32 %v2836_v13, %v8158_v55  ;;  %v3068_v4 = vadd.f32 %v3067_v52, %v2956_v15  ;;  %v8173_v61 = vpop.f32.mrb[30].mxu0  ;;  %v8175_v39 = vpop.f32.mrb[30].mxu1 }
 0x325   :  { %11043 = vst [vmem:[#allocation44_spill] sm:$0xff] %v8173_v61  ;;  %11044 = vst [vmem:[#allocation74_spill] sm:$0xff] %v8175_v39  ;;  %v3097_v14 = vadd.f32 %v3096_v32, %v2983_v47  ;;  %v2879_v23 = vadd.f32 %v8047_v9, %v8173_v61  ;;  %v2996_v56 = vmul.f32 %v8173_v61, %v8173_v61  ;;  %v8182_v37 = vpop.f32.mrb[31].mxu0  ;;  %v8184_v40 = vpop.f32.mrb[31].mxu1 }
 0x326   :  { %v2851_v29 = vadd.f32 %v2850_v27, %v8175_v39  ;;  %11045 = vst [vmem:[#allocation87_spill] sm:$0xff] %v8182_v37  ;;  %11046 = vst [vmem:[#allocation76_spill] sm:$0xff] %v8184_v40  ;;  %v8186_v13 = vadd.f32 %v3068_v4, %v2957_v45  ;;  %v2970_v5 = vmul.f32 %v8175_v39, %v8175_v39 }
 0x327   :  { %v2997_v52 = vmul.f32 %v8182_v37, %v8182_v37  ;;  %v2971_v9 = vmul.f32 %v8184_v40, %v8184_v40  ;;  %v3111_v15 = vadd.f32 %v8051_v1, %v2996_v56  ;;  %v2880_v47 = vadd.f32 %v2879_v23, %v8182_v37 }
 0x328   :  { %v8197_v27 = vadd.f32 %v2851_v29, %v8184_v40  ;;  %v3083_v32 = vadd.f32 %v3082_v0, %v2970_v5  ;;  %v8199_v50 = vpop.f32.mrb[32].mxu0  ;;  %v8201_v45 = vpop.f32.mrb[32].mxu1 }
 0x329   :  { %11047 = vst [vmem:[#allocation30_spill] sm:$0xff] %v8199_v50  ;;  %11048 = vst [vmem:[#allocation77_spill] sm:$0xff] %v8201_v45  ;;  %v3112_v4 = vadd.f32 %v3111_v15, %v2997_v52  ;;  %v2894_v39 = vadd.f32 %v8067_v8, %v8199_v50  ;;  %v3010_v22 = vmul.f32 %v8199_v50, %v8199_v50  ;;  %v8208_v56 = vpop.f32.mrb[33].mxu0  ;;  %v8210_v1 = vpop.f32.mrb[33].mxu1 }
 0x32a   :  { %v2866_v58 = vadd.f32 %v2865_v36, %v8201_v45  ;;  %11049 = vst [vmem:[#allocation47_spill] sm:$0xff] %v8208_v56  ;;  %11050 = vst [vmem:[#allocation69_spill] sm:$0xff] %v8210_v1  ;;  %v8212_v23 = vadd.f32 %v3083_v32, %v2971_v9  ;;  %v2984_v0 = vmul.f32 %v8201_v45, %v8201_v45 }
 0x32b   :  { %v3011_v29 = vmul.f32 %v8208_v56, %v8208_v56  ;;  %v2985_v8 = vmul.f32 %v8210_v1, %v8210_v1  ;;  %v3126_v5 = vadd.f32 %v8071_v25, %v3010_v22  ;;  %v2895_v52 = vadd.f32 %v2894_v39, %v8208_v56 }
 0x32c   :  { %v8223_v36 = vadd.f32 %v2866_v58, %v8210_v1  ;;  %v3098_v15 = vadd.f32 %v3097_v14, %v2984_v0  ;;  %v8225_v50 = vpop.f32.mrb[34].mxu0  ;;  %v8227_v9 = vpop.f32.mrb[34].mxu1 }
 0x32d   :  { %11051 = vst [vmem:[#allocation70_spill] sm:$0xff] %v8225_v50  ;;  %11052 = vst [vmem:[#allocation55_spill] sm:$0xff] %v8227_v9  ;;  %v3127_v32 = vadd.f32 %v3126_v5, %v3011_v29  ;;  %v2909_v45 = vadd.f32 %v8087_v30, %v8225_v50  ;;  %v3024_v60 = vmul.f32 %v8225_v50, %v8225_v50  ;;  %v8234_v22 = vpop.f32.mrb[35].mxu0  ;;  %v8236_v25 = vpop.f32.mrb[35].mxu1  ;;  %v11122_v55 = vld [vmem:[#allocation87_spill] sm:$0xff] }
 0x32e   :  { %v2881_v61 = vadd.f32 %v2880_v47, %v8227_v9  ;;  %11053 = vst [vmem:[#allocation53_spill] sm:$0xff] %v8234_v22  ;;  %11054 = vst [vmem:[#allocation56_spill] sm:$0xff] %v8236_v25  ;;  %v8238_v58 = vadd.f32 %v3098_v15, %v2985_v8  ;;  %v2998_v39 = vmul.f32 %v8227_v9, %v8227_v9 }
 0x32f   :  { %v3025_v14 = vmul.f32 %v8234_v22, %v8234_v22  ;;  %v2999_v30 = vmul.f32 %v8236_v25, %v8236_v25  ;;  %v3141_v0 = vadd.f32 %v8091_v7, %v3024_v60  ;;  %v2910_v29 = vadd.f32 %v2909_v45, %v8234_v22 }
 0x330   :  { %v8249_v47 = vadd.f32 %v2881_v61, %v8236_v25  ;;  %v3113_v5 = vadd.f32 %v3112_v4, %v2998_v39  ;;  %v8251_v50 = vpop.f32.mrb[36].mxu0  ;;  %v8253_v8 = vpop.f32.mrb[36].mxu1 }
 0x331   :  { %11055 = vst [vmem:[#allocation80_spill] sm:$0xff] %v8251_v50  ;;  %11056 = vst [vmem:[#allocation18_spill] sm:$0xff] %v8253_v8  ;;  %v3142_v15 = vadd.f32 %v3141_v0, %v3025_v14  ;;  %v2924_v9 = vadd.f32 %v8105_v10, %v8251_v50  ;;  %v3038_v56 = vmul.f32 %v8251_v50, %v8251_v50  ;;  %v8260_v60 = vpop.f32.mrb[37].mxu0  ;;  %v8262_v7 = vpop.f32.mrb[37].mxu1 }
 0x332   :  { %v2896_v35 = vadd.f32 %v2895_v52, %v8253_v8  ;;  %11057 = vst [vmem:[#allocation42_spill] sm:$0xff] %v8260_v60  ;;  %11058 = vst [vmem:[#allocation75_spill] sm:$0xff] %v8262_v7  ;;  %v8264_v61 = vadd.f32 %v3113_v5, %v2999_v30  ;;  %v3012_v45 = vmul.f32 %v8253_v8, %v8253_v8 }
 0x333   :  { %v3039_v4 = vmul.f32 %v8260_v60, %v8260_v60  ;;  %v3013_v10 = vmul.f32 %v8262_v7, %v8262_v7  ;;  %v3156_v39 = vadd.f32 %v8111_v38, %v3038_v56  ;;  %v2925_v14 = vadd.f32 %v2924_v9, %v8260_v60 }
 0x334   :  { %v2897_v52 = vadd.f32 %v2896_v35, %v8262_v7  ;;  %v3128_v0 = vadd.f32 %v3127_v32, %v3012_v45  ;;  %v8275_v25 = vpop.f32.mrb[38].mxu1  ;;  %v8277_v30 = vpop.f32.mrb[38].mxu0 }
 0x335   :  { %11059 = vst [vmem:[#allocation92_spill] sm:$0xff] %v8275_v25  ;;  %11060 = vst [vmem:[#allocation49_spill] sm:$0xff] %v8277_v30  ;;  %v3157_v5 = vadd.f32 %v3156_v39, %v3039_v4  ;;  %v2911_v8 = vadd.f32 %v2910_v29, %v8275_v25  ;;  %v3026_v50 = vmul.f32 %v8275_v25, %v8275_v25  ;;  %v8284_v37 = vpop.f32.mrb[39].mxu1  ;;  %v8286_v38 = vpop.f32.mrb[39].mxu0 }
 0x336   :  { %v2823_v22 = vadd.f32 %v8145_v24, %v8277_v30  ;;  %11061 = vst [vmem:[#allocation89_spill] sm:$0xff] %v8284_v37  ;;  %11062 = vst [vmem:[#allocation78_spill] sm:$0xff] %v8286_v38  ;;  %v3129_v56 = vadd.f32 %v3128_v0, %v3013_v10  ;;  %v2944_v35 = vmul.f32 %v8277_v30, %v8277_v30 }
 0x337   :  { %v3027_v9 = vmul.f32 %v8284_v37, %v8284_v37  ;;  %v2945_v32 = vmul.f32 %v8286_v38, %v8286_v38  ;;  %v3143_v29 = vadd.f32 %v3142_v15, %v3026_v50  ;;  %v2912_v45 = vadd.f32 %v2911_v8, %v8284_v37 }
 0x338   :  { %v8296_v4 = vadd.f32 %v2823_v22, %v8286_v38  ;;  %v3055_v24 = vadd.f32 %v8160_v59, %v2944_v35  ;;  %v8299_v39 = vpop.f32.mrb[40].mxu1  ;;  %v8301_v10 = vpop.f32.mrb[40].mxu0 }
 0x339   :  { %11063 = vst [vmem:[#allocation79_spill] sm:$0xff] %v8299_v39  ;;  %11064 = vst [vmem:[#allocation84_spill] sm:$0xff] %v8301_v10  ;;  %v3144_v0 = vadd.f32 %v3143_v29, %v3027_v9  ;;  %v2926_v25 = vadd.f32 %v2925_v14, %v8299_v39  ;;  %v3040_v7 = vmul.f32 %v8299_v39, %v8299_v39  ;;  %v8308_v15 = vpop.f32.mrb[41].mxu1  ;;  %v8310_v8 = vpop.f32.mrb[41].mxu0 }
 0x33a   :  { %v2838_v50 = vadd.f32 %v8171_v34, %v8301_v10  ;;  %11065 = vst [vmem:[#allocation61_spill] sm:$0xff] %v8308_v15  ;;  %11066 = vst [vmem:[#allocation88_spill] sm:$0xff] %v8310_v8  ;;  %v3056_v22 = vadd.f32 %v3055_v24, %v2945_v32  ;;  %v2958_v59 = vmul.f32 %v8301_v10, %v8301_v10 }
 0x33b   :  { %v3041_v35 = vmul.f32 %v8308_v15, %v8308_v15  ;;  %v2959_v14 = vmul.f32 %v8310_v8, %v8310_v8  ;;  %v3158_v9 = vadd.f32 %v3157_v5, %v3040_v7  ;;  %v2927_v29 = vadd.f32 %v2926_v25, %v8308_v15 }
 0x33c   :  { %v2839_v39 = vadd.f32 %v2838_v50, %v8310_v8  ;;  %v3070_v34 = vadd.f32 %v8186_v13, %v2958_v59  ;;  %v8321_v37 = vpop.f32.mrb[42].mxu0 }
 0x33d   :  { %11067 = vst [vmem:[#allocation65_spill] sm:$0xff] %v8321_v37  ;;  %v3159_v60 = vadd.f32 %v3158_v9, %v3041_v35  ;;  %v2853_v32 = vadd.f32 %v8197_v27, %v8321_v37  ;;  %v2972_v24 = vmul.f32 %v8321_v37, %v8321_v37  ;;  %v8327_v31 = vpop.f32.mrb[43].mxu0  ;;  %v11124_v37 = vld [vmem:[#allocation44_spill] sm:$0xff] }
 0x33e   :  { %11068 = vst [vmem:[#allocation81_spill] sm:$0xff] %v8327_v31  ;;  %v3071_v1 = vadd.f32 %v3070_v34, %v2959_v14  ;;  %v2973_v7 = vmul.f32 %v8327_v31, %v8327_v31 }
 0x33f   :  { %v3085_v25 = vadd.f32 %v8212_v23, %v2972_v24  ;;  %v8333_v5 = vadd.f32 %v2853_v32, %v8327_v31 }
 0x340   :  { %v8335_v13 = vpop.f32.mrb[44].mxu0 }
 0x341   :  { %11069 = vst [vmem:[#allocation85_spill] sm:$0xff] %v8335_v13  ;;  %v8337_v50 = vadd.f32 %v3085_v25, %v2973_v7  ;;  %v2868_v27 = vadd.f32 %v8223_v36, %v8335_v13  ;;  %v2986_v59 = vmul.f32 %v8335_v13, %v8335_v13  ;;  %v8343_v35 = vpop.f32.mrb[45].mxu0 }
 0x342   :  { %11070 = vst [vmem:[#allocation86_spill] sm:$0xff] %v8343_v35  ;;  %v2987_v14 = vmul.f32 %v8343_v35, %v8343_v35 }
 0x343   :  { %v3100_v23 = vadd.f32 %v8238_v58, %v2986_v59  ;;  %v8349_v9 = vadd.f32 %v2868_v27, %v8343_v35 }
 0x344   :  { %v8351_v34 = vpop.f32.mrb[46].mxu0 }
 0x345   :  { %11071 = vst [vmem:[#allocation82_spill] sm:$0xff] %v8351_v34  ;;  %v8353_v32 = vadd.f32 %v3100_v23, %v2987_v14  ;;  %v2883_v36 = vadd.f32 %v8249_v47, %v8351_v34  ;;  %v3000_v24 = vmul.f32 %v8351_v34, %v8351_v34  ;;  %v8359_v7 = vpop.f32.mrb[47].mxu0 }
 0x346   :  { %11072 = vst [vmem:[#allocation94_spill] sm:$0xff] %v8359_v7  ;;  %v3001_v25 = vmul.f32 %v8359_v7, %v8359_v7 }
 0x347   :  { %v3115_v58 = vadd.f32 %v8264_v61, %v3000_v24  ;;  %v8365_v27 = vadd.f32 %v2883_v36, %v8359_v7 }
 0x348   :  { %v8367_v59 = vpop.f32.mrb[48].mxu0 }
 0x349   :  { %11073 = vst [vmem:[#allocation71_spill] sm:$0xff] %v8367_v59  ;;  %v8369_v14 = vadd.f32 %v3115_v58, %v3001_v25  ;;  %v2898_v23 = vadd.f32 %v2897_v52, %v8367_v59  ;;  %v3014_v47 = vmul.f32 %v8367_v59, %v8367_v59  ;;  %v8374_v15 = vpop.f32.mrb[49].mxu0 }
 0x34a   :  { %11074 = vst [vmem:[#allocation90_spill] sm:$0xff] %v8374_v15  ;;  %v3015_v34 = vmul.f32 %v8374_v15, %v8374_v15 }
 0x34b   :  { %v3130_v13 = vadd.f32 %v3129_v56, %v3014_v47  ;;  %v8379_v61 = vadd.f32 %v2898_v23, %v8374_v15 }
 0x34c   :  { %v8381_v36 = vpop.f32.mrb[50].mxu0 }
 0x34d   :  { %11075 = vst [vmem:[#allocation91_spill] sm:$0xff] %v8381_v36  ;;  %v8383_v24 = vadd.f32 %v3130_v13, %v3015_v34  ;;  %v2913_v25 = vadd.f32 %v2912_v45, %v8381_v36  ;;  %v3028_v52 = vmul.f32 %v8381_v36, %v8381_v36  ;;  %v8388_v58 = vpop.f32.mrb[51].mxu0 }
 0x34e   :  { %11076 = vst [vmem:[#allocation16_spill] sm:$0xff] %v8388_v58  ;;  %v3029_v59 = vmul.f32 %v8388_v58, %v8388_v58 }
 0x34f   :  { %v3145_v7 = vadd.f32 %v3144_v0, %v3028_v52  ;;  %v8393_v56 = vadd.f32 %v2913_v25, %v8388_v58 }
 0x350   :  { %v8395_v23 = vpop.f32.mrb[52].mxu0 }
 0x351   :  { %11077 = vst [vmem:[#allocation45_spill] sm:$0xff] %v8395_v23  ;;  %v8397_v47 = vadd.f32 %v3145_v7, %v3029_v59  ;;  %v2928_v13 = vadd.f32 %v2927_v29, %v8395_v23  ;;  %v3042_v45 = vmul.f32 %v8395_v23, %v8395_v23  ;;  %v8402_v34 = vpop.f32.mrb[53].mxu0  ;;  %v8404_v36 = vpop.f32.mrb[42].mxu1 }
 0x352   :  { %11078 = vst [vmem:[#allocation14_spill] sm:$0xff] %v8402_v34  ;;  %11079 = vst [vmem:[#allocation46_spill] sm:$0xff] %v8404_v36  ;;  %v3043_v15 = vmul.f32 %v8402_v34, %v8402_v34  ;;  %v2825_v25 = vadd.f32 %v8296_v4, %v8404_v36  ;;  %v2946_v7 = vmul.f32 %v8404_v36, %v8404_v36  ;;  %v8415_v29 = vpop.f32.mrb[43].mxu1 }
 0x353   :  { %v3160_v0 = vadd.f32 %v3159_v60, %v3042_v45  ;;  %v8413_v59 = vadd.f32 %v2928_v13, %v8402_v34  ;;  %11080 = vst [vmem:[#allocation13_spill] sm:$0xff] %v8415_v29  ;;  %v2947_v52 = vmul.f32 %v8415_v29, %v8415_v29 }
 0x354   :  { %v3057_v23 = vadd.f32 %v3056_v22, %v2946_v7  ;;  %v2826_v42 = vadd.f32 %v2825_v25, %v8415_v29 }
 0x355   :  { %v8419_v58 = vadd.f32 %v3160_v0, %v3043_v15  ;;  %v8422_v60 = vpop.f32.mrb[44].mxu1 }
 0x356   :  { %11081 = vst [vmem:[#allocation43_spill] sm:$0xff] %v8422_v60  ;;  %v3058_v45 = vadd.f32 %v3057_v23, %v2947_v52  ;;  %v2840_v4 = vadd.f32 %v2839_v39, %v8422_v60  ;;  %v2960_v36 = vmul.f32 %v8422_v60, %v8422_v60  ;;  %v8427_v13 = vpop.f32.mrb[54].mxu0  ;;  %v8429_v34 = vpop.f32.mrb[45].mxu1 }
 0x357   :  { %11082 = vst [vmem:[#allocation17_spill] sm:$0xff] %v8427_v13  ;;  %11083 = vst [vmem:[#allocation52_spill] sm:$0xff] %v8429_v34  ;;  %v2827_v35 = vadd.f32 %v2826_v42, %v8427_v13  ;;  %v2948_v15 = vmul.f32 %v8427_v13, %v8427_v13  ;;  %v2961_v22 = vmul.f32 %v8429_v34, %v8429_v34  ;;  %v8436_v0 = vpop.f32.mrb[55].mxu0 }
 0x358   :  { %11084 = vst [vmem:[#allocation21_spill] sm:$0xff] %v8436_v0  ;;  %v3072_v23 = vadd.f32 %v3071_v1, %v2960_v36  ;;  %v2841_v39 = vadd.f32 %v2840_v4, %v8429_v34  ;;  %v2949_v25 = vmul.f32 %v8436_v0, %v8436_v0 }
 0x359   :  { %v3059_v7 = vadd.f32 %v3058_v45, %v2948_v15  ;;  %v2828_v52 = vadd.f32 %v2827_v35, %v8436_v0  ;;  %v8442_v60 = vpop.f32.mrb[46].mxu1 }
 0x35a   :  { %11085 = vst [vmem:[#allocation59_spill] sm:$0xff] %v8442_v60  ;;  %v3073_v42 = vadd.f32 %v3072_v23, %v2961_v22  ;;  %v2855_v53 = vadd.f32 %v8333_v5, %v8442_v60  ;;  %v2974_v11 = vmul.f32 %v8442_v60, %v8442_v60  ;;  %v8448_v21 = vpop.f32.mrb[56].mxu0  ;;  %v8450_v1 = vpop.f32.mrb[47].mxu1 }
 0x35b   :  { %11086 = vst [vmem:[#allocation25_spill] sm:$0xff] %v8448_v21  ;;  %11087 = vst [vmem:[#allocation35_spill] sm:$0xff] %v8450_v1  ;;  %v2842_v36 = vadd.f32 %v2841_v39, %v8448_v21  ;;  %v2962_v45 = vmul.f32 %v8448_v21, %v8448_v21  ;;  %v2975_v35 = vmul.f32 %v8450_v1, %v8450_v1  ;;  %2829 = vadd.xlane.f32.xlu0 %v2828_v52  ;;  %v8457_v4 = vpop.f32.mrb[57].mxu0 }
 0x35c   :  { %11088 = vst [vmem:[#allocation95_spill] sm:$0xff] %v8457_v4  ;;  %v3060_v15 = vadd.f32 %v3059_v7, %v2949_v25  ;;  %v3087_v5 = vadd.f32 %v8337_v50, %v2974_v11  ;;  %v2856_v22 = vadd.f32 %v2855_v53, %v8450_v1  ;;  %v2963_v23 = vmul.f32 %v8457_v4, %v8457_v4 }
 0x35d   :  { %v3074_v60 = vadd.f32 %v3073_v42, %v2962_v45  ;;  %v2843_v39 = vadd.f32 %v2842_v36, %v8457_v4  ;;  %v8464_v34 = vpop.f32.mrb[48].mxu1 }
 0x35e   :  { %11089 = vst [vmem:[#allocation64_spill] sm:$0xff] %v8464_v34  ;;  %v3088_v16 = vadd.f32 %v3087_v5, %v2975_v35  ;;  %v2870_v33 = vadd.f32 %v8349_v9, %v8464_v34  ;;  %v2988_v52 = vmul.f32 %v8464_v34, %v8464_v34  ;;  %v8470_v25 = vpop.f32.mrb[58].mxu0  ;;  %v8472_v11 = vpop.f32.mrb[49].mxu1 }
 0x35f   :  { %11090 = vst [vmem:[#allocation96_spill] sm:$0xff] %v8470_v25  ;;  %11091 = vst [vmem:[#allocation66_spill] sm:$0xff] %v8472_v11  ;;  %v2857_v53 = vadd.f32 %v2856_v22, %v8470_v25  ;;  %v2976_v50 = vmul.f32 %v8470_v25, %v8470_v25  ;;  %v2989_v7 = vmul.f32 %v8472_v11, %v8472_v11  ;;  %3061 = vadd.xlane.f32.xlu0 %v3060_v15  ;;  %v8479_v42 = vpop.f32.mrb[59].mxu0 }
 0x360   :  { %2844 = vadd.xlane.f32.xlu1 %v2843_v39  ;;  %11092 = vst [vmem:[#allocation63_spill] sm:$0xff] %v8479_v42  ;;  %v3102_v9 = vadd.f32 %v8353_v32, %v2988_v52  ;;  %v2871_v36 = vadd.f32 %v2870_v33, %v8472_v11  ;;  %v2977_v45 = vmul.f32 %v8479_v42, %v8479_v42 }
 0x361   :  { %v3075_v35 = vadd.f32 %v3074_v60, %v2963_v23  ;;  %v3089_v5 = vadd.f32 %v3088_v16, %v2976_v50  ;;  %v2858_v22 = vadd.f32 %v2857_v53, %v8479_v42  ;;  %v8486_v34 = vpop.f32.mrb[50].mxu1 }
 0x362   :  { %11093 = vst [vmem:[#allocation73_spill] sm:$0xff] %v8486_v34  ;;  %v3103_v1 = vadd.f32 %v3102_v9, %v2989_v7  ;;  %v2885_v15 = vadd.f32 %v8365_v27, %v8486_v34  ;;  %v3002_v39 = vmul.f32 %v8486_v34, %v8486_v34  ;;  %v8492_v25 = vpop.f32.mrb[60].mxu0  ;;  %v8494_v32 = vpop.f32.mrb[51].mxu1 }
 0x363   :  { %11094 = vst [vmem:[#allocation72_spill] sm:$0xff] %v8492_v25  ;;  %11095 = vst [vmem:[#allocation24_spill] sm:$0xff] %v8494_v32  ;;  %v2872_v33 = vadd.f32 %v2871_v36, %v8492_v25  ;;  %v2990_v16 = vmul.f32 %v8492_v25, %v8492_v25  ;;  %v3003_v60 = vmul.f32 %v8494_v32, %v8494_v32  ;;  %3076 = vadd.xlane.f32.xlu0 %v3075_v35  ;;  %v8501_v23 = vpop.f32.mrb[61].mxu0  ;;  %v11114_v25 = vld [vmem:[#allocation34_spill] sm:$0xff] }
 0x364   :  { %2859 = vadd.xlane.f32.xlu1 %v2858_v22  ;;  %11096 = vst [vmem:[#allocation97_spill] sm:$0xff] %v8501_v23  ;;  %v3117_v27 = vadd.f32 %v8369_v14, %v3002_v39  ;;  %v2886_v52 = vadd.f32 %v2885_v15, %v8494_v32  ;;  %v2991_v53 = vmul.f32 %v8501_v23, %v8501_v23 }
 0x365   :  { %v3090_v50 = vadd.f32 %v3089_v5, %v2977_v45  ;;  %v3104_v7 = vadd.f32 %v3103_v1, %v2990_v16  ;;  %v2873_v9 = vadd.f32 %v2872_v33, %v8501_v23  ;;  %v8508_v36 = vpop.f32.mrb[52].mxu1  ;;  %v11113_v23 = vld [vmem:[#allocation83_spill] sm:$0xff] }
 0x366   :  { %11097 = vst [vmem:[#allocation26_spill] sm:$0xff] %v8508_v36  ;;  %v3118_v34 = vadd.f32 %v3117_v27, %v3003_v60  ;;  %v2900_v35 = vadd.f32 %v8379_v61, %v8508_v36  ;;  %v3016_v22 = vmul.f32 %v8508_v36, %v8508_v36  ;;  %v8514_v11 = vpop.f32.mrb[62].mxu0  ;;  %v8516_v14 = vpop.f32.mrb[53].mxu1 }
 0x367   :  { %11098 = vst [vmem:[#allocation93_spill] sm:$0xff] %v8514_v11  ;;  %11099 = vst [vmem:[#allocation98_spill] sm:$0xff] %v8516_v14  ;;  %v2887_v15 = vadd.f32 %v2886_v52, %v8514_v11  ;;  %v3004_v1 = vmul.f32 %v8514_v11, %v8514_v11  ;;  %v3017_v45 = vmul.f32 %v8516_v14, %v8516_v14  ;;  %2874 = vadd.xlane.f32.xlu0 %v2873_v9  ;;  %v8523_v5 = vpop.f32.mrb[63].mxu0 }
 0x368   :  { %3091 = vadd.xlane.f32.xlu1 %v3090_v50  ;;  %11100 = vst [vmem:[#allocation99_spill] sm:$0xff] %v8523_v5  ;;  %v3132_v61 = vadd.f32 %v8383_v24, %v3016_v22  ;;  %v2901_v39 = vadd.f32 %v2900_v35, %v8516_v14  ;;  %v3005_v33 = vmul.f32 %v8523_v5, %v8523_v5 }
 0x369   :  { %v3105_v16 = vadd.f32 %v3104_v7, %v2991_v53  ;;  %v3119_v60 = vadd.f32 %v3118_v34, %v3004_v1  ;;  %v2888_v27 = vadd.f32 %v2887_v15, %v8523_v5  ;;  %v8530_v52 = vpop.f32.mrb[54].mxu1 }
 0x36a   :  { %11101 = vst [vmem:[#allocation100_spill] sm:$0xff] %v8530_v52  ;;  %v3133_v36 = vadd.f32 %v3132_v61, %v3017_v45  ;;  %v2915_v50 = vadd.f32 %v8393_v56, %v8530_v52  ;;  %v3030_v9 = vmul.f32 %v8530_v52, %v8530_v52  ;;  %v8536_v32 = vpop.f32.mrb[64].mxu0  ;;  %v8538_v24 = vpop.f32.mrb[55].mxu1 }
 0x36b   :  { %11102 = vst [vmem:[#allocation101_spill] sm:$0xff] %v8536_v32  ;;  %11103 = vst [vmem:[#allocation102_spill] sm:$0xff] %v8538_v24  ;;  %v2902_v35 = vadd.f32 %v2901_v39, %v8536_v32  ;;  %v3018_v34 = vmul.f32 %v8536_v32, %v8536_v32  ;;  %v3031_v53 = vmul.f32 %v8538_v24, %v8538_v24  ;;  %3106 = vadd.xlane.f32.xlu0 %v3105_v16  ;;  %v8545_v7 = vpop.f32.mrb[65].mxu0 }
 0x36c   :  { %2889 = vadd.xlane.f32.xlu1 %v2888_v27  ;;  %11104 = vst [vmem:[#allocation103_spill] sm:$0xff] %v8545_v7  ;;  %v3147_v56 = vadd.f32 %v8397_v47, %v3030_v9  ;;  %v2916_v22 = vadd.f32 %v2915_v50, %v8538_v24  ;;  %v3019_v15 = vmul.f32 %v8545_v7, %v8545_v7 }
 0x36d   :  { %v3120_v1 = vadd.f32 %v3119_v60, %v3005_v33  ;;  %v3134_v45 = vadd.f32 %v3133_v36, %v3018_v34  ;;  %v2903_v61 = vadd.f32 %v2902_v35, %v8545_v7  ;;  %v8552_v39 = vpop.f32.mrb[56].mxu1 }
 0x36e   :  { %11105 = vst [vmem:[#allocation104_spill] sm:$0xff] %v8552_v39  ;;  %v3148_v52 = vadd.f32 %v3147_v56, %v3031_v53  ;;  %v2930_v16 = vadd.f32 %v8413_v59, %v8552_v39  ;;  %v3044_v27 = vmul.f32 %v8552_v39, %v8552_v39  ;;  %v8558_v14 = vpop.f32.mrb[66].mxu0  ;;  %v8560_v47 = vpop.f32.mrb[57].mxu1 }
 0x36f   :  { %11106 = vst [vmem:[#allocation105_spill] sm:$0xff] %v8558_v14  ;;  %11107 = vst [vmem:[#allocation106_spill] sm:$0xff] %v8560_v47  ;;  %v2917_v50 = vadd.f32 %v2916_v22, %v8558_v14  ;;  %v3032_v36 = vmul.f32 %v8558_v14, %v8558_v14  ;;  %v3045_v33 = vmul.f32 %v8560_v47, %v8560_v47  ;;  %2904 = vadd.xlane.f32.xlu0 %v2903_v61  ;;  %v8567_v60 = vpop.f32.mrb[67].mxu0 }
 0x370   :  { %3121 = vadd.xlane.f32.xlu1 %v3120_v1  ;;  %11108 = vst [vmem:[#allocation107_spill] sm:$0xff] %v8567_v60  ;;  %v3162_v59 = vadd.f32 %v8419_v58, %v3044_v27  ;;  %v2931_v9 = vadd.f32 %v2930_v16, %v8560_v47  ;;  %v3033_v35 = vmul.f32 %v8567_v60, %v8567_v60  ;;  %v3607_v27 = vld [vmem:[%s10556_s9 + $0x38] sm:$0xff] }
 0x371   :  { %v3135_v34 = vadd.f32 %v3134_v45, %v3019_v15  ;;  %v3149_v53 = vadd.f32 %v3148_v52, %v3032_v36  ;;  %v2918_v56 = vadd.f32 %v2917_v50, %v8567_v60  ;;  %v3606_v50 = vld [vmem:[%s10556_s9 + $0x30] sm:$0xff]  ;;  %v8590_v36 = vpop.permute.xlu1 %3450 }
 0x372   :  { %v3163_v22 = vadd.f32 %v3162_v59, %v3045_v33  ;;  %v8574_v39 = vpop.f32.mrb[68].mxu0  ;;  %11111 = vst [vmem:[#allocation110_spill] sm:$0xff] %v8590_v36 }
 0x373   :  { %11109 = vst [vmem:[#allocation108_spill] sm:$0xff] %v8574_v39  ;;  %v2932_v24 = vadd.f32 %v2931_v9, %v8574_v39  ;;  %v3046_v1 = vmul.f32 %v8574_v39, %v8574_v39  ;;  %3136 = vadd.xlane.f32.xlu0 %v3135_v34  ;;  %v8579_v58 = vpop.f32.mrb[69].mxu0  ;;  %v3150_v61 = vadd.f32 %v3149_v53, %v3033_v35 }
 0x374   :  { %2919 = vadd.xlane.f32.xlu1 %v2918_v56  ;;  %11110 = vst [vmem:[#allocation109_spill] sm:$0xff] %v8579_v58  ;;  %v3047_v16 = vmul.f32 %v8579_v58, %v8579_v58  ;;  %v8606_v56 = vpop.permute.xlu0 %3455 }
 0x375   :  { %v3164_v15 = vadd.f32 %v3163_v22, %v3046_v1  ;;  %v2933_v52 = vadd.f32 %v2932_v24, %v8579_v58  ;;  %v8592_v33 = vpop.permute.xlu1 %3610 }
 0x377   :  { %2934 = vadd.xlane.f32.xlu0 %v2933_v52  ;;  %v3165_v45 = vadd.f32 %v3164_v15, %v3047_v16 }
 0x378   :  { %3151 = vadd.xlane.f32.xlu1 %v3150_v61  ;;  %v8610_v1 = vpop.permute.xlu0 %3630 }
 0x379   :  { %v8594_v59 = vpop.permute.xlu1 %3615 }
 0x37b   :  { %3166 = vadd.xlane.f32.xlu0 %v3165_v45 }
 0x37c   :  { %v8614_v16 = vpop.permute.xlu0 %3480 }
 0x37d   :  { %v8596_v24 = vpop.permute.xlu1 %3460 }
 0x381   :  { %v8598_v9 = vpop.permute.xlu1 %3465 }
 0x385   :  { %v8600_v35 = vpop.permute.xlu1 %3620 }
 0x389   :  { %3645 = vperm.xlu1 %5819, %v3607_v27   ;;  %v8602_v34 = vpop.permute.xlu1 %3625 }
 0x38d   :  { %v8604_v53 = vpop.permute.xlu1 %3470 }
 0x391   :  { %3640 = vperm.xlu0 %5820, %v3606_v50   ;;  %v8608_v22 = vpop.permute.xlu1 %3475 }
 0x395   :  { %v8612_v61 = vpop.permute.xlu1 %3635 }
 0x399   :  { %v8616_v15 = vpop.permute.xlu1 %3485 }
 0x3e8   :  { %v2830_v52 = vpop.xlane.xlu0 %2829 }
 0x3e9   :  { %v8618_v45 = vmul.f32 0.0005952381, %v2830_v52  ;;  %v11115_v52 = vld [vmem:[#allocation62_spill] sm:$0xff] }
 0x3eb   :  { %v3184_v27 = vmul.f32 %v8618_v45, %v8618_v45  ;;  %v11127_v0 = vsub.f32 %v7931_v18, %v8618_v45  ;;  %v11128_v43 = vsub.f32 %v8100_v17, %v8618_v45 }
 0x3ec   :  { %v3062_v14 = vpop.xlane.xlu0 %3061 }
 0x3ed   :  { %v2845_v58 = vpop.xlane.xlu1 %2844  ;;  %v3176_v11 = vmul.f32 0.0005952381, %v3062_v14 }
 0x3ee   :  { %v8636_v7 = vmul.f32 0.0005952381, %v2845_v58 }
 0x3ef   :  { %v3192_v58 = vsub.f32 %v3176_v11, %v3184_v27 }
 0x3f0   :  { %v3185_v50 = vmul.f32 %v8636_v7, %v8636_v7  ;;  %v3077_v60 = vpop.xlane.xlu0 %3076  ;;  %v11133_v17 = vsub.f32 %v7950_v20, %v8636_v7  ;;  %v11135_v10 = vsub.f32 %v7943_v19, %v8636_v7 }
 0x3f1   :  { %v2860_v5 = vpop.xlane.xlu1 %2859  ;;  %v3312_v14 = vadd.f32 1e-05, %v3192_v58  ;;  %v3177_v29 = vmul.f32 0.0005952381, %v3077_v60 }
 0x3f2   :  { %v8664_v39 = vmul.f32 0.0005952381, %v2860_v5 }
 0x3f3   :  { %5821 = vrsqrt.f32 %v3312_v14  ;;  %v3193_v58 = vsub.f32 %v3177_v29, %v3185_v50 }
 0x3f4   :  { %v3186_v5 = vmul.f32 %v8664_v39, %v8664_v39  ;;  %v2875_v27 = vpop.xlane.xlu0 %2874 }
 0x3f5   :  { %v3092_v47 = vpop.xlane.xlu1 %3091  ;;  %v3313_v50 = vadd.f32 1e-05, %v3193_v58  ;;  %v8688_v11 = vmul.f32 0.0005952381, %v2875_v27  ;;  %v11112_v27 = vld [vmem:[#allocation23_spill] sm:$0xff] }
 0x3f6   :  { %v3178_v14 = vmul.f32 0.0005952381, %v3092_v47 }
 0x3f7   :  { %5823 = vrsqrt.f32 %v3313_v50  ;;  %v3187_v47 = vmul.f32 %v8688_v11, %v8688_v11 }
 0x3f8   :  { %v3194_v58 = vsub.f32 %v3178_v14, %v3186_v5  ;;  %v3107_v29 = vpop.xlane.xlu0 %3106 }
 0x3f9   :  { %v2890_v13 = vpop.xlane.xlu1 %2889  ;;  %v3179_v32 = vmul.f32 0.0005952381, %v3107_v29  ;;  %v11121_v29 = vld [vmem:[#allocation50_spill] sm:$0xff] }
 0x3fa   :  { %v3314_v14 = vadd.f32 1e-05, %v3194_v58  ;;  %v8712_v40 = vmul.f32 0.0005952381, %v2890_v13 }
 0x3fb   :  { %v3195_v58 = vsub.f32 %v3179_v32, %v3187_v47  ;;  %v11129_v32 = vsub.f32 %v7927_v2, %v8618_v45 }
 0x3fc   :  { %5825 = vrsqrt.f32 %v3314_v14  ;;  %v3188_v13 = vmul.f32 %v8712_v40, %v8712_v40  ;;  %v2905_v51 = vpop.xlane.xlu0 %2904 }
 0x3fd   :  { %v3122_v5 = vpop.xlane.xlu1 %3121  ;;  %v8736_v47 = vpop.eup %5821  ;;  %v3315_v21 = vadd.f32 1e-05, %v3195_v58  ;;  %v8738_v60 = vmul.f32 0.0005952381, %v2905_v51  ;;  %v11130_v51 = vsub.f32 %v8089_v41, %v8618_v45 }
 0x3fe   :  { %v3180_v42 = vmul.f32 0.0005952381, %v3122_v5  ;;  %v3329_v57 = vmul.f32 %v8736_v47, %v11127_v0  ;;  %v3333_v50 = vmul.f32 %v8736_v47, %v11128_v43  ;;  %v3328_v5 = vmul.f32 %v8736_v47, %v11129_v32  ;;  %v11131_v0 = vld [vmem:[#allocation22_spill] sm:$0xff] }
 0x3ff   :  { %v3332_v58 = vmul.f32 %v8736_v47, %v11130_v51  ;;  %5827 = vrsqrt.f32 %v3315_v21  ;;  %v3189_v18 = vmul.f32 %v8738_v60, %v8738_v60  ;;  %v11132_v51 = vld [vmem:[#allocation47_spill] sm:$0xff] }
 0x400   :  { %v3196_v31 = vsub.f32 %v3180_v42, %v3188_v13  ;;  %v3137_v4 = vpop.xlane.xlu0 %3136  ;;  %v3489_v14 = vmul.f32 %v8590_v36, %v3329_v57  ;;  %v3493_v2 = vmul.f32 %v8590_v36, %v3333_v50  ;;  %v3488_v32 = vmul.f32 %v8590_v36, %v3328_v5 }
 0x401   :  { %v2920_v43 = vpop.xlane.xlu1 %2919  ;;  %v3492_v41 = vmul.f32 %v8590_v36, %v3332_v58  ;;  %v8766_v48 = vpop.eup %5823  ;;  %v3181_v42 = vmul.f32 0.0005952381, %v3137_v4  ;;  %v11134_v5 = vsub.f32 %v8117_v6, %v8636_v7 }
 0x402   :  { %v3316_v21 = vadd.f32 1e-05, %v3196_v31  ;;  %v8768_v13 = vmul.f32 0.0005952381, %v2920_v43  ;;  %v3343_v57 = vmul.f32 %v8766_v48, %v11133_v17  ;;  %v3649_v50 = vadd.f32 %v8592_v33, %v3489_v14 }
 0x403   :  { %v3347_v58 = vmul.f32 %v8766_v48, %v11134_v5  ;;  %v3653_v31 = vadd.f32 %v8592_v33, %v3493_v2  ;;  %v3197_v4 = vsub.f32 %v3181_v42, %v3189_v18  ;;  %v3342_v20 = vmul.f32 %v8766_v48, %v11135_v10 }
 0x404   :  { %5829 = vrsqrt.f32 %v3316_v21  ;;  %v3190_v43 = vmul.f32 %v8768_v13, %v8768_v13  ;;  %v2935_v30 = vpop.xlane.xlu0 %2934  ;;  %v3503_v14 = vmul.f32 %v8606_v56, %v3343_v57  ;;  %v3761_v44 = vmax.f32 %v3649_v50, 0.0 }
 0x405   :  { %v3152_v17 = vpop.xlane.xlu1 %3151  ;;  %v3507_v6 = vmul.f32 %v8606_v56, %v3347_v58  ;;  %v3765_v5 = vmax.f32 %v3653_v31, 0.0  ;;  %v3317_v2 = vadd.f32 1e-05, %v3197_v4  ;;  %v8792_v21 = vmul.f32 0.0005952381, %v2935_v30 }
 0x406   :  { %v8790_v54 = vpop.eup %5825  ;;  %v3182_v18 = vmul.f32 0.0005952381, %v3152_v17  ;;  %v3502_v42 = vmul.f32 %v8606_v56, %v3342_v20  ;;  %v3663_v19 = vadd.f32 %v8594_v59, %v3503_v14  ;;  %v3648_v8 = vadd.f32 %v8592_v33, %v3488_v32 }
 0x407   :  { %v3667_v10 = vadd.f32 %v8594_v59, %v3507_v6  ;;  %v11136_v57 = vsub.f32 %v8109_v46, %v8636_v7  ;;  %5831 = vrsqrt.f32 %v3317_v2  ;;  %v3191_v31 = vmul.f32 %v8792_v21, %v8792_v21 }
 0x408   :  { %v3198_v58 = vsub.f32 %v3182_v18, %v3190_v43  ;;  %v3662_v30 = vadd.f32 %v8594_v59, %v3502_v42  ;;  %v3167_v4 = vpop.xlane.xlu0 %3166  ;;  %v3775_v20 = vmax.f32 %v3663_v19, 0.0  ;;  %v3760_v14 = vmax.f32 %v3648_v8, 0.0 }
 0x409   :  { %v3346_v50 = vmul.f32 %v8766_v48, %v11136_v57  ;;  %v3779_v17 = vmax.f32 %v3667_v10, 0.0  ;;  %v8806_v38 = vpop.eup %5827  ;;  %v3183_v36 = vmul.f32 0.0005952381, %v3167_v4  ;;  %v3652_v57 = vadd.f32 %v8592_v33, %v3492_v41 }
 0x40a   :  { %v3318_v32 = vadd.f32 1e-05, %v3198_v58  ;;  %v3774_v46 = vmax.f32 %v3662_v30, 0.0  ;;  %v5689_v2 = vpack.c.bf16 %v3775_v20, %v3761_v44  ;;  %v11137_v42 = vsub.f32 %v7974_v12, %v8664_v39 }
 0x40b   :  { %v3506_v6 = vmul.f32 %v8606_v56, %v3346_v50  ;;  %v5721_v43 = vpack.c.bf16 %v3779_v17, %v3765_v5  ;;  %v3199_v8 = vsub.f32 %v3183_v36, %v3191_v31  ;;  %v3764_v50 = vmax.f32 %v3652_v57, 0.0 }
 0x40c   :  { %v3357_v19 = vmul.f32 %v8790_v54, %v11137_v42  ;;  %5833 = vrsqrt.f32 %v3318_v32  ;;  %v5691_v10 = vpack.c.bf16 %v3774_v46, %v3760_v14  ;;  %5690 = vmatprep.subr.bf16.mxu1 %v5689_v2  ;;  %v11138_v30 = vsub.f32 %v11112_v27, %v8688_v11 }
 0x40d   :  { %v3666_v18 = vadd.f32 %v8594_v59, %v3506_v6  ;;  %5722 = vmatprep.subr.bf16.mxu0 %v5721_v43  ;;  %v11139_v5 = vsub.f32 %v8132_v3, %v8664_v39  ;;  %v3319_v36 = vadd.f32 1e-05, %v3199_v8  ;;  %v11140_v31 = vsub.f32 %v11113_v23, %v8688_v11 }
 0x40e   :  { %v3371_v44 = vmul.f32 %v8806_v38, %v11138_v30  ;;  %v3517_v41 = vmul.f32 %v8596_v24, %v3357_v19  ;;  %v8823_v4 = vpop.eup %5829  ;;  %5692 = vmatpush1.bf16.msra.mxu1 %v5691_v10  ;;  %v11141_v27 = vsub.f32 %v7965_v26, %v8664_v39  ;;  %v11142_v14 = vsub.f32 %v11114_v25, %v8688_v11 }
 0x40f   :  { %v3778_v58 = vmax.f32 %v3666_v18, 0.0  ;;  %v3361_v12 = vmul.f32 %v8790_v54, %v11139_v5  ;;  %v3375_v20 = vmul.f32 %v8806_v38, %v11140_v31  ;;  %5835 = vrsqrt.f32 %v3319_v36 }
 0x410   :  { %v3356_v17 = vmul.f32 %v8790_v54, %v11141_v27  ;;  %v3370_v3 = vmul.f32 %v8806_v38, %v11142_v14  ;;  %v3531_v32 = vmul.f32 %v8598_v9, %v3371_v44  ;;  %v3677_v46 = vadd.f32 %v8600_v35, %v3517_v41 }
 0x411   :  { %v5723_v6 = vpack.c.bf16 %v3778_v58, %v3764_v50  ;;  %v3521_v57 = vmul.f32 %v8596_v24, %v3361_v12  ;;  %v3535_v23 = vmul.f32 %v8598_v9, %v3375_v20  ;;  %v11143_v42 = vsub.f32 %v8123_v62, %v8664_v39  ;;  %v8849_v8 = vpop.eup %5831 }
 0x412   :  { %v3516_v2 = vmul.f32 %v8596_v24, %v3356_v17  ;;  %v3530_v26 = vmul.f32 %v8598_v9, %v3370_v3  ;;  %v3691_v43 = vadd.f32 %v8602_v34, %v3531_v32  ;;  %v3789_v25 = vmax.f32 %v3677_v46, 0.0 }
 0x413   :  { %5724 = vmatpush1.bf16.msra.mxu0 %v5723_v6  ;;  %v3681_v18 = vadd.f32 %v8600_v35, %v3521_v57  ;;  %v3360_v19 = vmul.f32 %v8790_v54, %v11143_v42  ;;  %v3695_v10 = vadd.f32 %v8602_v34, %v3535_v23  ;;  %v11144_v30 = vsub.f32 %v11115_v52, %v8688_v11 }
 0x414   :  { %v3676_v50 = vadd.f32 %v8600_v35, %v3516_v2  ;;  %v3690_v58 = vadd.f32 %v8602_v34, %v3530_v26  ;;  %v3803_v41 = vmax.f32 %v3691_v43, 0.0  ;;  %v11145_v62 = vsub.f32 %v11121_v29, %v8712_v40 }
 0x415   :  { %v3374_v44 = vmul.f32 %v8806_v38, %v11144_v30  ;;  %v3793_v5 = vmax.f32 %v3681_v18, 0.0  ;;  %v3520_v12 = vmul.f32 %v8596_v24, %v3360_v19  ;;  %v3807_v31 = vmax.f32 %v3695_v10, 0.0 }
 0x416   :  { %v3385_v36 = vmul.f32 %v8823_v4, %v11145_v62  ;;  %v3788_v20 = vmax.f32 %v3676_v50, 0.0  ;;  %v3802_v27 = vmax.f32 %v3690_v58, 0.0  ;;  %v5693_v14 = vpack.c.bf16 %v3803_v41, %v3789_v25  ;;  %v8870_v46 = vpop.eup %5833 }
 0x417   :  { %v3534_v17 = vmul.f32 %v8598_v9, %v3374_v44  ;;  %v3680_v3 = vadd.f32 %v8600_v35, %v3520_v12  ;;  %v11146_v52 = vsub.f32 %v11131_v0, %v8738_v60  ;;  %v5725_v29 = vpack.c.bf16 %v3807_v31, %v3793_v5  ;;  %v11151_v5 = vld [vmem:[#allocation30_spill] sm:$0xff] }
 0x418   :  { %v3545_v32 = vmul.f32 %v8604_v53, %v3385_v36  ;;  %v5695_v57 = vpack.c.bf16 %v3802_v27, %v3788_v20  ;;  %v11147_v2 = vsub.f32 %v11122_v55, %v8712_v40  ;;  %5694 = vmatprep.subr.bf16.mxu1 %v5693_v14  ;;  %v11148_v18 = vsub.f32 %v11132_v51, %v8738_v60  ;;  %v11149_v55 = vld [vmem:[#allocation41_spill] sm:$0xff] }
 0x419   :  { %v3399_v6 = vmul.f32 %v8849_v8, %v11146_v52  ;;  %v3694_v23 = vadd.f32 %v8602_v34, %v3534_v17  ;;  %v3792_v43 = vmax.f32 %v3680_v3, 0.0  ;;  %5726 = vmatprep.subr.bf16.mxu0 %v5725_v29  ;;  %v3270_v50 = vsub.f32 %v11149_v55, %v8738_v60  ;;  %v8894_v62 = vpop.eup %5835 }
 0x41a   :  { %v3389_v26 = vmul.f32 %v8823_v4, %v11147_v2  ;;  %v3705_v0 = vadd.f32 %v8610_v1, %v3545_v32  ;;  %v3403_v42 = vmul.f32 %v8849_v8, %v11148_v18  ;;  %5696 = vmatpush1.bf16.msra.mxu1 %v5695_v57  ;;  %v11150_v58 = vsub.f32 %v11123_v49, %v8712_v40  ;;  %v11153_v57 = vld [vmem:[#allocation60_spill] sm:$0xff]  ;;  %v11154_v18 = vld [vmem:[#allocation67_spill] sm:$0xff] }
 0x41b   :  { %v3559_v25 = vmul.f32 %v8608_v22, %v3399_v6  ;;  %v3806_v19 = vmax.f32 %v3694_v23, 0.0  ;;  %v3274_v12 = vsub.f32 %v11151_v5, %v8738_v60  ;;  %v3398_v20 = vmul.f32 %v8849_v8, %v3270_v50  ;;  %v11156_v5 = vld [vmem:[#allocation42_spill] sm:$0xff] }
 0x41c   :  { %v3549_v10 = vmul.f32 %v8604_v53, %v3389_v26  ;;  %v3384_v30 = vmul.f32 %v8823_v4, %v11150_v58  ;;  %v3817_v41 = vmax.f32 %v3705_v0, 0.0  ;;  %v3563_v51 = vmul.f32 %v8608_v22, %v3403_v42  ;;  %v11155_v58 = vld [vmem:[#allocation53_spill] sm:$0xff] }
 0x41d   :  { %v3719_v44 = vadd.f32 %v8612_v61, %v3559_v25  ;;  %v5727_v36 = vpack.c.bf16 %v3806_v19, %v3792_v43  ;;  %v11152_v14 = vsub.f32 %v11124_v37, %v8712_v40  ;;  %v3402_v52 = vmul.f32 %v8849_v8, %v3274_v12 }
 0x41e   :  { %v3709_v31 = vadd.f32 %v8610_v1, %v3549_v10  ;;  %v3544_v27 = vmul.f32 %v8604_v53, %v3384_v30  ;;  %v3723_v17 = vadd.f32 %v8612_v61, %v3563_v51  ;;  %v3558_v32 = vmul.f32 %v8608_v22, %v3398_v20 }
 0x41f   :  { %v3831_v49 = vmax.f32 %v3719_v44, 0.0  ;;  %v3388_v3 = vmul.f32 %v8823_v4, %v11152_v14  ;;  %5728 = vmatpush1.bf16.msra.mxu0 %v5727_v36  ;;  %v3285_v23 = vsub.f32 %v11153_v57, %v8768_v13  ;;  %v3562_v25 = vmul.f32 %v8608_v22, %v3402_v52  ;;  %v8923_v36 = vpop.permute.xlu0 %3640 }
 0x420   :  { %v3821_v6 = vmax.f32 %v3709_v31, 0.0  ;;  %v3704_v29 = vadd.f32 %v8610_v1, %v3544_v27  ;;  %v3835_v26 = vmax.f32 %v3723_v17, 0.0  ;;  %v3718_v37 = vadd.f32 %v8612_v61, %v3558_v32  ;;  %v8931_v32 = vpop.permute.xlu1 %3645 }
 0x421   :  { %v5697_v2 = vpack.c.bf16 %v3831_v49, %v3817_v41  ;;  %v3548_v43 = vmul.f32 %v8604_v53, %v3388_v3  ;;  %v3299_v42 = vsub.f32 %v11154_v18, %v8792_v21  ;;  %v3413_v19 = vmul.f32 %v8870_v46, %v3285_v23  ;;  %v11157_v49 = vld [vmem:[#allocation28_spill] sm:$0xff] }
 0x422   :  { %v3816_v0 = vmax.f32 %v3704_v29, 0.0  ;;  %v5729_v10 = vpack.c.bf16 %v3835_v26, %v3821_v6  ;;  %v3722_v50 = vadd.f32 %v8612_v61, %v3562_v25  ;;  %v3289_v30 = vsub.f32 %v11155_v58, %v8768_v13  ;;  %v11158_v23 = vld [vmem:[#allocation68_spill] sm:$0xff] }
 0x423   :  { %5698 = vmatprep.subr.bf16.mxu1 %v5697_v2  ;;  %v3708_v55 = vadd.f32 %v8610_v1, %v3548_v43  ;;  %v3830_v44 = vmax.f32 %v3718_v37, 0.0  ;;  %v3427_v41 = vmul.f32 %v8894_v62, %v3299_v42  ;;  %v3573_v51 = vmul.f32 %v8614_v16, %v3413_v19 }
 0x424   :  { %v3303_v12 = vsub.f32 %v11156_v5, %v8792_v21  ;;  %5730 = vmatprep.subr.bf16.mxu0 %v5729_v10  ;;  %v3834_v20 = vmax.f32 %v3722_v50, 0.0  ;;  %v3417_v27 = vmul.f32 %v8870_v46, %v3289_v30  ;;  %v3284_v17 = vsub.f32 %v11157_v49, %v8768_v13 }
 0x425   :  { %v3820_v31 = vmax.f32 %v3708_v55, 0.0  ;;  %v5699_v14 = vpack.c.bf16 %v3830_v44, %v3816_v0  ;;  %v3587_v3 = vmul.f32 %v8616_v15, %v3427_v41  ;;  %v3733_v52 = vadd.f32 %v8923_v36, %v3573_v51  ;;  %v11159_v0 = vld [vmem:[#allocation70_spill] sm:$0xff]  ;;  %v11160_v55 = vld [vmem:[#allocation80_spill] sm:$0xff] }
 0x426   :  { %v3431_v6 = vmul.f32 %v8894_v62, %v3303_v12  ;;  %v3577_v57 = vmul.f32 %v8614_v16, %v3417_v27  ;;  %v3298_v2 = vsub.f32 %v11158_v23, %v8792_v21  ;;  %v3412_v26 = vmul.f32 %v8870_v46, %v3284_v17 }
 0x427   :  { %v5731_v29 = vpack.c.bf16 %v3834_v20, %v3820_v31  ;;  %5700 = vmatpush1.bf16.msra.mxu1 %v5699_v14  ;;  %v3747_v43 = vadd.f32 %v8931_v32, %v3587_v3  ;;  %v3845_v25 = vmax.f32 %v3733_v52, 0.0  ;;  %v3288_v18 = vsub.f32 %v11159_v0, %v8768_v13 }
 0x428   :  { %v3591_v37 = vmul.f32 %v8616_v15, %v3431_v6  ;;  %v3737_v42 = vadd.f32 %v8923_v36, %v3577_v57  ;;  %v3426_v19 = vmul.f32 %v8894_v62, %v3298_v2  ;;  %v3572_v10 = vmul.f32 %v8614_v16, %v3412_v26 }
 0x429   :  { %5732 = vmatpush1.bf16.msra.mxu0 %v5731_v29  ;;  %v3302_v50 = vsub.f32 %v11160_v55, %v8792_v21  ;;  %v3859_v58 = vmax.f32 %v3747_v43, 0.0  ;;  %v3416_v44 = vmul.f32 %v8870_v46, %v3288_v18  ;;  %v11161_v41 = vsub.f32 %v7909_v28, %v8618_v45  ;;  %v11163_v29 = vld [vmem:[#allocation110_spill] sm:$0xff] }
 0x42a   :  { %v3751_v30 = vadd.f32 %v8931_v32, %v3591_v37  ;;  %v3849_v5 = vmax.f32 %v3737_v42, 0.0  ;;  %v3586_v12 = vmul.f32 %v8616_v15, %v3426_v19  ;;  %v3732_v31 = vadd.f32 %v8923_v36, %v3572_v10  ;;  %v11164_v43 = vld [vmem:[#allocation78_spill] sm:$0xff]  ;;  %v11166_v42 = vld [vmem:[#allocation88_spill] sm:$0xff] }
 0x42b   :  { %v3331_v51 = vmul.f32 %v8736_v47, %v11161_v41  ;;  %v3430_v20 = vmul.f32 %v8894_v62, %v3302_v50  ;;  %v5701_v27 = vpack.c.bf16 %v3859_v58, %v3845_v25  ;;  %v3576_v17 = vmul.f32 %v8614_v16, %v3416_v44 }
 0x42c   :  { %v3863_v49 = vmax.f32 %v3751_v30, 0.0  ;;  %v11162_v14 = vsub.f32 %v7913_v63, %v8636_v7  ;;  %v3746_v28 = vadd.f32 %v8931_v32, %v3586_v12  ;;  %v3844_v52 = vmax.f32 %v3732_v31, 0.0  ;;  %v11168_v30 = vld [vmem:[#allocation36_spill] sm:$0xff] }
 0x42d   :  { %v3590_v6 = vmul.f32 %v8616_v15, %v3430_v20  ;;  %v3491_v57 = vmul.f32 %v11163_v29, %v3331_v51  ;;  %5702 = vmatprep.subr.bf16.mxu1 %v5701_v27  ;;  %v3736_v2 = vadd.f32 %v8923_v36, %v3576_v17  ;;  %v11165_v25 = vsub.f32 %v11164_v43, %v8618_v45 }
 0x42e   :  { %v3345_v3 = vmul.f32 %v8766_v48, %v11162_v14  ;;  %v5733_v23 = vpack.c.bf16 %v3863_v49, %v3849_v5  ;;  %v3858_v37 = vmax.f32 %v3746_v28, 0.0  ;;  %v11167_v19 = vsub.f32 %v11166_v42, %v8636_v7  ;;  %v11170_v49 = vld [vmem:[#allocation31_spill] sm:$0xff] }
 0x42f   :  { %v3337_v63 = vmul.f32 %v8736_v47, %v11165_v25  ;;  %v3750_v0 = vadd.f32 %v8931_v32, %v3590_v6  ;;  %v3651_v18 = vadd.f32 %v8592_v33, %v3491_v57  ;;  %v3848_v55 = vmax.f32 %v3736_v2, 0.0  ;;  %v11172_v57 = vld [vmem:[#allocation49_spill] sm:$0xff] }
 0x430   :  { %v3505_v26 = vmul.f32 %v8606_v56, %v3345_v3  ;;  %v3351_v10 = vmul.f32 %v8766_v48, %v11167_v19  ;;  %5734 = vmatprep.subr.bf16.mxu0 %v5733_v23  ;;  %v11169_v44 = vsub.f32 %v11168_v30, %v8618_v45  ;;  %v5703_v51 = vpack.c.bf16 %v3858_v37, %v3844_v52  ;;  %v8992_v52 = vld [vmem:[%s10557_s10] sm:$0xff] }
 0x431   :  { %v3497_v58 = vmul.f32 %v11163_v29, %v3337_v63  ;;  %v3862_v5 = vmax.f32 %v3750_v0, 0.0  ;;  %v3763_v12 = vmax.f32 %v3651_v18, 0.0  ;;  %v11171_v17 = vsub.f32 %v11170_v49, %v8636_v7 }
 0x432   :  { %v3665_v50 = vadd.f32 %v8594_v59, %v3505_v26  ;;  %v3330_v41 = vmul.f32 %v8736_v47, %v11169_v44  ;;  %v3511_v31 = vmul.f32 %v8606_v56, %v3351_v10  ;;  %5704 = vmatpush1.bf16.msra.mxu1 %v5703_v51  ;;  %v11173_v23 = vsub.f32 %v11172_v57, %v8618_v45  ;;  %v11174_v26 = vld [vmem:[#allocation84_spill] sm:$0xff] }
 0x433   :  { %v3657_v27 = vadd.f32 %v8592_v33, %v3497_v58  ;;  %v3344_v14 = vmul.f32 %v8766_v48, %v11171_v17  ;;  %v5735_v28 = vpack.c.bf16 %v3862_v5, %v3848_v55  ;;  %v11175_v43 = vsub.f32 %v11174_v26, %v8636_v7  ;;  %v11176_v55 = vld [vmem:[#allocation37_spill] sm:$0xff] }
 0x434   :  { %v3777_v20 = vmax.f32 %v3665_v50, 0.0  ;;  %v3490_v3 = vmul.f32 %v11163_v29, %v3330_v41  ;;  %v3671_v6 = vadd.f32 %v8594_v59, %v3511_v31  ;;  %v3336_v2 = vmul.f32 %v8736_v47, %v11173_v23  ;;  %v11178_v41 = vld [vmem:[#allocation51_spill] sm:$0xff]  ;;  %v11183_v23 = vld [vmem:[#allocation86_spill] sm:$0xff] }
 0x435   :  { %v3350_v25 = vmul.f32 %v8766_v48, %v11175_v43  ;;  %v3769_v37 = vmax.f32 %v3657_v27, 0.0  ;;  %v3504_v0 = vmul.f32 %v8606_v56, %v3344_v14  ;;  %5736 = vmatpush1.bf16.msra.mxu0 %v5735_v28  ;;  %v11177_v50 = vsub.f32 %v11176_v55, %v8664_v39  ;;  %5534 = vmatmul.mubr.msk.f32.vlgmr.msra.gmra.mrb[58].mxu1 %vm3874_vm1, %v8992_v52  ;;  %v9028_v28 = vld [vmem:[%s10557_s10 + $0x8] sm:$0x1] }
 0x436   :  { %v5705_v63 = vpack.c.bf16 %v3777_v20, %v3763_v12  ;;  %v3650_v18 = vadd.f32 %v8592_v33, %v3490_v3  ;;  %v3783_v42 = vmax.f32 %v3671_v6, 0.0  ;;  %v3496_v19 = vmul.f32 %v11163_v29, %v3336_v2  ;;  %v11180_v12 = vld [vmem:[#allocation81_spill] sm:$0xff] }
 0x437   :  { %v3510_v10 = vmul.f32 %v8606_v56, %v3350_v25  ;;  %v3359_v58 = vmul.f32 %v8790_v54, %v11177_v50  ;;  %v3664_v30 = vadd.f32 %v8594_v59, %v3504_v0  ;;  %v11179_v51 = vsub.f32 %v11178_v41, %v8688_v11  ;;  %v11185_v0 = vld [vmem:[#allocation11_spill] sm:$0xff]  ;;  %v11187_v41 = vld [vmem:[#allocation32_spill] sm:$0xff] }
 0x438   :  { %5706 = vmatprep.subr.bf16.mxu1 %v5705_v63  ;;  %v3762_v44 = vmax.f32 %v3650_v18, 0.0  ;;  %v11181_v31 = vsub.f32 %v11180_v12, %v8664_v39  ;;  %v5753_v27 = vpack.c.bf16 %v3783_v42, %v3769_v37  ;;  %v3656_v49 = vadd.f32 %v8592_v33, %v3496_v19  ;;  %5538 = vmatmul.mubr.msk.f32.vlgmr.msra.gmra.mrb[70].mxu0 %vm3874_vm1, %v8992_v52 }
 0x439   :  { %v3373_v5 = vmul.f32 %v8806_v38, %v11179_v51  ;;  %v3670_v17 = vadd.f32 %v8594_v59, %v3510_v10  ;;  %v3519_v14 = vmul.f32 %v8596_v24, %v3359_v58  ;;  %v11182_v3 = vmov 0.0  }
 0x43a   :  { %v3365_v20 = vmul.f32 %v8790_v54, %v11181_v31  ;;  %3951 = vmatprep.mubr.f32.mxu1 %v11182_v3  ;;  %v3776_v6 = vmax.f32 %v3664_v30, 0.0  ;;  %v11184_v2 = vsub.f32 %v11183_v23, %v8688_v11  ;;  %5754 = vmatprep.subr.bf16.mxu0 %v5753_v27  ;;  %v3768_v25 = vmax.f32 %v3656_v49, 0.0  ;;  %v11189_v27 = vld [vmem:[#allocation65_spill] sm:$0xff] }
 0x43b   :  { %v3533_v57 = vmul.f32 %v8598_v9, %v3373_v5  ;;  %v3782_v63 = vmax.f32 %v3670_v17, 0.0  ;;  %v3679_v37 = vadd.f32 %v8600_v35, %v3519_v14  ;;  %v11186_v18 = vsub.f32 %v11185_v0, %v8664_v39  ;;  %4105 = vmatprep.mubr.f32.mxu0 %v11182_v3  ;;  %5535 = vmatmul.mubr.msk.f32.gmra.mrb[60].mxu1 %vm3874_vm1, %v9028_v28  ;;  %v11194_v0 = vld [vmem:[#allocation27_spill] sm:$0xff] }
 0x43c   :  { %v3379_v26 = vmul.f32 %v8806_v38, %v11184_v2  ;;  %v3525_v43 = vmul.f32 %v8596_v24, %v3365_v20  ;;  %v5707_v19 = vpack.c.bf16 %v3776_v6, %v3762_v44  ;;  %v11188_v51 = vsub.f32 %v11187_v41, %v8688_v11  ;;  %4022 = vmatprep.mubr.f32.mxu1 %v11182_v3 }
 0x43d   :  { %v3358_v42 = vmul.f32 %v8790_v54, %v11186_v18  ;;  %v3693_v10 = vadd.f32 %v8602_v34, %v3533_v57  ;;  %v5755_v58 = vpack.c.bf16 %v3782_v63, %v3768_v25  ;;  %v3791_v30 = vmax.f32 %v3679_v37, 0.0  ;;  %5539 = vmatmul.mubr.msk.f32.gmra.mrb[72].mxu0 %vm3874_vm1, %v9028_v28  ;;  %v11191_v57 = vld [vmem:[#allocation85_spill] sm:$0xff] }
 0x43e   :  { %v3539_v55 = vmul.f32 %v8598_v9, %v3379_v26  ;;  %v3685_v50 = vadd.f32 %v8600_v35, %v3525_v43  ;;  %v3372_v5 = vmul.f32 %v8806_v38, %v11188_v51  ;;  %5708 = vmatpush1.bf16.msra.mxu1 %v5707_v19  ;;  %v11190_v49 = vsub.f32 %v11189_v27, %v8664_v39  ;;  %v11193_v26 = vld [vmem:[#allocation38_spill] sm:$0xff] }
 0x43f   :  { %v3518_v12 = vmul.f32 %v8596_v24, %v3358_v42  ;;  %v3805_v44 = vmax.f32 %v3693_v10, 0.0  ;;  %5756 = vmatpush1.bf16.msra.mxu0 %v5755_v58  ;;  %v11192_v23 = vsub.f32 %v11191_v57, %v8688_v11  ;;  %v3273_v43 = vsub.f32 %v11193_v26, %v8738_v60  ;;  %4253 = vmatprep.mubr.f32.mxu0 %v11182_v3  ;;  %v11196_v51 = vld [vmem:[#allocation90_spill] sm:$0xff]  ;;  %v11199_v57 = vld [vmem:[#allocation48_spill] sm:$0xff] }
 0x440   :  { %v3699_v31 = vadd.f32 %v8602_v34, %v3539_v55  ;;  %v3797_v20 = vmax.f32 %v3685_v50, 0.0  ;;  %v3364_v17 = vmul.f32 %v8790_v54, %v11190_v49  ;;  %v3532_v14 = vmul.f32 %v8598_v9, %v3372_v5  ;;  %v11197_v27 = vld [vmem:[#allocation94_spill] sm:$0xff] }
 0x441   :  { %v3678_v6 = vadd.f32 %v8600_v35, %v3518_v12  ;;  %v3378_v2 = vmul.f32 %v8806_v38, %v11192_v23  ;;  %v5709_v25 = vpack.c.bf16 %v3805_v44, %v3791_v30  ;;  %v11195_v18 = vsub.f32 %v11194_v0, %v8712_v40  ;;  %v11200_v0 = vld [vmem:[#allocation29_spill] sm:$0xff] }
 0x442   :  { %v3811_v63 = vmax.f32 %v3699_v31, 0.0  ;;  %v3524_v37 = vmul.f32 %v8596_v24, %v3364_v17  ;;  %v3692_v19 = vadd.f32 %v8602_v34, %v3532_v14  ;;  %v3401_v50 = vmul.f32 %v8849_v8, %v3273_v43 }
 0x443   :  { %v3387_v42 = vmul.f32 %v8823_v4, %v11195_v18  ;;  %v3790_v10 = vmax.f32 %v3678_v6, 0.0  ;;  %v3538_v55 = vmul.f32 %v8598_v9, %v3378_v2  ;;  %5710 = vmatprep.subr.bf16.mxu1 %v5709_v25  ;;  %v3279_v5 = vsub.f32 %v11196_v51, %v8738_v60 }
 0x444   :  { %v5757_v58 = vpack.c.bf16 %v3811_v63, %v3797_v20  ;;  %v3684_v30 = vadd.f32 %v8600_v35, %v3524_v37  ;;  %v3804_v12 = vmax.f32 %v3692_v19, 0.0  ;;  %v3561_v31 = vmul.f32 %v8608_v22, %v3401_v50 }
 0x445   :  { %v3547_v41 = vmul.f32 %v8604_v53, %v3387_v42  ;;  %v3698_v44 = vadd.f32 %v8602_v34, %v3538_v55  ;;  %v11198_v49 = vsub.f32 %v11197_v27, %v8712_v40  ;;  %v3407_v6 = vmul.f32 %v8849_v8, %v3279_v5  ;;  %v11202_v5 = vld [vmem:[#allocation71_spill] sm:$0xff] }
 0x446   :  { %5758 = vmatprep.subr.bf16.mxu0 %v5757_v58  ;;  %v3796_v14 = vmax.f32 %v3684_v30, 0.0  ;;  %v3258_v23 = vsub.f32 %v11199_v57, %v8712_v40  ;;  %v5711_v2 = vpack.c.bf16 %v3804_v12, %v3790_v10  ;;  %v3721_v43 = vadd.f32 %v8612_v61, %v3561_v31  ;;  %v11201_v10 = vld [vmem:[#allocation82_spill] sm:$0xff] }
 0x447   :  { %v3393_v17 = vmul.f32 %v8823_v4, %v11198_v49  ;;  %v3707_v20 = vadd.f32 %v8610_v1, %v3547_v41  ;;  %v3810_v26 = vmax.f32 %v3698_v44, 0.0  ;;  %v3567_v37 = vmul.f32 %v8608_v22, %v3407_v6  ;;  %v11203_v49 = vld [vmem:[#allocation40_spill] sm:$0xff] }
 0x448   :  { %v3272_v18 = vsub.f32 %v11200_v0, %v8738_v60  ;;  %v3386_v42 = vmul.f32 %v8823_v4, %v3258_v23  ;;  %5712 = vmatpush1.bf16.msra.mxu1 %v5711_v2  ;;  %v3833_v55 = vmax.f32 %v3721_v43, 0.0  ;;  %v3264_v58 = vsub.f32 %v11201_v10, %v8712_v40  ;;  %v11204_v2 = vld [vmem:[#allocation20_spill] sm:$0xff]  ;;  %v11206_v10 = vld [vmem:[#allocation14_spill] sm:$0xff] }
 0x449   :  { %v3553_v25 = vmul.f32 %v8604_v53, %v3393_v17  ;;  %v3819_v63 = vmax.f32 %v3707_v20, 0.0  ;;  %v5759_v19 = vpack.c.bf16 %v3810_v26, %v3796_v14  ;;  %v3727_v30 = vadd.f32 %v8612_v61, %v3567_v37 }
 0x44a   :  { %v3400_v41 = vmul.f32 %v8849_v8, %v3272_v18  ;;  %v3546_v51 = vmul.f32 %v8604_v53, %v3386_v42  ;;  %v3278_v12 = vsub.f32 %v11202_v5, %v8738_v60  ;;  %v3392_v27 = vmul.f32 %v8823_v4, %v3264_v58  ;;  %v11207_v5 = vld [vmem:[#allocation57_spill] sm:$0xff] }
 0x44b   :  { %v3713_v50 = vadd.f32 %v8610_v1, %v3553_v25  ;;  %5760 = vmatpush1.bf16.msra.mxu0 %v5759_v19  ;;  %v5713_v44 = vpack.c.bf16 %v3833_v55, %v3819_v63  ;;  %v3287_v17 = vsub.f32 %v11203_v49, %v8768_v13  ;;  %v3839_v14 = vmax.f32 %v3727_v30, 0.0  ;;  %v11205_v25 = vld [vmem:[#allocation16_spill] sm:$0xff] }
 0x44c   :  { %v3560_v20 = vmul.f32 %v8608_v22, %v3400_v41  ;;  %v3706_v6 = vadd.f32 %v8610_v1, %v3546_v51  ;;  %v3406_v57 = vmul.f32 %v8849_v8, %v3278_v12  ;;  %v3552_v23 = vmul.f32 %v8604_v53, %v3392_v27 }
 0x44d   :  { %v3825_v31 = vmax.f32 %v3713_v50, 0.0  ;;  %5714 = vmatprep.subr.bf16.mxu1 %v5713_v44  ;;  %v3301_v26 = vsub.f32 %v11204_v2, %v8792_v21  ;;  %v3415_v43 = vmul.f32 %v8870_v46, %v3287_v17  ;;  %v3293_v63 = vsub.f32 %v11205_v25, %v8768_v13 }
 0x44e   :  { %v3720_v0 = vadd.f32 %v8612_v61, %v3560_v20  ;;  %v3818_v18 = vmax.f32 %v3706_v6, 0.0  ;;  %v3566_v42 = vmul.f32 %v8608_v22, %v3406_v57  ;;  %v3712_v19 = vadd.f32 %v8610_v1, %v3552_v23  ;;  %v11208_v6 = vld [vmem:[#allocation33_spill] sm:$0xff] }
 0x44f   :  { %v5761_v37 = vpack.c.bf16 %v3839_v14, %v3825_v31  ;;  %v3429_v55 = vmul.f32 %v8894_v62, %v3301_v26  ;;  %v3575_v50 = vmul.f32 %v8614_v16, %v3415_v43  ;;  %v3307_v58 = vsub.f32 %v11206_v10, %v8792_v21 }
 0x450   :  { %v3832_v30 = vmax.f32 %v3720_v0, 0.0  ;;  %v3726_v41 = vadd.f32 %v8612_v61, %v3566_v42  ;;  %v3421_v51 = vmul.f32 %v8870_v46, %v3293_v63  ;;  %v3286_v12 = vsub.f32 %v11207_v5, %v8768_v13  ;;  %v11209_v0 = vld [vmem:[#allocation91_spill] sm:$0xff] }
 0x451   :  { %5762 = vmatprep.subr.bf16.mxu0 %v5761_v37  ;;  %v3824_v44 = vmax.f32 %v3712_v19, 0.0  ;;  %v3589_v31 = vmul.f32 %v8616_v15, %v3429_v55  ;;  %v3735_v27 = vadd.f32 %v8923_v36, %v3575_v50  ;;  %v3435_v49 = vmul.f32 %v8894_v62, %v3307_v58  ;;  %v11210_v50 = vld [vmem:[#allocation45_spill] sm:$0xff] }
 0x452   :  { %v5715_v17 = vpack.c.bf16 %v3832_v30, %v3818_v18  ;;  %v3838_v14 = vmax.f32 %v3726_v41, 0.0  ;;  %v3581_v20 = vmul.f32 %v8614_v16, %v3421_v51  ;;  %v3300_v57 = vsub.f32 %v11208_v6, %v8792_v21  ;;  %v11211_v51 = vld [vmem:[#allocation12_spill] sm:$0xff] }
 0x453   :  { %v3749_v23 = vadd.f32 %v8931_v32, %v3589_v31  ;;  %v3847_v2 = vmax.f32 %v3735_v27, 0.0  ;;  %v3595_v26 = vmul.f32 %v8616_v15, %v3435_v49  ;;  %v3414_v43 = vmul.f32 %v8870_v46, %v3286_v12 }
 0x454   :  { %5716 = vmatpush1.bf16.msra.mxu1 %v5715_v17  ;;  %v5763_v25 = vpack.c.bf16 %v3838_v14, %v3824_v44  ;;  %v3741_v63 = vadd.f32 %v8923_v36, %v3581_v20  ;;  %v3428_v37 = vmul.f32 %v8894_v62, %v3300_v57  ;;  %v3292_v18 = vsub.f32 %v11209_v0, %v8768_v13  ;;  %v11213_v20 = vld [vmem:[#allocation15_spill] sm:$0xff] }
 0x455   :  { %v3861_v42 = vmax.f32 %v3749_v23, 0.0  ;;  %v3755_v19 = vadd.f32 %v8931_v32, %v3595_v26  ;;  %v3574_v55 = vmul.f32 %v8614_v16, %v3414_v43  ;;  %v3306_v10 = vsub.f32 %v11210_v50, %v8792_v21  ;;  %v11217_v50 = vld [vmem:[#allocation95_spill] sm:$0xff] }
 0x456   :  { %5764 = vmatpush1.bf16.msra.mxu0 %v5763_v25  ;;  %v3853_v58 = vmax.f32 %v3741_v63, 0.0  ;;  %v3588_v30 = vmul.f32 %v8616_v15, %v3428_v37  ;;  %v3420_v41 = vmul.f32 %v8870_v46, %v3292_v18  ;;  %v11212_v5 = vsub.f32 %v11211_v51, %v8618_v45  ;;  %v11215_v25 = vld [vmem:[#allocation21_spill] sm:$0xff] }
 0x457   :  { %v5717_v44 = vpack.c.bf16 %v3861_v42, %v3847_v2  ;;  %v3867_v31 = vmax.f32 %v3755_v19, 0.0  ;;  %v3734_v27 = vadd.f32 %v8923_v36, %v3574_v55  ;;  %v3434_v49 = vmul.f32 %v8894_v62, %v3306_v10 }
 0x458   :  { %v3335_v12 = vmul.f32 %v8736_v47, %v11212_v5  ;;  %v3748_v17 = vadd.f32 %v8931_v32, %v3588_v30  ;;  %v3580_v14 = vmul.f32 %v8614_v16, %v3420_v41  ;;  %v11214_v6 = vsub.f32 %v11213_v20, %v8636_v7  ;;  %v11219_v41 = vld [vmem:[#allocation58_spill] sm:$0xff] }
 0x459   :  { %5718 = vmatprep.subr.bf16.mxu1 %v5717_v44  ;;  %v5765_v26 = vpack.c.bf16 %v3867_v31, %v3853_v58  ;;  %v3846_v43 = vmax.f32 %v3734_v27, 0.0  ;;  %v3594_v2 = vmul.f32 %v8616_v15, %v3434_v49  ;;  %v11216_v63 = vsub.f32 %v11215_v25, %v8618_v45  ;;  %v11221_v20 = vld [vmem:[#allocation54_spill] sm:$0xff] }
 0x45a   :  { %v3349_v57 = vmul.f32 %v8766_v48, %v11214_v6  ;;  %v3495_v23 = vmul.f32 %v11163_v29, %v3335_v12  ;;  %v3860_v0 = vmax.f32 %v3748_v17, 0.0  ;;  %v3740_v18 = vadd.f32 %v8923_v36, %v3580_v14 }
 0x45b   :  { %v3341_v37 = vmul.f32 %v8736_v47, %v11216_v63  ;;  %5766 = vmatprep.subr.bf16.mxu0 %v5765_v26  ;;  %v3754_v55 = vadd.f32 %v8931_v32, %v3594_v2  ;;  %v11218_v10 = vsub.f32 %v11217_v50, %v8636_v7  ;;  %v11220_v51 = vsub.f32 %v11219_v41, %v8618_v45  ;;  %v11223_v2 = vld [vmem:[#allocation17_spill] sm:$0xff] }
 0x45c   :  { %v3509_v42 = vmul.f32 %v8606_v56, %v3349_v57  ;;  %v3655_v19 = vadd.f32 %v8592_v33, %v3495_v23  ;;  %v5719_v12 = vpack.c.bf16 %v3860_v0, %v3846_v43  ;;  %v3852_v44 = vmax.f32 %v3740_v18, 0.0  ;;  %v11225_v63 = vld [vmem:[#allocation25_spill] sm:$0xff] }
 0x45d   :  { %v3355_v58 = vmul.f32 %v8766_v48, %v11218_v10  ;;  %v3501_v30 = vmul.f32 %v11163_v29, %v3341_v37  ;;  %v3334_v5 = vmul.f32 %v8736_v47, %v11220_v51  ;;  %v3866_v49 = vmax.f32 %v3754_v55, 0.0 }
 0x45e   :  { %v3669_v31 = vadd.f32 %v8594_v59, %v3509_v42  ;;  %v3767_v27 = vmax.f32 %v3655_v19, 0.0  ;;  %v11222_v6 = vsub.f32 %v11221_v20, %v8636_v7  ;;  %5720 = vmatpush1.bf16.msra.mxu1 %v5719_v12  ;;  %v11224_v43 = vsub.f32 %v11223_v2, %v8618_v45 }
 0x45f   :  { %v3515_v17 = vmul.f32 %v8606_v56, %v3355_v58  ;;  %v3661_v14 = vadd.f32 %v8592_v33, %v3501_v30  ;;  %v3494_v26 = vmul.f32 %v11163_v29, %v3334_v5  ;;  %v11226_v37 = vsub.f32 %v11225_v63, %v8636_v7  ;;  %v11227_v5 = vld [vmem:[#allocation76_spill] sm:$0xff] }
 0x460   :  { %v3348_v57 = vmul.f32 %v8766_v48, %v11222_v6  ;;  %v3781_v23 = vmax.f32 %v3669_v31, 0.0  ;;  %v3340_v25 = vmul.f32 %v8736_v47, %v11224_v43  ;;  %v5767_v18 = vpack.c.bf16 %v3866_v49, %v3852_v44  ;;  %v11229_v31 = vld [vmem:[#allocation69_spill] sm:$0xff] }
 0x461   :  { %v3354_v0 = vmul.f32 %v8766_v48, %v11226_v37  ;;  %v3675_v42 = vadd.f32 %v8594_v59, %v3515_v17  ;;  %v3773_v19 = vmax.f32 %v3661_v14, 0.0  ;;  %v3654_v10 = vadd.f32 %v8592_v33, %v3494_v26  ;;  %5536 = vmatmul.mubr.msk.f32.vlgmr.msra.gmra.mrb[62].mxu1 %vm3874_vm1, %v8992_v52  ;;  %v11231_v6 = vld [vmem:[#allocation97_spill] sm:$0xff]  ;;  %v11232_v37 = vld [vmem:[#allocation63_spill] sm:$0xff] }
 0x462   :  { %v3508_v55 = vmul.f32 %v8606_v56, %v3348_v57  ;;  %v5737_v50 = vpack.c.bf16 %v3781_v23, %v3767_v27  ;;  %v3500_v58 = vmul.f32 %v11163_v29, %v3340_v25  ;;  %5768 = vmatpush1.bf16.msra.mxu0 %v5767_v18  ;;  %v11228_v12 = vsub.f32 %v11227_v5, %v8664_v39  ;;  %v11235_v5 = vld [vmem:[#allocation77_spill] sm:$0xff] }
 0x463   :  { %v3514_v30 = vmul.f32 %v8606_v56, %v3354_v0  ;;  %v3787_v41 = vmax.f32 %v3675_v42, 0.0  ;;  %v11230_v27 = vsub.f32 %v11229_v31, %v8688_v11  ;;  %v3766_v17 = vmax.f32 %v3654_v10, 0.0  ;;  %4028 = vmatprep.mubr.f32.mxu1 %v11182_v3  ;;  %v11234_v10 = vld [vmem:[#allocation74_spill] sm:$0xff] }
 0x464   :  { %v3668_v51 = vadd.f32 %v8594_v59, %v3508_v55  ;;  %v3363_v44 = vmul.f32 %v8790_v54, %v11228_v12  ;;  %5738 = vmatprep.subr.bf16.mxu1 %v5737_v50  ;;  %v3660_v14 = vadd.f32 %v8592_v33, %v3500_v58  ;;  %v3255_v57 = vsub.f32 %v11231_v6, %v8688_v11 }
 0x465   :  { %v3377_v49 = vmul.f32 %v8806_v38, %v11230_v27  ;;  %v3674_v20 = vadd.f32 %v8594_v59, %v3514_v30  ;;  %v5785_v23 = vpack.c.bf16 %v3787_v41, %v3773_v19  ;;  %5542 = vmatmul.mubr.msk.f32.vlgmr.msra.gmra.mrb[74].mxu0 %vm3874_vm1, %v8992_v52  ;;  %v11233_v0 = vsub.f32 %v11232_v37, %v8664_v39 }
 0x466   :  { %v3780_v26 = vmax.f32 %v3668_v51, 0.0  ;;  %v3523_v2 = vmul.f32 %v8596_v24, %v3363_v44  ;;  %v3772_v25 = vmax.f32 %v3660_v14, 0.0  ;;  %v3383_v42 = vmul.f32 %v8806_v38, %v3255_v57  ;;  %5537 = vmatmul.mubr.msk.f32.gmra.mrb[64].mxu1 %vm3874_vm1, %v9028_v28  ;;  %v11237_v57 = vld [vmem:[#allocation72_spill] sm:$0xff]  ;;  %4259 = vmatprep.mubr.f32.mxu0 %v11182_v3 }
 0x467   :  { %v3537_v43 = vmul.f32 %v8598_v9, %v3377_v49  ;;  %v3786_v63 = vmax.f32 %v3674_v20, 0.0  ;;  %v3369_v18 = vmul.f32 %v8790_v54, %v11233_v0  ;;  %5786 = vmatprep.subr.bf16.mxu0 %v5785_v23  ;;  %v3234_v58 = vsub.f32 %v11234_v10, %v8664_v39  ;;  %v11236_v49 = vld [vmem:[#allocation96_spill] sm:$0xff]  ;;  %4176 = vmatprep.mubr.f32.mxu1 %v11182_v3 }
 0x468   :  { %v5739_v55 = vpack.c.bf16 %v3780_v26, %v3766_v17  ;;  %v3683_v19 = vadd.f32 %v8600_v35, %v3523_v2  ;;  %v3543_v51 = vmul.f32 %v8598_v9, %v3383_v42  ;;  %v3248_v12 = vsub.f32 %v11235_v5, %v8688_v11  ;;  %v11240_v5 = vld [vmem:[#allocation99_spill] sm:$0xff] }
 0x469   :  { %v3697_v50 = vadd.f32 %v8602_v34, %v3537_v43  ;;  %v5787_v30 = vpack.c.bf16 %v3786_v63, %v3772_v25  ;;  %v3529_v41 = vmul.f32 %v8596_v24, %v3369_v18  ;;  %v3362_v27 = vmul.f32 %v8790_v54, %v3234_v58  ;;  %v11238_v25 = vld [vmem:[#allocation56_spill] sm:$0xff]  ;;  %5543 = vmatmul.mubr.msk.f32.gmra.mrb[76].mxu0 %vm3874_vm1, %v9028_v28 }
 0x46a   :  { %5740 = vmatpush1.bf16.msra.mxu1 %v5739_v55  ;;  %v3795_v44 = vmax.f32 %v3683_v19, 0.0  ;;  %v3240_v17 = vsub.f32 %v11236_v49, %v8664_v39  ;;  %v3703_v20 = vadd.f32 %v8602_v34, %v3543_v51  ;;  %v3376_v6 = vmul.f32 %v8806_v38, %v3248_v12  ;;  %4407 = vmatprep.mubr.f32.mxu0 %v11182_v3 }
 0x46b   :  { %v3809_v31 = vmax.f32 %v3697_v50, 0.0  ;;  %5788 = vmatpush1.bf16.msra.mxu0 %v5787_v30  ;;  %v3689_v14 = vadd.f32 %v8600_v35, %v3529_v41  ;;  %v3254_v23 = vsub.f32 %v11237_v57, %v8688_v11  ;;  %v3522_v2 = vmul.f32 %v8596_v24, %v3362_v27  ;;  %v11239_v50 = vld [vmem:[#allocation75_spill] sm:$0xff] }
 0x46c   :  { %v3368_v43 = vmul.f32 %v8790_v54, %v3240_v17  ;;  %v3263_v63 = vsub.f32 %v11238_v25, %v8712_v40  ;;  %v3815_v0 = vmax.f32 %v3703_v20, 0.0  ;;  %v3536_v18 = vmul.f32 %v8598_v9, %v3376_v6  ;;  %v11241_v20 = vld [vmem:[#allocation103_spill] sm:$0xff] }
 0x46d   :  { %v5741_v26 = vpack.c.bf16 %v3809_v31, %v3795_v44  ;;  %v3801_v37 = vmax.f32 %v3689_v14, 0.0  ;;  %v3382_v42 = vmul.f32 %v8806_v38, %v3254_v23  ;;  %v3682_v55 = vadd.f32 %v8600_v35, %v3522_v2 }
 0x46e   :  { %v3528_v19 = vmul.f32 %v8596_v24, %v3368_v43  ;;  %v3277_v10 = vsub.f32 %v11239_v50, %v8738_v60  ;;  %v3391_v58 = vmul.f32 %v8823_v4, %v3263_v63  ;;  %v3696_v41 = vadd.f32 %v8602_v34, %v3536_v18  ;;  %v11242_v43 = vld [vmem:[#allocation55_spill] sm:$0xff] }
 0x46f   :  { %5742 = vmatprep.subr.bf16.mxu1 %v5741_v26  ;;  %v5789_v30 = vpack.c.bf16 %v3815_v0, %v3801_v37  ;;  %v3542_v51 = vmul.f32 %v8598_v9, %v3382_v42  ;;  %v3269_v12 = vsub.f32 %v11240_v5, %v8712_v40  ;;  %v3794_v44 = vmax.f32 %v3682_v55, 0.0 }
 0x470   :  { %v3688_v31 = vadd.f32 %v8600_v35, %v3528_v19  ;;  %v3405_v27 = vmul.f32 %v8849_v8, %v3277_v10  ;;  %v3551_v49 = vmul.f32 %v8604_v53, %v3391_v58  ;;  %v3808_v17 = vmax.f32 %v3696_v41, 0.0  ;;  %v11243_v19 = vld [vmem:[#allocation18_spill] sm:$0xff] }
 0x471   :  { %5790 = vmatprep.subr.bf16.mxu0 %v5789_v30  ;;  %v3702_v14 = vadd.f32 %v8602_v34, %v3542_v51  ;;  %v3283_v6 = vsub.f32 %v11241_v20, %v8738_v60  ;;  %v3397_v57 = vmul.f32 %v8823_v4, %v3269_v12  ;;  %v3262_v25 = vsub.f32 %v11242_v43, %v8712_v40  ;;  %v11244_v51 = vld [vmem:[#allocation93_spill] sm:$0xff] }
 0x472   :  { %v3800_v23 = vmax.f32 %v3688_v31, 0.0  ;;  %v3565_v26 = vmul.f32 %v8608_v22, %v3405_v27  ;;  %v3711_v2 = vadd.f32 %v8610_v1, %v3551_v49  ;;  %v5743_v63 = vpack.c.bf16 %v3808_v17, %v3794_v44  ;;  %v11245_v27 = vld [vmem:[#allocation101_spill] sm:$0xff] }
 0x473   :  { %v3814_v37 = vmax.f32 %v3702_v14, 0.0  ;;  %v3411_v0 = vmul.f32 %v8849_v8, %v3283_v6  ;;  %v3557_v18 = vmul.f32 %v8604_v53, %v3397_v57  ;;  %v3276_v50 = vsub.f32 %v11243_v19, %v8738_v60  ;;  %v11246_v6 = vld [vmem:[#allocation89_spill] sm:$0xff] }
 0x474   :  { %v3725_v42 = vadd.f32 %v8612_v61, %v3565_v26  ;;  %v3823_v55 = vmax.f32 %v3711_v2, 0.0  ;;  %v3390_v10 = vmul.f32 %v8823_v4, %v3262_v25  ;;  %5744 = vmatpush1.bf16.msra.mxu1 %v5743_v63  ;;  %v3268_v5 = vsub.f32 %v11244_v51, %v8712_v40 }
 0x475   :  { %v5791_v58 = vpack.c.bf16 %v3814_v37, %v3800_v23  ;;  %v3571_v30 = vmul.f32 %v8608_v22, %v3411_v0  ;;  %v3717_v41 = vadd.f32 %v8610_v1, %v3557_v18  ;;  %v3404_v44 = vmul.f32 %v8849_v8, %v3276_v50  ;;  %v11247_v37 = vld [vmem:[#allocation61_spill] sm:$0xff]  ;;  %v11248_v50 = vld [vmem:[#allocation107_spill] sm:$0xff] }
 0x476   :  { %v3837_v12 = vmax.f32 %v3725_v42, 0.0  ;;  %v3550_v31 = vmul.f32 %v8604_v53, %v3390_v10  ;;  %v3282_v49 = vsub.f32 %v11245_v27, %v8738_v60  ;;  %v3396_v20 = vmul.f32 %v8823_v4, %v3268_v5 }
 0x477   :  { %5792 = vmatpush1.bf16.msra.mxu0 %v5791_v58  ;;  %v3731_v17 = vadd.f32 %v8612_v61, %v3571_v30  ;;  %v3829_v14 = vmax.f32 %v3717_v41, 0.0  ;;  %v3291_v57 = vsub.f32 %v11246_v6, %v8768_v13  ;;  %v3564_v26 = vmul.f32 %v8608_v22, %v3404_v44  ;;  %v11249_v44 = vld [vmem:[#allocation109_spill] sm:$0xff] }
 0x478   :  { %v5745_v23 = vpack.c.bf16 %v3837_v12, %v3823_v55  ;;  %v3710_v2 = vadd.f32 %v8610_v1, %v3550_v31  ;;  %v3410_v43 = vmul.f32 %v8849_v8, %v3282_v49  ;;  %v3556_v63 = vmul.f32 %v8604_v53, %v3396_v20  ;;  %v11250_v20 = vld [vmem:[#allocation92_spill] sm:$0xff] }
 0x479   :  { %v3843_v25 = vmax.f32 %v3731_v17, 0.0  ;;  %v3305_v0 = vsub.f32 %v11247_v37, %v8792_v21  ;;  %v3419_v18 = vmul.f32 %v8870_v46, %v3291_v57  ;;  %v3724_v42 = vadd.f32 %v8612_v61, %v3564_v26 }
 0x47a   :  { %5746 = vmatprep.subr.bf16.mxu1 %v5745_v23  ;;  %v3822_v19 = vmax.f32 %v3710_v2, 0.0  ;;  %v3570_v55 = vmul.f32 %v8608_v22, %v3410_v43  ;;  %v3297_v10 = vsub.f32 %v11248_v50, %v8768_v13  ;;  %v3716_v30 = vadd.f32 %v8610_v1, %v3556_v63  ;;  %v11251_v63 = vld [vmem:[#allocation79_spill] sm:$0xff] }
 0x47b   :  { %v5793_v58 = vpack.c.bf16 %v3843_v25, %v3829_v14  ;;  %v3433_v41 = vmul.f32 %v8894_v62, %v3305_v0  ;;  %v3579_v51 = vmul.f32 %v8614_v16, %v3419_v18  ;;  %v3836_v5 = vmax.f32 %v3724_v42, 0.0 }
 0x47c   :  { %v3730_v12 = vadd.f32 %v8612_v61, %v3570_v55  ;;  %v3311_v31 = vsub.f32 %v11249_v44, %v8792_v21  ;;  %v3425_v27 = vmul.f32 %v8870_v46, %v3297_v10  ;;  %v3828_v49 = vmax.f32 %v3716_v30, 0.0 }
 0x47d   :  { %5794 = vmatprep.subr.bf16.mxu0 %v5793_v58  ;;  %v3593_v17 = vmul.f32 %v8616_v15, %v3433_v41  ;;  %v3739_v14 = vadd.f32 %v8923_v36, %v3579_v51  ;;  %v3290_v6 = vsub.f32 %v11250_v20, %v8768_v13  ;;  %v5747_v57 = vpack.c.bf16 %v3836_v5, %v3822_v19  ;;  %v11252_v19 = vld [vmem:[#allocation105_spill] sm:$0xff]  ;;  %v11253_v41 = vld [vmem:[#allocation108_spill] sm:$0xff] }
 0x47e   :  { %v3842_v23 = vmax.f32 %v3730_v12, 0.0  ;;  %v3439_v26 = vmul.f32 %v8894_v62, %v3311_v31  ;;  %v3585_v2 = vmul.f32 %v8614_v16, %v3425_v27  ;;  %v3304_v37 = vsub.f32 %v11251_v63, %v8792_v21  ;;  %v11254_v31 = vld [vmem:[#allocation52_spill] sm:$0xff] }
 0x47f   :  { %v3753_v43 = vadd.f32 %v8931_v32, %v3593_v17  ;;  %v3851_v25 = vmax.f32 %v3739_v14, 0.0  ;;  %v3418_v0 = vmul.f32 %v8870_v46, %v3290_v6  ;;  %5748 = vmatpush1.bf16.msra.mxu1 %v5747_v57  ;;  %v3296_v50 = vsub.f32 %v11252_v19, %v8768_v13 }
 0x480   :  { %v5795_v18 = vpack.c.bf16 %v3842_v23, %v3828_v49  ;;  %v3599_v42 = vmul.f32 %v8616_v15, %v3439_v26  ;;  %v3745_v55 = vadd.f32 %v8923_v36, %v3585_v2  ;;  %v3432_v58 = vmul.f32 %v8894_v62, %v3304_v37  ;;  %v11255_v23 = vld [vmem:[#allocation13_spill] sm:$0xff] }
 0x481   :  { %v3865_v10 = vmax.f32 %v3753_v43, 0.0  ;;  %v3578_v30 = vmul.f32 %v8614_v16, %v3418_v0  ;;  %v3310_v51 = vsub.f32 %v11253_v41, %v8792_v21  ;;  %v3424_v44 = vmul.f32 %v8870_v46, %v3296_v50  ;;  %v11257_v0 = vld [vmem:[#allocation46_spill] sm:$0xff] }
 0x482   :  { %5796 = vmatpush1.bf16.msra.mxu0 %v5795_v18  ;;  %v3759_v5 = vadd.f32 %v8931_v32, %v3599_v42  ;;  %v3857_v12 = vmax.f32 %v3745_v55, 0.0  ;;  %v3225_v27 = vsub.f32 %v11254_v31, %v8636_v7  ;;  %v3592_v17 = vmul.f32 %v8616_v15, %v3432_v58 }
 0x483   :  { %v5749_v49 = vpack.c.bf16 %v3865_v10, %v3851_v25  ;;  %v3738_v14 = vadd.f32 %v8923_v36, %v3578_v30  ;;  %v3438_v20 = vmul.f32 %v8894_v62, %v3310_v51  ;;  %v3584_v57 = vmul.f32 %v8614_v16, %v3424_v44  ;;  %v11258_v30 = vld [vmem:[#allocation43_spill] sm:$0xff] }
 0x484   :  { %v3871_v6 = vmax.f32 %v3759_v5, 0.0  ;;  %v11256_v26 = vsub.f32 %v11255_v23, %v8618_v45  ;;  %v3353_v43 = vmul.f32 %v8766_v48, %v3225_v27  ;;  %v3752_v63 = vadd.f32 %v8931_v32, %v3592_v17 }
 0x485   :  { %5750 = vmatprep.subr.bf16.mxu1 %v5749_v49  ;;  %v3850_v25 = vmax.f32 %v3738_v14, 0.0  ;;  %v3598_v37 = vmul.f32 %v8616_v15, %v3438_v20  ;;  %v3210_v18 = vsub.f32 %v11257_v0, %v8618_v45  ;;  %v3744_v55 = vadd.f32 %v8923_v36, %v3584_v57 }
 0x486   :  { %v3339_v2 = vmul.f32 %v8736_v47, %v11256_v26  ;;  %v5797_v42 = vpack.c.bf16 %v3871_v6, %v3857_v12  ;;  %v3513_v50 = vmul.f32 %v8606_v56, %v3353_v43  ;;  %v3864_v10 = vmax.f32 %v3752_v63, 0.0  ;;  %v11259_v12 = vld [vmem:[#allocation35_spill] sm:$0xff] }
 0x487   :  { %v3758_v58 = vadd.f32 %v8931_v32, %v3598_v37  ;;  %v3224_v41 = vsub.f32 %v11258_v30, %v8636_v7  ;;  %v3338_v51 = vmul.f32 %v8736_v47, %v3210_v18  ;;  %v3856_v5 = vmax.f32 %v3744_v55, 0.0  ;;  %v11260_v7 = vld [vmem:[#allocation66_spill] sm:$0xff]  ;;  %v11261_v43 = vld [vmem:[#allocation59_spill] sm:$0xff]  ;;  %v11262_v37 = vld [vmem:[#allocation64_spill] sm:$0xff] }
 0x488   :  { %v3499_v19 = vmul.f32 %v11163_v29, %v3339_v2  ;;  %5798 = vmatprep.subr.bf16.mxu0 %v5797_v42  ;;  %v3673_v45 = vadd.f32 %v8594_v59, %v3513_v50  ;;  %v3239_v31 = vsub.f32 %v11259_v12, %v8664_v39  ;;  %v5751_v27 = vpack.c.bf16 %v3864_v10, %v3850_v25 }
 0x489   :  { %v3870_v49 = vmax.f32 %v3758_v58, 0.0  ;;  %v3352_v17 = vmul.f32 %v8766_v48, %v3224_v41  ;;  %v3498_v14 = vmul.f32 %v11163_v29, %v3338_v51  ;;  %v3253_v47 = vsub.f32 %v11260_v7, %v8688_v11 }
 0x48a   :  { %v3659_v44 = vadd.f32 %v8592_v33, %v3499_v19  ;;  %v3785_v6 = vmax.f32 %v3673_v45, 0.0  ;;  %v3367_v57 = vmul.f32 %v8790_v54, %v3239_v31  ;;  %5752 = vmatpush1.bf16.msra.mxu1 %v5751_v27  ;;  %v3238_v63 = vsub.f32 %v11261_v43, %v8664_v39 }
 0x48b   :  { %v5799_v23 = vpack.c.bf16 %v3870_v49, %v3856_v5  ;;  %v3512_v26 = vmul.f32 %v8606_v56, %v3352_v17  ;;  %v3658_v2 = vadd.f32 %v8592_v33, %v3498_v14  ;;  %v3381_v48 = vmul.f32 %v8806_v38, %v3253_v47  ;;  %v11263_v56 = vld [vmem:[#allocation24_spill] sm:$0xff]  ;;  %v11265_v5 = vld [vmem:[#allocation73_spill] sm:$0xff] }
 0x48c   :  { %v3771_v20 = vmax.f32 %v3659_v44, 0.0  ;;  %v3527_v29 = vmul.f32 %v8596_v24, %v3367_v57  ;;  %v3252_v0 = vsub.f32 %v11262_v37, %v8688_v11  ;;  %v3366_v42 = vmul.f32 %v8790_v54, %v3238_v63 }
 0x48d   :  { %5800 = vmatpush1.bf16.msra.mxu0 %v5799_v23  ;;  %v3672_v18 = vadd.f32 %v8594_v59, %v3512_v26  ;;  %v3267_v55 = vsub.f32 %v11263_v56, %v8712_v40  ;;  %5540 = vmatmul.mubr.msk.f32.vlgmr.msra.gmra.mrb[66].mxu1 %vm3874_vm1, %v8992_v52  ;;  %v3770_v39 = vmax.f32 %v3658_v2, 0.0  ;;  %v3541_v33 = vmul.f32 %v8598_v9, %v3381_v48  ;;  %v11264_v59 = vld [vmem:[#allocation98_spill] sm:$0xff] }
 0x48e   :  { %v5769_v25 = vpack.c.bf16 %v3785_v6, %v3771_v20  ;;  %v3687_v19 = vadd.f32 %v8600_v35, %v3527_v29  ;;  %v3380_v50 = vmul.f32 %v8806_v38, %v3252_v0  ;;  %v3526_v10 = vmul.f32 %v8596_v24, %v3366_v42  ;;  %4182 = vmatprep.mubr.f32.mxu1 %v11182_v3  ;;  %v11267_v20 = vld [vmem:[#allocation102_spill] sm:$0xff]  ;;  %v11270_v0 = vld [vmem:[#allocation104_spill] sm:$0xff] }
 0x48f   :  { %v3784_v11 = vmax.f32 %v3672_v18, 0.0  ;;  %v3281_v54 = vsub.f32 %v11264_v59, %v8738_v60  ;;  %v3395_v58 = vmul.f32 %v8823_v4, %v3267_v55  ;;  %v3701_v30 = vadd.f32 %v8602_v34, %v3541_v33  ;;  %v11268_v23 = vld [vmem:[#allocation106_spill] sm:$0xff] }
 0x490   :  { %5770 = vmatprep.subr.bf16.mxu1 %v5769_v25  ;;  %v3799_v41 = vmax.f32 %v3687_v19, 0.0  ;;  %v3540_v51 = vmul.f32 %v8598_v9, %v3380_v50  ;;  %v3266_v44 = vsub.f32 %v11265_v5, %v8712_v40  ;;  %5546 = vmatmul.mubr.msk.f32.vlgmr.msra.gmra.mrb[78].mxu0 %vm3874_vm1, %v8992_v52  ;;  %v3686_v24 = vadd.f32 %v8600_v35, %v3526_v10  ;;  %v11266_v9 = vld [vmem:[#allocation26_spill] sm:$0xff] }
 0x491   :  { %v5771_v38 = vpack.c.bf16 %v3784_v11, %v3770_v39  ;;  %v3409_v45 = vmul.f32 %v8849_v8, %v3281_v54  ;;  %v3555_v12 = vmul.f32 %v8604_v53, %v3395_v58  ;;  %4413 = vmatprep.mubr.f32.mxu0 %v11182_v3  ;;  %v3813_v31 = vmax.f32 %v3701_v30, 0.0  ;;  %5541 = vmatmul.mubr.msk.f32.gmra.mrb[68].mxu1 %vm3874_vm1, %v9028_v28 }
 0x492   :  { %v3700_v27 = vadd.f32 %v8602_v34, %v3540_v51  ;;  %v3280_v49 = vsub.f32 %v11266_v9, %v8738_v60  ;;  %v3394_v40 = vmul.f32 %v8823_v4, %v3266_v44  ;;  %v3798_v17 = vmax.f32 %v3686_v24, 0.0  ;;  %4330 = vmatprep.mubr.f32.mxu1 %v11182_v3 }
 0x493   :  { %5772 = vmatpush1.bf16.msra.mxu1 %v5771_v38  ;;  %v3569_v35 = vmul.f32 %v8608_v22, %v3409_v45  ;;  %v3715_v14 = vadd.f32 %v8610_v1, %v3555_v12  ;;  %v3295_v6 = vsub.f32 %v11267_v20, %v8768_v13  ;;  %v5773_v34 = vpack.c.bf16 %v3813_v31, %v3799_v41 }
 0x494   :  { %v3812_v7 = vmax.f32 %v3700_v27, 0.0  ;;  %v3408_v60 = vmul.f32 %v8849_v8, %v3280_v49  ;;  %v3554_v4 = vmul.f32 %v8604_v53, %v3394_v40  ;;  %5547 = vmatmul.mubr.msk.f32.gmra.mrb[80].mxu0 %vm3874_vm1, %v9028_v28  ;;  %v3309_v26 = vsub.f32 %v11268_v23, %v8792_v21  ;;  %v11269_v8 = vld [vmem:[#allocation100_spill] sm:$0xff] }
 0x495   :  { %v3729_v47 = vadd.f32 %v8612_v61, %v3569_v35  ;;  %v3827_v57 = vmax.f32 %v3715_v14, 0.0  ;;  %v3423_v2 = vmul.f32 %v8870_v46, %v3295_v6  ;;  %5774 = vmatprep.subr.bf16.mxu1 %v5773_v34  ;;  %v3294_v53 = vsub.f32 %v11269_v8, %v8768_v13 }
 0x496   :  { %v5775_v43 = vpack.c.bf16 %v3812_v7, %v3798_v17  ;;  %v3568_v63 = vmul.f32 %v8608_v22, %v3408_v60  ;;  %v3714_v25 = vadd.f32 %v8610_v1, %v3554_v4  ;;  %v3437_v29 = vmul.f32 %v8894_v62, %v3309_v26 }
 0x497   :  { %v3841_v48 = vmax.f32 %v3729_v47, 0.0  ;;  %v3583_v37 = vmul.f32 %v8614_v16, %v3423_v2  ;;  %v3308_v18 = vsub.f32 %v11270_v0, %v8792_v21  ;;  %v3422_v56 = vmul.f32 %v8870_v46, %v3294_v53 }
 0x498   :  { %5776 = vmatpush1.bf16.msra.mxu1 %v5775_v43  ;;  %v3728_v42 = vadd.f32 %v8612_v61, %v3568_v63  ;;  %v3597_v22 = vmul.f32 %v8616_v15, %v3437_v29  ;;  %v3826_v39 = vmax.f32 %v3714_v25, 0.0 }
 0x499   :  { %v5777_v55 = vpack.c.bf16 %v3841_v48, %v3827_v57  ;;  %v3743_v1 = vadd.f32 %v8923_v36, %v3583_v37  ;;  %v3436_v13 = vmul.f32 %v8894_v62, %v3308_v18  ;;  %v3582_v19 = vmul.f32 %v8614_v16, %v3422_v56 }
 0x49a   :  { %v3840_v33 = vmax.f32 %v3728_v42, 0.0  ;;  %v3757_v50 = vadd.f32 %v8931_v32, %v3597_v22 }
 0x49b   :  { %5778 = vmatprep.subr.bf16.mxu1 %v5777_v55  ;;  %v3596_v21 = vmul.f32 %v8616_v15, %v3436_v13  ;;  %v3742_v61 = vadd.f32 %v8923_v36, %v3582_v19  ;;  %v3855_v46 = vmax.f32 %v3743_v1, 0.0 }
 0x49c   :  { %v5779_v11 = vpack.c.bf16 %v3840_v33, %v3826_v39  ;;  %v3869_v10 = vmax.f32 %v3757_v50, 0.0 }
 0x49d   :  { %v3756_v59 = vadd.f32 %v8931_v32, %v3596_v21  ;;  %v3854_v58 = vmax.f32 %v3742_v61, 0.0 }
 0x49e   :  { %5780 = vmatpush1.bf16.msra.mxu1 %v5779_v11  ;;  %v5781_v54 = vpack.c.bf16 %v3869_v10, %v3855_v46 }
 0x49f   :  { %v3868_v62 = vmax.f32 %v3756_v59, 0.0 }
 0x4a0   :  { %5782 = vmatprep.subr.bf16.mxu1 %v5781_v54 }
 0x4a1   :  { %v5783_v30 = vpack.c.bf16 %v3868_v62, %v3854_v58 }
 0x4a3   :  { %5784 = vmatpush1.bf16.msra.mxu1 %v5783_v30 }
 0x4a6   :  { %5544 = vmatmul.mubr.msk.f32.vlgmr.msra.gmra.mrb[70].mxu1 %vm3874_vm1, %v8992_v52 }
 0x4a7   :  { %4336 = vmatprep.mubr.f32.mxu1 %v11182_v3 }
 0x4aa   :  { %5545 = vmatmul.mubr.msk.f32.gmra.mrb[72].mxu1 %vm3874_vm1, %v9028_v28 }
 0x508   :  { %v9436_v16 = vpop.f32.mrb[58].mxu1 }
 0x509   :  { %4420 = vrot.lane.b32.xlu0 %v9436_v16, %s5939_s2  ;;  %v9440_v15 = vpop.f32.mrb[59].mxu1  ;;  %v4504_v41 = vrot.slane %v9436_v16, 1  ;;  %v4623_v24 = vrot.slane %v9436_v16, 2  ;;  %v4735_v27 = vrot.slane %v9436_v16, 3  ;;  %v4917_v17 = vrot.slane %v9436_v16, 5 }
 0x50a   :  { %4422 = vrot.lane.b32.xlu1 %v9440_v15, %s5939_s2  ;;  %v4505_v5 = vrot.slane %v9440_v15, 1  ;;  %v4624_v45 = vrot.slane %v9440_v15, 2  ;;  %v4736_v9 = vrot.slane %v9440_v15, 3  ;;  %v4918_v35 = vrot.slane %v9440_v15, 5 }
 0x50b   :  { %v9444_v36 = vpop.f32.mrb[70].mxu0  ;;  %v5029_v6 = vrot.slane %v9436_v16, 6  ;;  %v5030_v7 = vrot.slane %v9440_v15, 6  ;;  %v5141_v43 = vrot.slane %v9436_v16, 7  ;;  %v5142_v63 = vrot.slane %v9440_v15, 7 }
 0x50c   :  { %v9446_v32 = vpop.f32.mrb[71].mxu0  ;;  %v4508_v44 = vrot.slane %v9444_v36, 1  ;;  %v4627_v12 = vrot.slane %v9444_v36, 2  ;;  %v4739_v49 = vrot.slane %v9444_v36, 3  ;;  %v4921_v14 = vrot.slane %v9444_v36, 5 }
 0x50d   :  { %4428 = vrot.lane.b32.xlu0 %v9444_v36, %s5939_s2  ;;  %v4509_v38 = vrot.slane %v9446_v32, 1  ;;  %v4628_v31 = vrot.slane %v9446_v32, 2  ;;  %v4740_v40 = vrot.slane %v9446_v32, 3  ;;  %v4922_v20 = vrot.slane %v9446_v32, 5 }
 0x50e   :  { %v3953_v52 = vpop.f32.mrb[60].mxu1  ;;  %4430 = vrot.lane.b32.xlu1 %v9446_v32, %s5939_s2  ;;  %v5033_v47 = vrot.slane %v9444_v36, 6  ;;  %v5034_v23 = vrot.slane %v9446_v32, 6  ;;  %v5145_v53 = vrot.slane %v9444_v36, 7  ;;  %v5146_v48 = vrot.slane %v9446_v32, 7 }
 0x50f   :  { %v3955_v3 = vpop.f32.mrb[61].mxu1 }
 0x510   :  { %v4107_v28 = vpop.f32.mrb[72].mxu0 }
 0x511   :  { %v4109_v51 = vpop.f32.mrb[73].mxu0  ;;  %4532 = vrot.lane.b32.xlu0 %v4504_v41, %s5937_s21 }
 0x512   :  { %4534 = vrot.lane.b32.xlu1 %v4505_v5, %s5937_s21 }
 0x515   :  { %4540 = vrot.lane.b32.xlu0 %v4508_v44, %s5937_s21 }
 0x516   :  { %4542 = vrot.lane.b32.xlu1 %v4509_v38, %s5937_s21 }
 0x519   :  { %4651 = vrot.lane.b32.xlu0 %v4623_v24, %s5936_s4 }
 0x51a   :  { %4653 = vrot.lane.b32.xlu1 %v4624_v45, %s5936_s4 }
 0x51d   :  { %4659 = vrot.lane.b32.xlu0 %v4627_v12, %s5936_s4 }
 0x51e   :  { %4661 = vrot.lane.b32.xlu1 %v4628_v31, %s5936_s4 }
 0x521   :  { %4763 = vrot.lane.b32.xlu0 %v4735_v27, %s5940_s24 }
 0x522   :  { %4765 = vrot.lane.b32.xlu1 %v4736_v9, %s5940_s24 }
 0x525   :  { %4771 = vrot.lane.b32.xlu0 %v4739_v49, %s5940_s24 }
 0x526   :  { %4773 = vrot.lane.b32.xlu1 %v4740_v40, %s5940_s24 }
 0x529   :  { %4945 = vrot.lane.b32.xlu0 %v4917_v17, %s5938_s23 }
 0x52a   :  { %4947 = vrot.lane.b32.xlu1 %v4918_v35, %s5938_s23 }
 0x52d   :  { %4953 = vrot.lane.b32.xlu0 %v4921_v14, %s5938_s23 }
 0x52e   :  { %4955 = vrot.lane.b32.xlu1 %v4922_v20, %s5938_s23 }
 0x531   :  { %5057 = vrot.lane.b32.xlu0 %v5029_v6, %s5942_s16 }
 0x532   :  { %5059 = vrot.lane.b32.xlu1 %v5030_v7, %s5942_s16 }
 0x534   :  { %v9485_v34 = vpop.f32.mrb[62].mxu1 }
 0x535   :  { %v9488_v60 = vpop.f32.mrb[63].mxu1  ;;  %5065 = vrot.lane.b32.xlu0 %v5033_v47, %s5942_s16  ;;  %v4506_v29 = vrot.slane %v9485_v34, 1  ;;  %v4625_v42 = vrot.slane %v9485_v34, 2  ;;  %v4737_v21 = vrot.slane %v9485_v34, 3  ;;  %v4919_v10 = vrot.slane %v9485_v34, 5 }
 0x536   :  { %5067 = vrot.lane.b32.xlu1 %v5034_v23, %s5942_s16  ;;  %v4507_v37 = vrot.slane %v9488_v60, 1  ;;  %v4626_v56 = vrot.slane %v9488_v60, 2  ;;  %v4738_v11 = vrot.slane %v9488_v60, 3  ;;  %v4920_v54 = vrot.slane %v9488_v60, 5 }
 0x537   :  { %v5143_v24 = vrot.slane %v9485_v34, 7  ;;  %v5144_v45 = vrot.slane %v9488_v60, 7 }
 0x538   :  { %v9492_v4 = vpop.f32.mrb[74].mxu0 }
 0x539   :  { %v9495_v57 = vpop.f32.mrb[75].mxu0  ;;  %v9498_v26 = vpop.f32.mrb[64].mxu1  ;;  %5169 = vrot.lane.b32.xlu0 %v5141_v43, %s5941_s15  ;;  %v4512_v0 = vrot.slane %v9492_v4, 1  ;;  %v4631_v1 = vrot.slane %v9492_v4, 2  ;;  %v4743_v61 = vrot.slane %v9492_v4, 3  ;;  %v4925_v62 = vrot.slane %v9492_v4, 5 }
 0x53a   :  { %v9501_v2 = vpop.f32.mrb[65].mxu1  ;;  %5171 = vrot.lane.b32.xlu1 %v5142_v63, %s5941_s15  ;;  %v4513_v18 = vrot.slane %v9495_v57, 1  ;;  %v4632_v39 = vrot.slane %v9495_v57, 2  ;;  %v4744_v46 = vrot.slane %v9495_v57, 3  ;;  %v4926_v30 = vrot.slane %v9495_v57, 5  ;;  %v9644_v43 = vld [vmem:[#allocation3 + $0x28] sm:$0xff] }
 0x53b   :  { %v5038_v5 = vrot.slane %v9495_v57, 6  ;;  %v5149_v31 = vrot.slane %v9492_v4, 7  ;;  %v5150_v9 = vrot.slane %v9495_v57, 7  ;;  %11278 = vst [vmem:[#allocation44_spill] sm:$0xff] %v9644_v43  ;;  %v10772_v63 = vrot.slane %v9644_v43, 1 }
 0x53c   :  { %v9506_v25 = vpop.f32.mrb[76].mxu0 }
 0x53d   :  { %v9509_v8 = vpop.f32.mrb[77].mxu0  ;;  %5177 = vrot.lane.b32.xlu0 %v5145_v53, %s5941_s15 }
 0x53e   :  { %5179 = vrot.lane.b32.xlu1 %v5146_v48, %s5941_s15 }
 0x541   :  { %5253 = vrot.lane.b32.xlu0 %v3953_v52, %s5943_s25  ;;  %v5031_v52 = vrot.slane %v9485_v34, 6 }
 0x542   :  { %5255 = vrot.lane.b32.xlu1 %v3955_v3, %s5943_s25  ;;  %v5032_v3 = vrot.slane %v9488_v60, 6 }
 0x545   :  { %5261 = vrot.lane.b32.xlu0 %v4107_v28, %s5943_s25 }
 0x546   :  { %5263 = vrot.lane.b32.xlu1 %v4109_v51, %s5943_s25  ;;  %v5037_v51 = vrot.slane %v9492_v4, 6 }
 0x549   :  { %4424 = vrot.lane.b32.xlu0 %v9485_v34, %s5939_s2 }
 0x54a   :  { %4426 = vrot.lane.b32.xlu1 %v9488_v60, %s5939_s2 }
 0x54d   :  { %4436 = vrot.lane.b32.xlu0 %v9492_v4, %s5939_s2 }
 0x54e   :  { %4438 = vrot.lane.b32.xlu1 %v9495_v57, %s5939_s2 }
 0x551   :  { %4536 = vrot.lane.b32.xlu0 %v4506_v29, %s5937_s21 }
 0x552   :  { %4538 = vrot.lane.b32.xlu1 %v4507_v37, %s5937_s21 }
 0x555   :  { %4548 = vrot.lane.b32.xlu0 %v4512_v0, %s5937_s21  ;;  %v10771_v0 = vrot.slane %v9644_v43, 2 }
 0x556   :  { %4550 = vrot.lane.b32.xlu1 %v4513_v18, %s5937_s21 }
 0x559   :  { %4655 = vrot.lane.b32.xlu0 %v4625_v42, %s5936_s4 }
 0x55a   :  { %4657 = vrot.lane.b32.xlu1 %v4626_v56, %s5936_s4 }
 0x55d   :  { %4667 = vrot.lane.b32.xlu0 %v4631_v1, %s5936_s4 }
 0x55e   :  { %4669 = vrot.lane.b32.xlu1 %v4632_v39, %s5936_s4  ;;  %v10770_v39 = vrot.slane %v9644_v43, 3 }
 0x560   :  { %v9539_v55 = vpop.f32.mrb[66].mxu1 }
 0x561   :  { %11271 = vst [vmem:[#allocation23_spill] sm:$0xff] %v9539_v55  ;;  %v9542_v22 = vpop.f32.mrb[67].mxu1  ;;  %4767 = vrot.lane.b32.xlu0 %v4737_v21, %s5940_s24  ;;  %v4510_v23 = vrot.slane %v9539_v55, 1  ;;  %v4629_v21 = vrot.slane %v9539_v55, 2 }
 0x562   :  { %4769 = vrot.lane.b32.xlu1 %v4738_v11, %s5940_s24 }
 0x563   :  { %v9545_v13 = vpop.f32.mrb[78].mxu0 }
 0x564   :  { %11272 = vst [vmem:[#allocation83_spill] sm:$0xff] %v9545_v13  ;;  %v9548_v33 = vpop.f32.mrb[79].mxu0  ;;  %v9551_v19 = vpop.f32.mrb[68].mxu1 }
 0x565   :  { %v9554_v50 = vpop.f32.mrb[69].mxu1  ;;  %4779 = vrot.lane.b32.xlu0 %v4743_v61, %s5940_s24  ;;  %v4517_v37 = vrot.slane %v9548_v33, 1  ;;  %v4630_v61 = vrot.slane %v9542_v22, 2 }
 0x566   :  { %4781 = vrot.lane.b32.xlu1 %v4744_v46, %s5940_s24 }
 0x567   :  { %v9565_v59 = vpop.f32.mrb[80].mxu0 }
 0x568   :  { %v9568_v58 = vpop.f32.mrb[81].mxu0 }
 0x569   :  { %4949 = vrot.lane.b32.xlu0 %v4919_v10, %s5938_s23 }
 0x56a   :  { %4951 = vrot.lane.b32.xlu1 %v4920_v54, %s5938_s23 }
 0x56d   :  { %4961 = vrot.lane.b32.xlu0 %v4925_v62, %s5938_s23 }
 0x56e   :  { %4963 = vrot.lane.b32.xlu1 %v4926_v30, %s5938_s23 }
 0x571   :  { %5061 = vrot.lane.b32.xlu0 %v5031_v52, %s5942_s16 }
 0x572   :  { %5063 = vrot.lane.b32.xlu1 %v5032_v3, %s5942_s16  ;;  %v4635_v3 = vrot.slane %v9545_v13, 2 }
 0x575   :  { %5073 = vrot.lane.b32.xlu0 %v5037_v51, %s5942_s16 }
 0x576   :  { %5075 = vrot.lane.b32.xlu1 %v5038_v5, %s5942_s16  ;;  %v4636_v5 = vrot.slane %v9548_v33, 2 }
 0x579   :  { %v9579_v28 = vpop.f32.mrb[70].mxu1  ;;  %5173 = vrot.lane.b32.xlu0 %v5143_v24, %s5941_s15 }
 0x57a   :  { %11273 = vst [vmem:[#allocation34_spill] sm:$0xff] %v9579_v28  ;;  %v9582_v41 = vpop.f32.mrb[71].mxu1  ;;  %5175 = vrot.lane.b32.xlu1 %v5144_v45, %s5941_s15  ;;  %v4852_v45 = vmul.f32 %v9644_v43, %v9446_v32  ;;  %v4747_v32 = vrot.slane %v9545_v13, 3 }
 0x57b   :  { %11274 = vst [vmem:[#allocation62_spill] sm:$0xff] %v9582_v41  ;;  %v9596_v12 = vpop.permute.xlu0 %4420 }
 0x57c   :  { %v9599_v27 = vpop.permute.xlu1 %4422 }
 0x57d   :  { %v9587_v44 = vpop.f32.mrb[72].mxu1  ;;  %5185 = vrot.lane.b32.xlu0 %v5149_v31, %s5941_s15 }
 0x57e   :  { %v9590_v38 = vpop.f32.mrb[73].mxu1  ;;  %5187 = vrot.lane.b32.xlu1 %v5150_v9, %s5941_s15 }
 0x57f   :  { %v9604_v49 = vpop.permute.xlu0 %4428 }
 0x580   :  { %v9606_v40 = vpop.permute.xlu1 %4430 }
 0x581   :  { %11275 = vst [vmem:[#allocation50_spill] sm:$0xff] %v9606_v40  ;;  %5257 = vrot.lane.b32.xlu0 %v9498_v26, %s5943_s25  ;;  %v4456_v18 = vsel %vm918_vm6, %v9604_v49, %v9606_v40 }
 0x582   :  { %5259 = vrot.lane.b32.xlu1 %v9501_v2, %s5943_s25  ;;  %v4511_v2 = vrot.slane %v9542_v22, 1  ;;  %v4467_v46 = vmul.f32 %v9644_v43, %v4456_v18 }
 0x583   :  { %v9612_v17 = vpop.permute.xlu0 %4532 }
 0x584   :  { %v9614_v35 = vpop.permute.xlu1 %4534 }
 0x585   :  { %5269 = vrot.lane.b32.xlu0 %v9506_v25, %s5943_s25 }
 0x586   :  { %5271 = vrot.lane.b32.xlu1 %v9509_v8, %s5943_s25  ;;  %v4516_v8 = vrot.slane %v9545_v13, 1 }
 0x587   :  { %v9620_v14 = vpop.permute.xlu0 %4540 }
 0x588   :  { %v9622_v20 = vpop.permute.xlu1 %4542 }
 0x589   :  { %11276 = vst [vmem:[#allocation87_spill] sm:$0xff] %v9622_v20  ;;  %4432 = vrot.lane.b32.xlu0 %v9539_v55, %s5939_s2  ;;  %v4568_v48 = vsel %vm1003_vm7, %v9620_v14, %v9622_v20 }
 0x58a   :  { %4434 = vrot.lane.b32.xlu1 %v9542_v22, %s5939_s2  ;;  %v4600_v56 = vmul.f32 %v10772_v63, %v4568_v48  ;;  %v4880_v48 = vrot.slane %v4852_v45, 4 }
 0x58b   :  { %v9628_v6 = vpop.permute.xlu0 %4651 }
 0x58c   :  { %v9630_v7 = vpop.permute.xlu1 %4653  ;;  %v4614_v62 = vadd.f32 %v4600_v56, %v4467_v46  ;;  %v4748_v56 = vrot.slane %v9548_v33, 3 }
 0x58d   :  { %4444 = vrot.lane.b32.xlu0 %v9545_v13, %s5939_s2 }
 0x58e   :  { %4446 = vrot.lane.b32.xlu1 %v9548_v33, %s5939_s2 }
 0x58f   :  { %v9636_v47 = vpop.permute.xlu0 %4659 }
 0x590   :  { %v9639_v26 = vpop.permute.xlu1 %4661 }
 0x591   :  { %11277 = vst [vmem:[#allocation19_spill] sm:$0xff] %v9639_v26  ;;  %4544 = vrot.lane.b32.xlu0 %v4510_v23, %s5937_s21  ;;  %v4687_v42 = vsel %vm1088_vm8, %v9636_v47, %v9639_v26  ;;  %v4741_v23 = vrot.slane %v9539_v55, 3 }
 0x592   :  { %4546 = vrot.lane.b32.xlu1 %v4511_v2, %s5937_s21  ;;  %v4712_v10 = vmul.f32 %v10771_v0, %v4687_v42 }
 0x593   :  { %v9647_v25 = vpop.permute.xlu0 %4763 }
 0x594   :  { %11279 = vst [vmem:[#allocation22_spill] sm:$0xff] %v9647_v25  ;;  %v9654_v29 = vpop.permute.xlu1 %4765  ;;  %v4726_v24 = vadd.f32 %v4712_v10, %v4614_v62  ;;  %v4924_v10 = vrot.slane %v9542_v22, 5  ;;  %v4929_v62 = vrot.slane %v9545_v13, 5 }
 0x595   :  { %4556 = vrot.lane.b32.xlu0 %v4516_v8, %s5937_s21  ;;  %v4742_v8 = vrot.slane %v9542_v22, 3 }
 0x596   :  { %4558 = vrot.lane.b32.xlu1 %v4517_v37, %s5937_s21 }
 0x597   :  { %v9670_v1 = vpop.permute.xlu0 %4771 }
 0x598   :  { %v9674_v11 = vpop.permute.xlu1 %4773 }
 0x599   :  { %11281 = vst [vmem:[#allocation47_spill] sm:$0xff] %v9674_v11  ;;  %v4799_v54 = vsel %vm1173_vm9, %v9670_v1, %v9674_v11  ;;  %4663 = vrot.lane.b32.xlu0 %v4629_v21, %s5936_s4 }
 0x59a   :  { %4665 = vrot.lane.b32.xlu1 %v4630_v61, %s5936_s4  ;;  %v4824_v30 = vmul.f32 %v10770_v39, %v4799_v54  ;;  %v4923_v61 = vrot.slane %v9539_v55, 5 }
 0x59b   :  { %v9688_v52 = vpop.permute.xlu0 %4945 }
 0x59c   :  { %v9691_v51 = vpop.permute.xlu1 %4947  ;;  %v4838_v31 = vadd.f32 %v4824_v30, %v4726_v24  ;;  %v5035_v24 = vrot.slane %v9539_v55, 6 }
 0x59d   :  { %4675 = vrot.lane.b32.xlu0 %v4635_v3, %s5936_s4  ;;  %v4930_v3 = vrot.slane %v9548_v33, 5 }
 0x59e   :  { %4677 = vrot.lane.b32.xlu1 %v4636_v5, %s5936_s4  ;;  %v9709_v18 = vadd.f32 %v4880_v48, %v4838_v31  ;;  %v5036_v31 = vrot.slane %v9542_v22, 6 }
 0x59f   :  { %v9698_v9 = vpop.permute.xlu0 %4953 }
 0x5a0   :  { %v9701_v2 = vpop.permute.xlu1 %4955  ;;  %11283 = vst [vmem:[#allocation30_spill] sm:$0xff] %v9709_v18 }
 0x5a1   :  { %4775 = vrot.lane.b32.xlu0 %v4741_v23, %s5940_s24 }
 0x5a2   :  { %4777 = vrot.lane.b32.xlu1 %v4742_v8, %s5940_s24  ;;  %v5041_v8 = vrot.slane %v9545_v13, 6 }
 0x5a3   :  { %v9706_v37 = vpop.permute.xlu0 %5057 }
 0x5a4   :  { %11282 = vst [vmem:[#allocation41_spill] sm:$0xff] %v9706_v37  ;;  %v9711_v42 = vpop.permute.xlu1 %5059 }
 0x5a5   :  { %4787 = vrot.lane.b32.xlu0 %v4747_v32, %s5940_s24  ;;  %v5042_v32 = vrot.slane %v9548_v33, 6 }
 0x5a6   :  { %4789 = vrot.lane.b32.xlu1 %v4748_v56, %s5940_s24 }
 0x5a7   :  { %v9716_v21 = vpop.permute.xlu0 %5065 }
 0x5a8   :  { %v9719_v46 = vpop.permute.xlu1 %5067 }
 0x5a9   :  { %4957 = vrot.lane.b32.xlu0 %v4923_v61, %s5938_s23  ;;  %v5147_v61 = vrot.slane %v9539_v55, 7  ;;  %v9785_v55 = vld [vmem:[#allocation3 + $0x8] sm:$0xff] }
 0x5aa   :  { %4959 = vrot.lane.b32.xlu1 %v4924_v10, %s5938_s23 }
 0x5ab   :  { %v9724_v54 = vpop.permute.xlu0 %5169 }
 0x5ac   :  { %11284 = vst [vmem:[#allocation60_spill] sm:$0xff] %v9724_v54  ;;  %v9727_v30 = vpop.permute.xlu1 %5171 }
 0x5ad   :  { %4969 = vrot.lane.b32.xlu0 %v4929_v62, %s5938_s23  ;;  %v5148_v62 = vrot.slane %v9542_v22, 7 }
 0x5ae   :  { %4971 = vrot.lane.b32.xlu1 %v4930_v3, %s5938_s23 }
 0x5af   :  { %v9732_v5 = vpop.permute.xlu0 %5177 }
 0x5b0   :  { %v9735_v45 = vpop.permute.xlu1 %5179 }
 0x5b1   :  { %5069 = vrot.lane.b32.xlu0 %v5035_v24, %s5942_s16  ;;  %v5153_v24 = vrot.slane %v9545_v13, 7  ;;  %v9779_v13 = vld [vmem:[#allocation3 + $0x20] sm:$0xff] }
 0x5b2   :  { %5071 = vrot.lane.b32.xlu1 %v5036_v31, %s5942_s16  ;;  %11288 = vst [vmem:[#allocation28_spill] sm:$0xff] %v9779_v13  ;;  %v9798_v26 = vmul.f32 %v9779_v13, %v9444_v36 }
 0x5b3   :  { %v9740_v23 = vpop.permute.xlu0 %5253 }
 0x5b4   :  { %11285 = vst [vmem:[#allocation67_spill] sm:$0xff] %v9740_v23  ;;  %v9743_v48 = vpop.permute.xlu1 %5255 }
 0x5b5   :  { %5081 = vrot.lane.b32.xlu0 %v5041_v8, %s5942_s16  ;;  %v5154_v8 = vrot.slane %v9548_v33, 7 }
 0x5b6   :  { %5083 = vrot.lane.b32.xlu1 %v5042_v32, %s5942_s16 }
 0x5b7   :  { %v9748_v56 = vpop.permute.xlu0 %5261 }
 0x5b8   :  { %v9751_v10 = vpop.permute.xlu1 %5263 }
 0x5b9   :  { %5181 = vrot.lane.b32.xlu0 %v5147_v61, %s5941_s15  ;;  %v9768_v61 = vld [vmem:[#allocation3 + $0x10] sm:$0xff] }
 0x5ba   :  { %5183 = vrot.lane.b32.xlu1 %v5148_v62, %s5941_s15  ;;  %11287 = vst [vmem:[#allocation42_spill] sm:$0xff] %v9768_v61  ;;  %v4583_v62 = vrot.slane %v9768_v61, 1  ;;  %v9885_v37 = vmul.f32 %v9768_v61, %v9495_v57 }
 0x5bb   :  { %v4425_v3 = vpop.permute.xlu0 %4424 }
 0x5bc   :  { %v4427_v31 = vpop.permute.xlu1 %4426  ;;  %v4459_v63 = vsel %vm918_vm6, %v9599_v27, %v4425_v3 }
 0x5bd   :  { %v4458_v32 = vsel %vm918_vm6, %v4425_v3, %v4427_v31  ;;  %5193 = vrot.lane.b32.xlu0 %v5153_v24, %s5941_s15  ;;  %v9776_v24 = vld [vmem:[#allocation3 + $0x18] sm:$0xff]  ;;  %v9789_v3 = vmul.f32 %v9785_v55, %v9440_v15 }
 0x5be   :  { %5195 = vrot.lane.b32.xlu1 %v5154_v8, %s5941_s15  ;;  %v4465_v11 = vmul.f32 %v9776_v24, %v4458_v32  ;;  %v11289_v36 = vrot.slane %v9776_v24, 1  ;;  %v4514_v32 = vrot.slane %v9579_v28, 1 }
 0x5bf   :  { %v9762_v39 = vpop.permute.xlu0 %4436 }
 0x5c0   :  { %v9764_v0 = vpop.permute.xlu1 %4438 }
 0x5c1   :  { %11286 = vst [vmem:[#allocation53_spill] sm:$0xff] %v9764_v0  ;;  %5265 = vrot.lane.b32.xlu0 %v9551_v19, %s5943_s25  ;;  %v4457_v19 = vsel %vm918_vm6, %v4427_v31, %v9604_v49  ;;  %v4464_v49 = vmul.f32 %v9768_v61, %v4459_v63  ;;  %v11290_v63 = vrot.slane %v9779_v13, 1 }
 0x5c2   :  { %5267 = vrot.lane.b32.xlu1 %v9554_v50, %s5943_s25  ;;  %v4466_v40 = vmul.f32 %v9779_v13, %v4457_v19 }
 0x5c3   :  { %v4537_v43 = vpop.permute.xlu0 %4536 }
 0x5c4   :  { %v4571_v8 = vsel %vm1003_vm7, %v9614_v35, %v4537_v43  ;;  %v4539_v18 = vpop.permute.xlu1 %4538 }
 0x5c5   :  { %v4597_v31 = vmul.f32 %v4583_v62, %v4571_v8  ;;  %v4569_v15 = vsel %vm1003_vm7, %v4539_v18, %v9620_v14  ;;  %v4570_v50 = vsel %vm1003_vm7, %v4537_v43, %v4539_v18  ;;  %4440 = vrot.lane.b32.xlu0 %v9579_v28, %s5939_s2  ;;  %v4452_v14 = vsel %vm918_vm6, %v9762_v39, %v9764_v0 }
 0x5c6   :  { %v4598_v20 = vmul.f32 %v11289_v36, %v4570_v50  ;;  %v4599_v8 = vmul.f32 %v11290_v63, %v4569_v15  ;;  %4442 = vrot.lane.b32.xlu1 %v9582_v41, %s5939_s2  ;;  %v4515_v63 = vrot.slane %v9582_v41, 1  ;;  %v4634_v50 = vrot.slane %v9582_v41, 2 }
 0x5c7   :  { %v4611_v43 = vadd.f32 %v4597_v31, %v4464_v49  ;;  %v9820_v18 = vpop.permute.xlu0 %4548  ;;  %v4695_v31 = vrot.slane %v9768_v61, 2 }
 0x5c8   :  { %v4612_v36 = vadd.f32 %v4598_v20, %v4465_v11  ;;  %v4613_v23 = vadd.f32 %v4599_v8, %v4466_v40  ;;  %v9825_v15 = vpop.permute.xlu1 %4550  ;;  %v4471_v20 = vmul.f32 %v9768_v61, %v4452_v14  ;;  %v10787_v11 = vrot.slane %v9776_v24, 2 }
 0x5c9   :  { %11291 = vst [vmem:[#allocation68_spill] sm:$0xff] %v9825_v15  ;;  %v4564_v49 = vsel %vm1003_vm7, %v9820_v18, %v9825_v15  ;;  %4552 = vrot.lane.b32.xlu0 %v4514_v32, %s5937_s21  ;;  %v10786_v8 = vrot.slane %v9779_v13, 2  ;;  %v4633_v32 = vrot.slane %v9579_v28, 2  ;;  %v9845_v15 = vmul.f32 %v9768_v61, %v9485_v34 }
 0x5ca   :  { %v4604_v40 = vmul.f32 %v4583_v62, %v4564_v49  ;;  %4554 = vrot.lane.b32.xlu1 %v4515_v63, %s5937_s21  ;;  %v4572_v62 = vsel %vm1003_vm7, %v9612_v17, %v9614_v35  ;;  %v9863_v35 = vmul.f32 %v9776_v24, %v9488_v60  ;;  %v11292_v60 = vrot.slane %v9785_v55, 1 }
 0x5cb   :  { %v4656_v0 = vpop.permute.xlu0 %4655 }
 0x5cc   :  { %v4618_v14 = vadd.f32 %v4604_v40, %v4471_v20  ;;  %v4690_v63 = vsel %vm1088_vm8, %v9630_v7, %v4656_v0  ;;  %v4658_v49 = vpop.permute.xlu1 %4657  ;;  %v4460_v20 = vsel %vm918_vm6, %v9596_v12, %v9599_v27  ;;  %v4691_v40 = vsel %vm1088_vm8, %v9628_v6, %v9630_v7 }
 0x5cd   :  { %v4709_v54 = vmul.f32 %v4695_v31, %v4690_v63  ;;  %v4688_v19 = vsel %vm1088_vm8, %v4658_v49, %v9636_v47  ;;  %v4689_v34 = vsel %vm1088_vm8, %v4656_v0, %v4658_v49  ;;  %4671 = vrot.lane.b32.xlu0 %v4633_v32, %s5936_s4  ;;  %v4596_v32 = vmul.f32 %v11292_v60, %v4572_v62 }
 0x5ce   :  { %v4710_v47 = vmul.f32 %v10787_v11, %v4689_v34  ;;  %v4711_v0 = vmul.f32 %v10786_v8, %v4688_v19  ;;  %4673 = vrot.lane.b32.xlu1 %v4634_v50, %s5936_s4  ;;  %v4745_v27 = vrot.slane %v9579_v28, 3  ;;  %v4803_v7 = vsel %vm1173_vm9, %v9647_v25, %v9654_v29 }
 0x5cf   :  { %v4723_v63 = vadd.f32 %v4709_v54, %v4611_v43  ;;  %v9880_v49 = vpop.permute.xlu0 %4667  ;;  %v4746_v62 = vrot.slane %v9582_v41, 3  ;;  %v4463_v54 = vmul.f32 %v9785_v55, %v4460_v20  ;;  %v11294_v43 = vrot.slane %v9785_v55, 2 }
 0x5d0   :  { %v4724_v19 = vadd.f32 %v4710_v47, %v4612_v36  ;;  %v4725_v34 = vadd.f32 %v4711_v0, %v4613_v23  ;;  %v9891_v50 = vpop.permute.xlu1 %4669  ;;  %v4807_v8 = vrot.slane %v9768_v61, 3  ;;  %v10790_v23 = vrot.slane %v9776_v24, 3 }
 0x5d1   :  { %11293 = vst [vmem:[#allocation70_spill] sm:$0xff] %v9891_v50  ;;  %v4708_v60 = vmul.f32 %v11294_v43, %v4691_v40  ;;  %v4683_v57 = vsel %vm1088_vm8, %v9880_v49, %v9891_v50  ;;  %4783 = vrot.lane.b32.xlu0 %v4745_v27, %s5940_s24  ;;  %v4877_v20 = vrot.slane %v9845_v15, 4  ;;  %v4610_v0 = vadd.f32 %v4596_v32, %v4463_v54 }
 0x5d2   :  { %v4716_v36 = vmul.f32 %v4695_v31, %v4683_v57  ;;  %4785 = vrot.lane.b32.xlu1 %v4746_v62, %s5940_s24  ;;  %v11295_v40 = vrot.slane %v9785_v55, 3  ;;  %v4927_v50 = vrot.slane %v9579_v28, 5  ;;  %v4878_v27 = vrot.slane %v9863_v35, 4 }
 0x5d3   :  { %v4768_v11 = vpop.permute.xlu0 %4767  ;;  %v4928_v57 = vrot.slane %v9582_v41, 5  ;;  %v4884_v47 = vrot.slane %v9885_v37, 4  ;;  %v4722_v15 = vadd.f32 %v4708_v60, %v4610_v0  ;;  %v5039_v0 = vrot.slane %v9579_v28, 6 }
 0x5d4   :  { %v4820_v43 = vmul.f32 %v11295_v40, %v4803_v7  ;;  %v4730_v25 = vadd.f32 %v4716_v36, %v4618_v14  ;;  %v4802_v31 = vsel %vm1173_vm9, %v9654_v29, %v4768_v11  ;;  %v4770_v62 = vpop.permute.xlu1 %4769  ;;  %v11296_v29 = vrot.slane %v9779_v13, 3 }
 0x5d5   :  { %v4821_v32 = vmul.f32 %v4807_v8, %v4802_v31  ;;  %v4800_v7 = vsel %vm1173_vm9, %v4770_v62, %v9670_v1  ;;  %v4801_v54 = vsel %vm1173_vm9, %v4768_v11, %v4770_v62  ;;  %4965 = vrot.lane.b32.xlu0 %v4927_v50, %s5938_s23  ;;  %v4981_v1 = vsel %vm1300_vm10, %v9698_v9, %v9701_v2 }
 0x5d6   :  { %v4822_v14 = vmul.f32 %v10790_v23, %v4801_v54  ;;  %v4823_v35 = vmul.f32 %v11296_v29, %v4800_v7  ;;  %4967 = vrot.lane.b32.xlu1 %v4928_v57, %s5938_s23  ;;  %v4834_v36 = vadd.f32 %v4820_v43, %v4722_v15  ;;  %v5093_v40 = vsel %vm1385_vm11, %v9716_v21, %v9719_v46 }
 0x5d7   :  { %v4835_v11 = vadd.f32 %v4821_v32, %v4723_v63  ;;  %v9933_v50 = vpop.permute.xlu0 %4779  ;;  %v5040_v43 = vrot.slane %v9582_v41, 6  ;;  %v5205_v63 = vsel %vm1470_vm12, %v9732_v5, %v9735_v45  ;;  %v11299_v54 = vrot.slane %v9798_v26, 4 }
 0x5d8   :  { %v4836_v31 = vadd.f32 %v4822_v14, %v4724_v19  ;;  %v4837_v62 = vadd.f32 %v4823_v35, %v4725_v34  ;;  %v9940_v57 = vpop.permute.xlu1 %4781  ;;  %v10796_v19 = vrot.slane %v9776_v24, 5  ;;  %v11298_v34 = vrot.slane %v9779_v13, 5 }
 0x5d9   :  { %11297 = vst [vmem:[#allocation80_spill] sm:$0xff] %v9940_v57  ;;  %v4795_v15 = vsel %vm1173_vm9, %v9933_v50, %v9940_v57  ;;  %5077 = vrot.lane.b32.xlu0 %v5039_v0, %s5942_s16  ;;  %v4905_v32 = vadd.f32 %v4877_v20, %v4835_v11  ;;  %v11300_v23 = vrot.slane %v9779_v13, 6  ;;  %v11301_v37 = vrot.slane %v9789_v3, 4 }
 0x5da   :  { %v5005_v7 = vmul.f32 %v11298_v34, %v4981_v1  ;;  %v4907_v14 = vadd.f32 %v11299_v54, %v4837_v62  ;;  %v4828_v29 = vmul.f32 %v4807_v8, %v4795_v15  ;;  %5079 = vrot.lane.b32.xlu1 %v5040_v43, %s5942_s16  ;;  %v4906_v35 = vadd.f32 %v4878_v27, %v4836_v31 }
 0x5db   :  { %v5117_v60 = vmul.f32 %v11300_v23, %v5093_v40  ;;  %v4904_v57 = vadd.f32 %v11301_v37, %v4834_v36  ;;  %v4950_v0 = vpop.permute.xlu0 %4949  ;;  %v5151_v20 = vrot.slane %v9579_v28, 7  ;;  %v5152_v11 = vrot.slane %v9582_v41, 7 }
 0x5dc   :  { %v11302_v1 = vrot.slane %v9779_v13, 7  ;;  %v5019_v26 = vadd.f32 %v5005_v7, %v4907_v14  ;;  %v4842_v62 = vadd.f32 %v4828_v29, %v4730_v25  ;;  %v4984_v8 = vsel %vm1300_vm10, %v9691_v51, %v4950_v0  ;;  %v4952_v27 = vpop.permute.xlu1 %4951 }
 0x5dd   :  { %v5289_v3 = vsel %vm1555_vm15, %v9748_v56, %v9751_v10  ;;  %v11303_v23 = vrot.slane %v9785_v55, 5  ;;  %v4982_v36 = vsel %vm1300_vm10, %v4952_v27, %v9698_v9  ;;  %v4983_v25 = vsel %vm1300_vm10, %v4950_v0, %v4952_v27  ;;  %5189 = vrot.lane.b32.xlu0 %v5151_v20, %s5941_s15  ;;  %v9990_v9 = vld [vmem:[#allocation3 + $0x58] sm:$0x1] }
 0x5de   :  { %v5229_v34 = vmul.f32 %v11302_v1, %v5205_v63  ;;  %v5131_v40 = vadd.f32 %v5117_v60, %v5019_v26  ;;  %v11304_v31 = vrot.slane %v9768_v61, 5  ;;  %v5004_v63 = vmul.f32 %v10796_v19, %v4982_v36  ;;  %5191 = vrot.lane.b32.xlu1 %v5152_v11, %s5941_s15  ;;  %11306 = vst [vmem:[#allocation78_spill] sm:$0xff] %v9990_v9 }
 0x5df   :  { %v5002_v37 = vmul.f32 %v11303_v23, %v4984_v8  ;;  %v9986_v15 = vadd.f32 %v4884_v47, %v4842_v62  ;;  %v9988_v54 = vpop.permute.xlu0 %4961  ;;  %v5299_v14 = vmul.f32 %v9990_v9, %v5289_v3  ;;  %v10798_v1 = vrot.slane %v9785_v55, 6 }
 0x5e0   :  { %v5003_v43 = vmul.f32 %v11304_v31, %v4983_v25  ;;  %v5243_v29 = vadd.f32 %v5229_v34, %v5131_v40  ;;  %v5018_v60 = vadd.f32 %v5004_v63, %v4906_v35  ;;  %v9993_v20 = vpop.permute.xlu1 %4963  ;;  %v10795_v47 = vrot.slane %v9768_v61, 6 }
 0x5e1   :  { %11305 = vst [vmem:[#allocation110_spill] sm:$0xff] %v9986_v15  ;;  %v5016_v7 = vadd.f32 %v5002_v37, %v4904_v57  ;;  %11307 = vst [vmem:[#allocation88_spill] sm:$0xff] %v9993_v20  ;;  %5273 = vrot.lane.b32.xlu0 %v9587_v44, %s5943_s25  ;;  %v10794_v57 = vrot.slane %v9776_v24, 6  ;;  %v10797_v36 = vrot.slane %v9785_v55, 7  ;;  %v10792_v25 = vrot.slane %v9776_v24, 7 }
 0x5e2   :  { %v5017_v0 = vadd.f32 %v5003_v43, %v4905_v32  ;;  %5275 = vrot.lane.b32.xlu1 %v9590_v38, %s5943_s25  ;;  %v10002_v11 = vadd.f32 %v5299_v14, %v5243_v29 }
 0x5e3   :  { %v5062_v26 = vpop.permute.xlu0 %5061 }
 0x5e4   :  { %v5096_v32 = vsel %vm1385_vm11, %v9711_v42, %v5062_v26  ;;  %v5064_v35 = vpop.permute.xlu1 %5063 }
 0x5e5   :  { %v5114_v44 = vmul.f32 %v10798_v1, %v5096_v32  ;;  %v5094_v34 = vsel %vm1385_vm11, %v5064_v35, %v9716_v21  ;;  %v5095_v38 = vsel %vm1385_vm11, %v5062_v26, %v5064_v35  ;;  %5277 = vrot.lane.b32.xlu0 %v9565_v59, %s5943_s25  ;;  %v10793_v59 = vrot.slane %v9768_v61, 7 }
 0x5e6   :  { %v5115_v62 = vmul.f32 %v10795_v47, %v5095_v38  ;;  %v5116_v8 = vmul.f32 %v10794_v57, %v5094_v34  ;;  %5279 = vrot.lane.b32.xlu1 %v9568_v58, %s5943_s25  ;;  %v10050_v38 = vld [vmem:[#allocation3 + $0x40] sm:$0x1] }
 0x5e7   :  { %v5128_v27 = vadd.f32 %v5114_v44, %v5016_v7  ;;  %v10022_v3 = vpop.permute.xlu0 %5073 }
 0x5e8   :  { %v5129_v23 = vadd.f32 %v5115_v62, %v5017_v0  ;;  %v5130_v21 = vadd.f32 %v5116_v8, %v5018_v60  ;;  %v10024_v37 = vpop.permute.xlu1 %5075 }
 0x5e9   :  { %11308 = vst [vmem:[#allocation36_spill] sm:$0xff] %v10024_v37 }
 0x5eb   :  { %v5174_v40 = vpop.permute.xlu0 %5173 }
 0x5ec   :  { %v5208_v31 = vsel %vm1470_vm12, %v9727_v30, %v5174_v40  ;;  %v5176_v43 = vpop.permute.xlu1 %5175 }
 0x5ed   :  { %v5226_v58 = vmul.f32 %v10797_v36, %v5208_v31  ;;  %v5206_v63 = vsel %vm1470_vm12, %v5176_v43, %v9732_v5  ;;  %v5207_v7 = vsel %vm1470_vm12, %v5174_v40, %v5176_v43  ;;  %v10061_v40 = vld [vmem:[#allocation3 + $0x50] sm:$0x1] }
 0x5ee   :  { %v5227_v14 = vmul.f32 %v10793_v59, %v5207_v7  ;;  %v5228_v29 = vmul.f32 %v10792_v25, %v5206_v63  ;;  %11310 = vst [vmem:[#allocation49_spill] sm:$0xff] %v10061_v40  ;;  %v10103_v59 = vld [vmem:[#allocation3 + $0x30] sm:$0xff] }
 0x5ef   :  { %v5240_v0 = vadd.f32 %v5226_v58, %v5128_v27  ;;  %v10043_v60 = vpop.permute.xlu0 %5185  ;;  %v10801_v57 = vrot.slane %v10103_v59, 1 }
 0x5f0   :  { %v5241_v26 = vadd.f32 %v5227_v14, %v5129_v23  ;;  %v5242_v32 = vadd.f32 %v5228_v29, %v5130_v21  ;;  %v10045_v35 = vpop.permute.xlu1 %5187  ;;  %v10058_v23 = vld [vmem:[#allocation3 + $0x48] sm:$0x1] }
 0x5f1   :  { %11309 = vst [vmem:[#allocation31_spill] sm:$0xff] %v10058_v23 }
 0x5f3   :  { %v5258_v44 = vpop.permute.xlu0 %5257 }
 0x5f4   :  { %v5292_v5 = vsel %vm1555_vm15, %v9743_v48, %v5258_v44  ;;  %v5260_v34 = vpop.permute.xlu1 %5259 }
 0x5f5   :  { %v5296_v62 = vmul.f32 %v10050_v38, %v5292_v5  ;;  %v5290_v8 = vsel %vm1555_vm15, %v5260_v34, %v9748_v56  ;;  %v5291_v27 = vsel %vm1555_vm15, %v5258_v44, %v5260_v34  ;;  %v10073_v56 = vstv %s10558_s11 }
 0x5f6   :  { %v5297_v21 = vmul.f32 %v10058_v23, %v5291_v27  ;;  %v5298_v31 = vmul.f32 %v10061_v40, %v5290_v8 }
 0x5f7   :  { %v10064_v43 = vadd.f32 %v5296_v62, %v5240_v0  ;;  %v10066_v58 = vpop.permute.xlu0 %5269 }
 0x5f8   :  { %v5311_v63 = vadd.f32 %v5297_v21, %v5241_v26  ;;  %v5312_v7 = vadd.f32 %v5298_v31, %v5242_v32  ;;  %v10068_v14 = vpop.permute.xlu1 %5271 }
 0x5fa   :  { %v10076_v29 = vadd.f32 %v10073_v56, %v5311_v63  ;;  %v10079_v44 = vadd.f32 %v10073_v56, %v5312_v7  ;;  %v11311_v7 = vrot.slane %v9785_v55, 1 }
 0x5fb   :  { %v10081_v5 = vpop.permute.xlu0 %4432 }
 0x5fc   :  { %v4435_v26 = vpop.permute.xlu1 %4434 }
 0x5fd   :  { %v4453_v32 = vsel %vm918_vm6, %v4435_v26, %v9762_v39 }
 0x5fe   :  { %v4470_v63 = vmul.f32 %v9785_v55, %v4453_v32 }
 0x5ff   :  { %v10088_v34 = vpop.permute.xlu0 %4444 }
 0x600   :  { %v4447_v62 = vpop.permute.xlu1 %4446 }
 0x601   :  { %v4448_v8 = vsel %vm918_vm6, %v10088_v34, %v4447_v62 }
 0x602   :  { %v4475_v36 = vmul.f32 %v10103_v59, %v4448_v8  ;;  %v11312_v8 = vrot.slane %v9785_v55, 2 }
 0x603   :  { %v10093_v27 = vpop.permute.xlu0 %4544 }
 0x604   :  { %v4547_v21 = vpop.permute.xlu1 %4546 }
 0x605   :  { %v4565_v31 = vsel %vm1003_vm7, %v4547_v21, %v9820_v18 }
 0x606   :  { %v4603_v25 = vmul.f32 %v11311_v7, %v4565_v31  ;;  %v10114_v31 = vld [vmem:[#allocation3] sm:$0xff] }
 0x607   :  { %v10101_v39 = vpop.permute.xlu0 %4556  ;;  %v10118_v7 = vmul.f32 %v10114_v31, %v9436_v16  ;;  %v4581_v9 = vrot.slane %v10114_v31, 1  ;;  %v4855_v16 = vmul.f32 %v9785_v55, %v9492_v4  ;;  %v4461_v4 = vsel %vm918_vm6, %v4447_v62, %v9596_v12 }
 0x608   :  { %v4617_v47 = vadd.f32 %v4603_v25, %v4470_v63  ;;  %v4559_v19 = vpop.permute.xlu1 %4558  ;;  %v4854_v62 = vmul.f32 %v10114_v31, %v9542_v22 }
 0x609   :  { %v4560_v0 = vsel %vm1003_vm7, %v10101_v39, %v4559_v19  ;;  %v4883_v12 = vrot.slane %v4855_v16, 4 }
 0x60a   :  { %v4608_v18 = vmul.f32 %v10801_v57, %v4560_v0  ;;  %v4566_v57 = vsel %vm1003_vm7, %v10093_v27, %v4547_v21  ;;  %v4454_v21 = vsel %vm918_vm6, %v10081_v5, %v4435_v26  ;;  %v10808_v26 = vrot.slane %v10103_v59, 2 }
 0x60b   :  { %v10112_v32 = vpop.permute.xlu0 %4663 }
 0x60c   :  { %v4622_v1 = vadd.f32 %v4608_v18, %v4475_v36  ;;  %v4666_v25 = vpop.permute.xlu1 %4665  ;;  %v4573_v18 = vsel %vm1003_vm7, %v4559_v19, %v9612_v17  ;;  %v4602_v36 = vmul.f32 %v4581_v9, %v4566_v57  ;;  %v4977_v57 = vsel %vm1300_vm10, %v9988_v54, %v9993_v20 }
 0x60d   :  { %v4684_v63 = vsel %vm1088_vm8, %v4666_v25, %v9880_v49  ;;  %v4685_v49 = vsel %vm1088_vm8, %v10112_v32, %v4666_v25  ;;  %v4469_v25 = vmul.f32 %v10114_v31, %v4454_v21  ;;  %v11313_v21 = vrot.slane %v9785_v55, 3 }
 0x60e   :  { %v4715_v40 = vmul.f32 %v11312_v8, %v4684_v63  ;;  %v4693_v63 = vrot.slane %v10114_v31, 2 }
 0x60f   :  { %v10130_v23 = vpop.permute.xlu0 %4675  ;;  %v4616_v41 = vadd.f32 %v4602_v36, %v4469_v25  ;;  %v5089_v36 = vsel %vm1385_vm11, %v10022_v3, %v10024_v37  ;;  %v11316_v37 = vrot.slane %v10103_v59, 3 }
 0x610   :  { %v4729_v8 = vadd.f32 %v4715_v40, %v4617_v47  ;;  %v4678_v0 = vpop.permute.xlu1 %4677  ;;  %v4805_v47 = vrot.slane %v10114_v31, 3  ;;  %v4595_v40 = vmul.f32 %v4581_v9, %v4573_v18 }
 0x611   :  { %v4679_v17 = vsel %vm1088_vm8, %v10130_v23, %v4678_v0  ;;  %v4692_v19 = vsel %vm1088_vm8, %v4678_v0, %v9628_v6  ;;  %v4462_v6 = vmul.f32 %v10114_v31, %v4461_v4  ;;  %v4714_v0 = vmul.f32 %v4693_v63, %v4685_v49 }
 0x612   :  { %v4707_v9 = vmul.f32 %v4693_v63, %v4692_v19  ;;  %v4720_v18 = vmul.f32 %v10808_v26, %v4679_v17  ;;  %v4860_v49 = vmul.f32 %v10103_v59, %v9548_v33  ;;  %v4985_v63 = vsel %vm1300_vm10, %v9688_v52, %v9691_v51 }
 0x613   :  { %v10158_v15 = vpop.permute.xlu0 %4775  ;;  %v11314_v4 = vrot.slane %v9785_v55, 5  ;;  %v4609_v17 = vadd.f32 %v4595_v40, %v4462_v6  ;;  %v5201_v33 = vsel %vm1470_vm12, %v10043_v60, %v10045_v35  ;;  %v4728_v25 = vadd.f32 %v4714_v0, %v4616_v41  ;;  %v11315_v6 = vld [vmem:[#allocation22_spill] sm:$0xff]  ;;  %v11317_v41 = vld [vmem:[#allocation41_spill] sm:$0xff] }
 0x614   :  { %v4778_v61 = vpop.permute.xlu1 %4777  ;;  %v4888_v0 = vrot.slane %v4860_v49, 4 }
 0x615   :  { %v4796_v16 = vsel %vm1173_vm9, %v4778_v61, %v9933_v50  ;;  %v4797_v22 = vsel %vm1173_vm9, %v10158_v15, %v4778_v61  ;;  %v5009_v50 = vmul.f32 %v11314_v4, %v4977_v57  ;;  %v4734_v57 = vadd.f32 %v4720_v18, %v4622_v1 }
 0x616   :  { %v4826_v20 = vmul.f32 %v4805_v47, %v4797_v22  ;;  %v4827_v28 = vmul.f32 %v11313_v21, %v4796_v16  ;;  %v4721_v22 = vadd.f32 %v4707_v9, %v4609_v17  ;;  %v11318_v9 = vrot.slane %v9785_v55, 6 }
 0x617   :  { %v10187_v61 = vpop.permute.xlu0 %4787 }
 0x618   :  { %v4841_v51 = vadd.f32 %v4827_v28, %v4729_v8  ;;  %v4790_v16 = vpop.permute.xlu1 %4789  ;;  %v4840_v4 = vadd.f32 %v4826_v20, %v4728_v25  ;;  %v5097_v28 = vsel %vm1385_vm11, %v11317_v41, %v9711_v42  ;;  %v4882_v8 = vrot.slane %v4854_v62, 4 }
 0x619   :  { %v4791_v40 = vsel %vm1173_vm9, %v10187_v61, %v4790_v16  ;;  %v4804_v21 = vsel %vm1173_vm9, %v4790_v16, %v11315_v6  ;;  %v5121_v18 = vmul.f32 %v11318_v9, %v5089_v36  ;;  %v5285_v42 = vsel %vm1555_vm15, %v10066_v58, %v10068_v14 }
 0x61a   :  { %v4911_v26 = vadd.f32 %v4883_v12, %v4841_v51  ;;  %v4819_v19 = vmul.f32 %v4805_v47, %v4804_v21  ;;  %v4832_v13 = vmul.f32 %v11316_v37, %v4791_v40  ;;  %v11319_v47 = vrot.slane %v10114_v31, 5 }
 0x61b   :  { %v10209_v1 = vpop.permute.xlu0 %4957  ;;  %v11320_v37 = vrot.slane %v9785_v55, 7  ;;  %v11323_v55 = vrot.slane %v10114_v31, 6 }
 0x61c   :  { %v5023_v17 = vadd.f32 %v5009_v50, %v4911_v26  ;;  %v4833_v16 = vadd.f32 %v4819_v19, %v4721_v22  ;;  %v4846_v20 = vadd.f32 %v4832_v13, %v4734_v57  ;;  %v4960_v12 = vpop.permute.xlu1 %4959  ;;  %v5001_v25 = vmul.f32 %v11319_v47, %v4985_v63 }
 0x61d   :  { %v5233_v51 = vmul.f32 %v11320_v37, %v5201_v33  ;;  %v4978_v62 = vsel %vm1300_vm10, %v4960_v12, %v9988_v54  ;;  %v11321_v26 = vrot.slane %v10118_v7, 4  ;;  %v4910_v50 = vadd.f32 %v4882_v8, %v4840_v4  ;;  %v11324_v33 = vld [vmem:[#allocation60_spill] sm:$0xff] }
 0x61e   :  { %v5135_v49 = vadd.f32 %v5121_v18, %v5023_v17  ;;  %v11322_v19 = vmov %v11319_v47  ;;  %v5113_v36 = vmul.f32 %v11323_v55, %v5097_v28  ;;  %v5209_v22 = vsel %vm1470_vm12, %v11324_v33, %v9727_v30  ;;  %v11325_v28 = vld [vmem:[#allocation67_spill] sm:$0xff] }
 0x61f   :  { %v4903_v13 = vadd.f32 %v11321_v26, %v4833_v16  ;;  %v5008_v63 = vmul.f32 %v11322_v19, %v4978_v62  ;;  %v5945_v57 = vmov 1966171168   ;;  %v10234_v6 = vpop.permute.xlu0 %4969  ;;  %v10236_v54 = vadd.f32 %v4888_v0, %v4846_v20  ;;  %v11326_v30 = vld [vmem:[#allocation87_spill] sm:$0xff]  ;;  %v10261_v62 = vld [vmem:[#allocation3 + $0x38] sm:$0x1] }
 0x620   :  { %v5358_v40 = vunpack.c.l.s4 %v5945_v57  ;;  %v5303_v7 = vmul.f32 %v10050_v38, %v5285_v42  ;;  %v5247_v21 = vadd.f32 %v5233_v51, %v5135_v49  ;;  %v10239_v9 = vpop.permute.xlu1 %4971  ;;  %v5293_v18 = vsel %vm1555_vm15, %v11325_v28, %v9743_v48  ;;  %v11329_v51 = vld [vmem:[#allocation19_spill] sm:$0xff] }
 0x621   :  { %v5015_v4 = vadd.f32 %v5001_v25, %v4903_v13  ;;  %v5022_v8 = vadd.f32 %v5008_v63, %v4910_v50  ;;  %v4567_v17 = vsel %vm1003_vm7, %v11326_v30, %v10093_v27  ;;  %v11327_v0 = vrot.slane %v10114_v31, 7  ;;  %v11328_v25 = vld [vmem:[#allocation50_spill] sm:$0xff]  ;;  %v11331_v19 = vld [vmem:[#allocation47_spill] sm:$0xff] }
 0x622   :  { %v10251_v38 = vadd.f32 %v5303_v7, %v5247_v21  ;;  %v5359_v47 = vunpack.c.0.s8 %v5358_v40  ;;  %v4455_v37 = vsel %vm918_vm6, %v11328_v25, %v10081_v5  ;;  %v4686_v48 = vsel %vm1088_vm8, %v11329_v51, %v10112_v32  ;;  %v11332_v63 = vld [vmem:[#allocation23_spill] sm:$0xff] }
 0x623   :  { %v5225_v16 = vmul.f32 %v11327_v0, %v5209_v22  ;;  %v5127_v20 = vadd.f32 %v5113_v36, %v5015_v4  ;;  %v5070_v42 = vpop.permute.xlu0 %5069  ;;  %v5295_v27 = vmul.f32 %v10261_v62, %v5293_v18  ;;  %v11330_v49 = vrot.slane %v10103_v59, 1 }
 0x624   :  { %v5072_v50 = vpop.permute.xlu1 %5071  ;;  %v4798_v5 = vsel %vm1173_vm9, %v11331_v19, %v10158_v15  ;;  %v4853_v55 = vmul.f32 %v10103_v59, %v11332_v63  ;;  %v4468_v36 = vmul.f32 %v10103_v59, %v4455_v37  ;;  %v11333_v22 = vrot.slane %v10103_v59, 2  ;;  %v11335_v15 = vld [vmem:[#allocation10_spill] sm:$0xff]  ;;  %v11337_v37 = vld [vmem:[#allocation44_spill] sm:$0xff] }
 0x625   :  { %v4601_v26 = vmul.f32 %v11330_v49, %v4567_v17  ;;  %v5239_v13 = vadd.f32 %v5225_v16, %v5127_v20  ;;  %v5090_v32 = vsel %vm1385_vm11, %v5072_v50, %v10022_v3  ;;  %v11334_v7 = vrot.slane %v10114_v31, 6 }
 0x626   :  { %v4713_v57 = vmul.f32 %v11333_v22, %v4686_v48  ;;  %v5326_v4 = vadd.f32 %v10073_v56, %v10064_v43  ;;  %v10283_v18 = vsub.s32 %v5359_v47, %v11335_v15  ;;  %v11336_v3 = vrot.slane %v10103_v59, 3 }
 0x627   :  { %v5309_v40 = vadd.f32 %v5295_v27, %v5239_v13  ;;  %v5120_v21 = vmul.f32 %v11334_v7, %v5090_v32  ;;  %v10285_v30 = vpop.permute.xlu0 %5081  ;;  %v4615_v17 = vadd.f32 %v4601_v26, %v4468_v36  ;;  %v4992_v51 = vrot.slane %v11337_v37, 5 }
 0x628   :  { %v4825_v0 = vmul.f32 %v11336_v3, %v4798_v5  ;;  %v10290_v25 = vpop.permute.xlu1 %5083  ;;  %v4881_v48 = vrot.slane %v4853_v55, 4  ;;  %v4980_v43 = vsel %vm1300_vm10, %v9701_v2, %v10209_v1  ;;  %v4993_v47 = vrot.slane %v10103_v59, 5 }
 0x629   :  { %v5325_v16 = vadd.f32 %v10073_v56, %v5309_v40  ;;  %v5134_v20 = vadd.f32 %v5120_v21, %v5022_v8  ;;  %v4727_v27 = vadd.f32 %v4713_v57, %v4615_v17  ;;  %v4979_v26 = vsel %vm1300_vm10, %v10209_v1, %v4960_v12 }
 0x62a   :  { %v5104_v8 = vrot.slane %v11337_v37, 6  ;;  %v5105_v13 = vrot.slane %v10103_v59, 6  ;;  %v5216_v19 = vrot.slane %v11337_v37, 7  ;;  %v11338_v63 = vcombine.low %v10076_v29, %v10079_v44 }
 0x62b   :  { %v5353_v49 = vcombine.low %v5325_v16, %v5326_v4  ;;  %v5182_v5 = vpop.permute.xlu0 %5181  ;;  %v4839_v2 = vadd.f32 %v4825_v0, %v4727_v27  ;;  %v5092_v1 = vsel %vm1385_vm11, %v9719_v46, %v5070_v42  ;;  %v5006_v36 = vmul.f32 %v4992_v51, %v4980_v43 }
 0x62c   :  { %v10308_v55 = vrot.slane %v11338_v63, %v10283_v18  ;;  %v5184_v12 = vpop.permute.xlu1 %5183  ;;  %v5091_v22 = vsel %vm1385_vm11, %v5070_v42, %v5072_v50  ;;  %v5217_v57 = vrot.slane %v10103_v59, 7  ;;  %v5007_v44 = vmul.f32 %v4993_v47, %v4979_v26  ;;  %v10351_v63 = vld [vmem:[#allocation3 + $0x60] sm:$0x1] }
 0x62d   :  { %v10311_v32 = vrot.slane %v5353_v49, %v10283_v18  ;;  %v5202_v29 = vsel %vm1470_vm12, %v5184_v12, %v10043_v60  ;;  %v5204_v46 = vsel %vm1470_vm12, %v9735_v45, %v5182_v5  ;;  %v11339_v40 = vrot.slane %v10114_v31, 7  ;;  %v11340_v31 = vld [vmem:[#allocation30_spill] sm:$0xff] }
 0x62e   :  { %v5118_v42 = vmul.f32 %v5104_v8, %v5092_v1  ;;  %v5203_v50 = vsel %vm1470_vm12, %v5182_v5, %v5184_v12  ;;  %v4909_v4 = vadd.f32 %v4881_v48, %v4839_v2  ;;  %v5119_v15 = vmul.f32 %v5105_v13, %v5091_v22  ;;  %v10359_v12 = vld [vmem:[#allocation3 + $0x68] sm:$0x1] }
 0x62f   :  { %v5232_v7 = vmul.f32 %v11339_v40, %v5202_v29  ;;  %v5385_v21 = vcombine.low %v10311_v32, %v10308_v55  ;;  %v10337_v60 = vpop.permute.xlu0 %5193  ;;  %v5020_v3 = vadd.f32 %v5006_v36, %v11340_v31  ;;  %v5230_v0 = vmul.f32 %v5216_v19, %v5204_v46 }
 0x630   :  { %v10341_v45 = vpop.permute.xlu1 %5195  ;;  %v5021_v16 = vadd.f32 %v5007_v44, %v4909_v4  ;;  %v5231_v27 = vmul.f32 %v5217_v57, %v5203_v50 }
 0x631   :  { %v5246_v17 = vadd.f32 %v5232_v7, %v5134_v20  ;;  %v5132_v49 = vadd.f32 %v5118_v42, %v5020_v3  ;;  %v5329_v7 = vadd.f32 %v10073_v56, %v10002_v11 }
 0x632   :  { %v5133_v26 = vadd.f32 %v5119_v15, %v5021_v16 }
 0x633   :  { %v5266_v43 = vpop.permute.xlu0 %5265  ;;  %v5244_v20 = vadd.f32 %v5230_v0, %v5132_v49 }
 0x634   :  { %v5288_v48 = vsel %vm1555_vm15, %v9751_v10, %v5266_v43  ;;  %v5268_v5 = vpop.permute.xlu1 %5267  ;;  %v5245_v1 = vadd.f32 %v5231_v27, %v5133_v26  ;;  %v11341_v27 = vld [vmem:[#allocation68_spill] sm:$0xff] }
 0x635   :  { %v5300_v55 = vmul.f32 %v10351_v63, %v5288_v48  ;;  %v5286_v2 = vsel %vm1555_vm15, %v5268_v5, %v10066_v58  ;;  %v5287_v32 = vsel %vm1555_vm15, %v5266_v43, %v5268_v5  ;;  %v11342_v43 = vrot.slane %v11337_v37, 1  ;;  %v11343_v5 = vld [vmem:[#allocation53_spill] sm:$0xff] }
 0x636   :  { %v5301_v36 = vmul.f32 %v10359_v12, %v5287_v32  ;;  %v5302_v10 = vmul.f32 %v10261_v62, %v5286_v2 }
 0x637   :  { %v5314_v22 = vadd.f32 %v5300_v55, %v5244_v20  ;;  %v4441_v29 = vpop.permute.xlu0 %4440 }
 0x638   :  { %v5315_v44 = vadd.f32 %v5301_v36, %v5245_v1  ;;  %v5316_v46 = vadd.f32 %v5302_v10, %v5246_v17  ;;  %v4443_v40 = vpop.permute.xlu1 %4442  ;;  %v4451_v20 = vsel %vm918_vm6, %v11343_v5, %v4441_v29  ;;  %v11345_v36 = vld [vmem:[#allocation70_spill] sm:$0xff] }
 0x639   :  { %v5330_v58 = vadd.f32 %v10073_v56, %v5314_v22  ;;  %v4449_v15 = vsel %vm918_vm6, %v4443_v40, %v10088_v34 }
 0x63a   :  { %v5331_v42 = vadd.f32 %v10073_v56, %v5315_v44  ;;  %v5332_v50 = vadd.f32 %v10073_v56, %v5316_v46  ;;  %v4474_v16 = vmul.f32 %v11337_v37, %v4449_v15  ;;  %v5393_v44 = vrot.slane %v5385_v21, %v10283_v18  ;;  %v11347_v21 = vld [vmem:[#allocation83_spill] sm:$0xff] }
 0x63b   :  { %v5355_v4 = vcombine.low %v5329_v7, %v5330_v58  ;;  %v4553_v62 = vpop.permute.xlu0 %4552  ;;  %v4450_v7 = vsel %vm918_vm6, %v4441_v29, %v4443_v40  ;;  %v11346_v58 = vrot.slane %v11337_v37, 2 }
 0x63c   :  { %v5356_v31 = vcombine.low %v5331_v42, %v5332_v50  ;;  %v4555_v3 = vpop.permute.xlu1 %4554  ;;  %v4563_v49 = vsel %vm1003_vm7, %v11341_v27, %v4553_v62  ;;  %v4986_v50 = vsel %vm1300_vm10, %v10239_v9, %v9688_v52 }
 0x63d   :  { %v5377_v17 = vrot.slane %v5355_v4, %v10283_v18  ;;  %v4561_v11 = vsel %vm1003_vm7, %v4555_v3, %v10101_v39  ;;  %v11344_v39 = vrot.slane %v9776_v24, 1  ;;  %v4562_v1 = vsel %vm1003_vm7, %v4553_v62, %v4555_v3  ;;  %v11348_v3 = vld [vmem:[#allocation28_spill] sm:$0xff] }
 0x63e   :  { %v5384_v0 = vrot.slane %v5356_v31, %v10283_v18  ;;  %v4607_v34 = vmul.f32 %v11342_v43, %v4561_v11  ;;  %v4472_v4 = vmul.f32 %v9776_v24, %v4451_v20  ;;  %v4859_v62 = vmul.f32 %v11337_v37, %v11347_v21 }
 0x63f   :  { %v4672_v26 = vpop.permute.xlu0 %4671  ;;  %v4605_v32 = vmul.f32 %v11344_v39, %v4563_v49  ;;  %v11349_v29 = vrot.slane %v11348_v3, 1  ;;  %v4473_v27 = vmul.f32 %v11348_v3, %v4450_v7  ;;  %v11353_v20 = vrot.slane %v9776_v24, 3 }
 0x640   :  { %v5386_v48 = vcombine.low %v5377_v17, %v5384_v0  ;;  %v4621_v55 = vadd.f32 %v4607_v34, %v4474_v16  ;;  %v4674_v2 = vpop.permute.xlu1 %4673  ;;  %v4682_v10 = vsel %vm1088_vm8, %v11345_v36, %v4672_v26  ;;  %v11350_v17 = vrot.slane %v9776_v24, 2  ;;  %v11351_v0 = vld [vmem:[#allocation80_spill] sm:$0xff] }
 0x641   :  { %v4680_v22 = vsel %vm1088_vm8, %v4674_v2, %v10130_v23  ;;  %v4681_v23 = vsel %vm1088_vm8, %v4672_v26, %v4674_v2  ;;  %v4606_v40 = vmul.f32 %v11349_v29, %v4562_v1  ;;  %v4619_v49 = vadd.f32 %v4605_v32, %v4472_v4  ;;  %v11358_v29 = vld [vmem:[#allocation88_spill] sm:$0xff] }
 0x642   :  { %v5400_v46 = vrot.slane %v5386_v48, %v10283_v18  ;;  %v4719_v42 = vmul.f32 %v11346_v58, %v4680_v22  ;;  %v4717_v11 = vmul.f32 %v11350_v17, %v4682_v10  ;;  %v11352_v26 = vrot.slane %v11348_v3, 2  ;;  %v11356_v22 = vld [vmem:[#allocation62_spill] sm:$0xff] }
 0x643   :  { %v4784_v15 = vpop.permute.xlu0 %4783  ;;  %v11354_v39 = vrot.slane %v11337_v37, 3  ;;  %v4887_v1 = vrot.slane %v4859_v62, 4  ;;  %v11357_v58 = vrot.slane %v11348_v3, 3 }
 0x644   :  { %v5401_v31 = vcombine.low %v5393_v44, %v5400_v46  ;;  %v4794_v52 = vsel %vm1173_vm9, %v11351_v0, %v4784_v15  ;;  %v4786_v16 = vpop.permute.xlu1 %4785  ;;  %v4718_v48 = vmul.f32 %v11352_v26, %v4681_v23  ;;  %v4733_v5 = vadd.f32 %v4719_v42, %v4621_v55 }
 0x645   :  { %v4792_v43 = vsel %vm1173_vm9, %v4786_v16, %v10187_v61  ;;  %v4793_v34 = vsel %vm1173_vm9, %v4784_v15, %v4786_v16  ;;  %v4829_v2 = vmul.f32 %v11353_v20, %v4794_v52  ;;  %v11355_v61 = vld [vmem:[#allocation34_spill] sm:$0xff]  ;;  %v4858_v44 = vmul.f32 %v11348_v3, %v11356_v22 }
 0x646   :  { %5444 = vst [vmem:[%s10559_s12] sm:$0xff] %v5401_v31  ;;  %v4831_v32 = vmul.f32 %v11354_v39, %v4792_v43  ;;  %v4857_v10 = vmul.f32 %v9776_v24, %v11355_v61  ;;  %v4620_v46 = vadd.f32 %v4606_v40, %v4473_v27  ;;  %v4731_v7 = vadd.f32 %v4717_v11, %v4619_v49  ;;  %v11359_v27 = vld [vmem:[#allocation36_spill] sm:$0xff] }
 0x647   :  { %v4966_v36 = vpop.permute.xlu0 %4965  ;;  %v4830_v4 = vmul.f32 %v11357_v58, %v4793_v34  ;;  %v4973_v23 = vsel %vm1300_vm10, %v10234_v6, %v10239_v9  ;;  %v5014_v15 = vmul.f32 %v4993_v47, %v4986_v50  ;;  %v4886_v16 = vrot.slane %v4858_v44, 4  ;;  %v11360_v50 = vld [vmem:[#allocation42_spill] sm:$0xff] }
 0x648   :  { %v4845_v55 = vadd.f32 %v4831_v32, %v4733_v5  ;;  %v4968_v42 = vpop.permute.xlu1 %4967  ;;  %v4732_v21 = vadd.f32 %v4718_v48, %v4620_v46  ;;  %v4843_v62 = vadd.f32 %v4829_v2, %v4731_v7  ;;  %v4976_v40 = vsel %vm1300_vm10, %v11358_v29, %v4966_v36  ;;  %v11366_v7 = vld [vmem:[#allocation110_spill] sm:$0xff] }
 0x649   :  { %v4975_v17 = vsel %vm1300_vm10, %v4966_v36, %v4968_v42  ;;  %v4885_v52 = vrot.slane %v4857_v10, 4  ;;  %v5013_v47 = vmul.f32 %v4992_v51, %v4973_v23  ;;  %v11361_v43 = vrot.slane %v11360_v50, 5 }
 0x64a   :  { %v4915_v31 = vadd.f32 %v4887_v1, %v4845_v55  ;;  %v4844_v0 = vadd.f32 %v4830_v4, %v4732_v21  ;;  %v4974_v26 = vsel %vm1300_vm10, %v4968_v42, %v10234_v6  ;;  %v5028_v5 = vadd.f32 %v5014_v15, %v10236_v54 }
 0x64b   :  { %v5078_v11 = vpop.permute.xlu0 %5077  ;;  %v5010_v34 = vmul.f32 %v11361_v43, %v4976_v40  ;;  %v5085_v20 = vsel %vm1385_vm11, %v10285_v30, %v10290_v25  ;;  %v4913_v2 = vadd.f32 %v4885_v52, %v4843_v62  ;;  %v11362_v51 = vrot.slane %v9776_v24, 5 }
 0x64c   :  { %v5088_v9 = vsel %vm1385_vm11, %v11359_v27, %v5078_v11  ;;  %v5080_v49 = vpop.permute.xlu1 %5079  ;;  %v5098_v32 = vsel %vm1385_vm11, %v10290_v25, %v11317_v41  ;;  %v5210_v6 = vsel %vm1470_vm12, %v10341_v45, %v11324_v33  ;;  %v11363_v54 = vrot.slane %v11360_v50, 6 }
 0x64d   :  { %v5087_v48 = vsel %vm1385_vm11, %v5078_v11, %v5080_v49  ;;  %v5011_v39 = vmul.f32 %v11362_v51, %v4975_v17  ;;  %v5086_v36 = vsel %vm1385_vm11, %v5080_v49, %v10285_v30  ;;  %v4914_v10 = vadd.f32 %v4886_v16, %v4844_v0 }
 0x64e   :  { %v5122_v1 = vmul.f32 %v11363_v54, %v5088_v9  ;;  %v11364_v22 = vrot.slane %v11348_v3, 5  ;;  %v11365_v46 = vrot.slane %v9776_v24, 6  ;;  %v5024_v58 = vadd.f32 %v5010_v34, %v11366_v7  ;;  %v11372_v34 = vld [vmem:[#allocation49_spill] sm:$0xff]  ;;  %v11373_v54 = vld [vmem:[#allocation78_spill] sm:$0xff] }
 0x64f   :  { %v5190_v61 = vpop.permute.xlu0 %5189  ;;  %v11367_v4 = vrot.slane %v11360_v50, 7  ;;  %v5027_v23 = vadd.f32 %v5013_v47, %v4915_v31  ;;  %v5025_v15 = vadd.f32 %v5011_v39, %v4913_v2  ;;  %v11368_v21 = vrot.slane %v11348_v3, 6  ;;  %v11371_v47 = vld [vmem:[#allocation31_spill] sm:$0xff] }
 0x650   :  { %v5012_v44 = vmul.f32 %v11364_v22, %v4974_v26  ;;  %v5123_v41 = vmul.f32 %v11365_v46, %v5087_v48  ;;  %v5200_v25 = vsel %vm1470_vm12, %v10045_v35, %v5190_v61  ;;  %v5192_v33 = vpop.permute.xlu1 %5191  ;;  %v11369_v35 = vrot.slane %v9776_v24, 7 }
 0x651   :  { %v5234_v55 = vmul.f32 %v11367_v4, %v5200_v25  ;;  %v5198_v30 = vsel %vm1470_vm12, %v5192_v33, %v10337_v60  ;;  %v5199_v42 = vsel %vm1470_vm12, %v5190_v61, %v5192_v33  ;;  %v5124_v62 = vmul.f32 %v11368_v21, %v5086_v36 }
 0x652   :  { %v5235_v29 = vmul.f32 %v11369_v35, %v5199_v42  ;;  %v5125_v40 = vmul.f32 %v5104_v8, %v5085_v20  ;;  %v5126_v17 = vmul.f32 %v5105_v13, %v5098_v32  ;;  %v5197_v11 = vsel %vm1470_vm12, %v10337_v60, %v10341_v45 }
 0x653   :  { %v5136_v0 = vadd.f32 %v5122_v1, %v5024_v58  ;;  %v5274_v31 = vpop.permute.xlu0 %5273  ;;  %v5026_v52 = vadd.f32 %v5012_v44, %v4914_v10  ;;  %v5137_v16 = vadd.f32 %v5123_v41, %v5025_v15  ;;  %v11370_v27 = vrot.slane %v11348_v3, 7 }
 0x654   :  { %v5284_v24 = vsel %vm1555_vm15, %v10068_v14, %v5274_v31  ;;  %v5276_v8 = vpop.permute.xlu1 %5275  ;;  %v5238_v13 = vmul.f32 %v5217_v57, %v5210_v6  ;;  %v5139_v3 = vadd.f32 %v5125_v40, %v5027_v23  ;;  %v5140_v48 = vadd.f32 %v5126_v17, %v5028_v5 }
 0x655   :  { %v5236_v9 = vmul.f32 %v11370_v27, %v5198_v30  ;;  %v5248_v49 = vadd.f32 %v5234_v55, %v5136_v0  ;;  %v5304_v50 = vmul.f32 %v11371_v47, %v5284_v24  ;;  %v5283_v60 = vsel %vm1555_vm15, %v5274_v31, %v5276_v8 }
 0x656   :  { %v5138_v45 = vadd.f32 %v5124_v62, %v5026_v52  ;;  %v5249_v43 = vadd.f32 %v5235_v29, %v5137_v16  ;;  %v5305_v26 = vmul.f32 %v11372_v34, %v5283_v60  ;;  %v5333_v20 = vadd.f32 %v10073_v56, %v10251_v38 }
 0x657   :  { %v5318_v14 = vadd.f32 %v5304_v50, %v5248_v49  ;;  %v5278_v2 = vpop.permute.xlu0 %5277  ;;  %v5237_v59 = vmul.f32 %v5216_v19, %v5197_v11  ;;  %v5252_v36 = vadd.f32 %v5238_v13, %v5140_v48  ;;  %v11374_v42 = vlaneseq }
 0x658   :  { %v5250_v57 = vadd.f32 %v5236_v9, %v5138_v45  ;;  %v5319_v51 = vadd.f32 %v5305_v26, %v5249_v43  ;;  %v5282_v39 = vsel %vm1555_vm15, %v5276_v8, %v5278_v2  ;;  %v5280_v32 = vpop.permute.xlu1 %5279 }
 0x659   :  { %v5334_v6 = vadd.f32 %v10073_v56, %v5318_v14  ;;  %v5306_v1 = vmul.f32 %v11373_v54, %v5282_v39  ;;  %v5281_v5 = vsel %vm1555_vm15, %v5278_v2, %v5280_v32  ;;  %v5294_v38 = vsel %vm1555_vm15, %v5280_v32, %v11325_v28 }
 0x65a   :  { %v5251_v37 = vadd.f32 %v5237_v59, %v5139_v3  ;;  %v5307_v19 = vmul.f32 %v10351_v63, %v5281_v5  ;;  %v5308_v61 = vmul.f32 %v10359_v12, %v5294_v38  ;;  %v5335_v41 = vadd.f32 %v10073_v56, %v5319_v51 }
 0x65b   :  { %v5402_v10 = vcombine.low %v5333_v20, %v5334_v6  ;;  %v5320_v22 = vadd.f32 %v5306_v1, %v5250_v57  ;;  %vm5447_vm2 = vcmp.lt.s32.totalorder %v11374_v42, 768 }
 0x65c   :  { %v5321_v44 = vadd.f32 %v5307_v19, %v5251_v37  ;;  %v5322_v46 = vadd.f32 %v5308_v61, %v5252_v36 }
 0x65d   :  { %v5336_v25 = vadd.f32 %v10073_v56, %v5320_v22  ;;  %v5411_v58 = vrot.slane %v5402_v10, %v10283_v18 }
 0x65e   :  { %v5337_v33 = vadd.f32 %v10073_v56, %v5321_v44  ;;  %v5338_v7 = vadd.f32 %v10073_v56, %v5322_v46 }
 0x65f   :  { %v5403_v53 = vcombine.low %v5335_v41, %v5336_v25 }
 0x660   :  { %v5404_v28 = vcombine.low %v5337_v33, %v5338_v7 }
 0x661   :  { %v5418_v63 = vrot.slane %v5403_v53, %v10283_v18 }
 0x662   :  { %v5425_v12 = vrot.slane %v5404_v28, %v10283_v18 }
 0x663   :  { %v5426_v4 = vcombine.low %v5411_v58, %v5418_v63 }
 0x664   :  { %v5440_v55 = vrot.slane %v5425_v12, %v10283_v18 }
 0x665   :  { %v5433_v30 = vrot.slane %v5426_v4, %v10283_v18 }
 0x667   :  { %v5441_v23 = vcombine.low %v5433_v30, %v5440_v55 }
 0x669   :  { %5449 = vst.msk [vmem:[%s10559_s12 + $0x8] sm:$0x3f] %vm5447_vm2, %v5441_v23 }
 0x66a   :  { %5454 = vsyncpa [#allocation4], 1 }
 0x66b   :  { %5455 = vsyncpa [#allocation6], 1 }

</bundles_post_ra>
